<compile_context>
chip_gen: v7x
topology: tpu7x:2x2x1
jax: 0.10.0
libtpu: 0.0.40
codegen_flags: <defaults>
</compile_context>

<pallas_src>
import functools

import jax
import jax.numpy as jnp
from jax.experimental import pallas as pl
from jax.experimental.pallas import tpu as pltpu


def _illum_kernel(L_ref, R_ref, w1_ref, b1_ref, w2_ref, b2_ref, w3_ref, b3_ref,
                  o_ref, *, H, W):
    """Fused conv1(relu) -> conv2(relu) -> conv3(sigmoid) for one image.

    L_ref, R_ref : (1, 1, H*W)  input planes, flattened spatial in lanes
    w1_ref       : (9, 32, 2)   conv1 per-tap (Cout, Cin), tap index = kh*3+kw
    b1_ref       : (32, 1)
    w2_ref       : (9, 32, 32)  conv2 per-tap (Cout, Cin)
    b2_ref       : (32, 1)
    w3_ref       : (9, 32, 1)   conv3 per-tap (Cin, 1) columns
    b3_ref       : (1, 1)
    o_ref        : (1, 1, H*W)  sigmoid output, lane-dense
    """
    f32 = jnp.float32
    HW = H * W
    PAD = W + 1  # widest tap offset is +-(W+1)

    # Column-validity masks (depend only on kw); hoisted out of all tap loops.
    col = jax.lax.broadcasted_iota(jnp.int32, (1, HW), 1) % W
    col_mask = {0: (col >= 1).astype(f32),        # dw = -1
                1: None,                           # dw =  0
                2: (col <= (W - 2)).astype(f32)}   # dw = +1

    def pad_flat(x):
        """(C, HW) -> (C, HW + 2*PAD) with zero margins ('same' padding, flat)."""
        z = jnp.zeros((x.shape[0], PAD), f32)
        return jnp.concatenate([z, x, z], axis=-1)

    def tap(xpad, kh, kw):
        """Shifted view for (dh, dw) = (kh-1, kw-1); out-of-image taps are 0."""
        off = (kh - 1) * W + (kw - 1)
        s = xpad[:, PAD + off: PAD + off + HW]
        m = col_mask[kw]
        return s if m is None else s * m

    # ---- conv1 (Cin=2): 9 taps, VPU broadcast-mul accumulate over 2 planes.
    Lp = pad_flat(L_ref[0].astype(f32))            # (1, HW + 2*PAD)
    Rp = pad_flat(R_ref[0].astype(f32))
    acc1 = jnp.zeros((32, HW), f32)
    for kh in range(3):
        for kw in range(3):
            t = kh * 3 + kw
            w1t = w1_ref[t]                        # (32, 2)
            acc1 = acc1 + w1t[:, 0:1] * tap(Lp, kh, kw)
            acc1 = acc1 + w1t[:, 1:2] * tap(Rp, kh, kw)
    a1 = jnp.maximum(acc1 + b1_ref[...], 0.0)      # (32, HW)

    # ---- conv2 (32->32): 9 accumulated (32,32) x (32,HW) MXU matmuls.
    a1p = pad_flat(a1)                             # (32, HW + 2*PAD)
    acc2 = jnp.zeros((32, HW), f32)
    for kh in range(3):
        for kw in range(3):
            t = kh * 3 + kw
            acc2 = acc2 + jnp.dot(w2_ref[t], tap(a1p, kh, kw),
                                  preferred_element_type=f32)
    a2 = jnp.maximum(acc2 + b2_ref[...], 0.0)      # (32, HW)

    # ---- conv3 (Cout=1): 9 broadcast-mul taps, one sublane reduce at the end.
    a2p = pad_flat(a2)
    acc3 = jnp.zeros((32, HW), f32)
    for kh in range(3):
        for kw in range(3):
            t = kh * 3 + kw
            acc3 = acc3 + w3_ref[t] * tap(a2p, kh, kw)   # (32,1) * (32,HW)
    y = jnp.sum(acc3, axis=0, keepdims=True) + b3_ref[...]   # (1, HW)
    o_ref[0] = jax.nn.sigmoid(y).astype(o_ref.dtype)


def _illum_pallas(L, R, w1k, b1c, w2k, b2c, w3k, b3c, H, W):
    """L, R: (N, 1, H*W) f32 -> (N, 1, H*W) f32."""
    N, _, HW = L.shape
    kernel = functools.partial(_illum_kernel, H=H, W=W)
    grid_spec = pltpu.PrefetchScalarGridSpec(
        num_scalar_prefetch=0,
        grid=(N,),
        in_specs=[
            pl.BlockSpec((1, 1, HW), lambda n: (n, 0, 0)),
            pl.BlockSpec((1, 1, HW), lambda n: (n, 0, 0)),
            pl.BlockSpec(w1k.shape, lambda n: (0, 0, 0)),
            pl.BlockSpec(b1c.shape, lambda n: (0, 0)),
            pl.BlockSpec(w2k.shape, lambda n: (0, 0, 0)),
            pl.BlockSpec(b2c.shape, lambda n: (0, 0)),
            pl.BlockSpec(w3k.shape, lambda n: (0, 0, 0)),
            pl.BlockSpec(b3c.shape, lambda n: (0, 0)),
        ],
        out_specs=pl.BlockSpec((1, 1, HW), lambda n: (n, 0, 0)),
    )
    return pl.pallas_call(
        kernel,
        out_shape=jax.ShapeDtypeStruct((N, 1, HW), jnp.float32),
        grid_spec=grid_spec,
        compiler_params=pltpu.CompilerParams(
            dimension_semantics=("parallel",),
        ),
    )(L, R, w1k, b1c, w2k, b2c, w3k, b3c)


def init_params(key):
    """Deterministic init matching PyTorch Conv2d default. Weights are HWIO."""
    keys = jax.random.split(key, 6)

    def conv_init(kw_key, kb_key, cin, cout):
        fan_in = cin * 3 * 3
        bound = 1.0 / jnp.sqrt(float(fan_in))
        w = jax.random.uniform(kw_key, (3, 3, cin, cout), jnp.float32,
                               minval=-bound, maxval=bound)
        b = jax.random.uniform(kb_key, (cout,), jnp.float32,
                               minval=-bound, maxval=bound)
        return w, b

    w1, b1 = conv_init(keys[0], keys[1], 2, 32)
    w2, b2 = conv_init(keys[2], keys[3], 32, 32)
    w3, b3 = conv_init(keys[4], keys[5], 32, 1)
    return (w1, b1, w2, b2, w3, b3)


def illum_forward(params, input_L, ratio):
    """input_L, ratio: NCHW (N,1,H,W) f32 -> NCHW (N,1,H,W) f32."""
    # NOTE: weights here are HWIO; PyTorch OIHW weights must be transposed
    # (2, 3, 1, 0) before use.
    w1, b1, w2, b2, w3, b3 = params
    N, _, H, W = input_L.shape
    # NCHW with C=1 <-> (N,1,H*W) are pure reshapes (lane-dense I/O blocks).
    L = input_L.reshape(N, 1, H * W).astype(jnp.float32)
    R = ratio.reshape(N, 1, H * W).astype(jnp.float32)
    # Per-tap (Cout, Cin) weight blocks in (kh, kw) raster order.
    w1k = jnp.transpose(w1, (0, 1, 3, 2)).reshape(9, 32, 2)
    w2k = jnp.transpose(w2, (0, 1, 3, 2)).reshape(9, 32, 32)
    w3k = w3.reshape(9, 32, 1)
    b1c = b1.reshape(32, 1)
    b2c = b2.reshape(32, 1)
    b3c = b3.reshape(1, 1)
    out = _illum_pallas(L, R, w1k, b1c, w2k, b2c, w3k, b3c, H, W)  # (N,1,H*W)
    return out.reshape(N, 1, H, W)


def illum_reference(params, input_L, ratio):
    """Pure-JAX reference (lax.conv) matching the PyTorch module."""
    w1, b1, w2, b2, w3, b3 = params
    x = jnp.concatenate([input_L, ratio], axis=1)
    x = jnp.transpose(x, (0, 2, 3, 1))  # NHWC

    def conv(x, w, b):
        y = jax.lax.conv_general_dilated(
            x, w, window_strides=(1, 1), padding=((1, 1), (1, 1)),
            dimension_numbers=("NHWC", "HWIO", "NHWC"),
            precision=jax.lax.Precision.HIGHEST)
        return y + b[None, None, None, :]

    x = jax.nn.relu(conv(x, w1, b1))
    x = jax.nn.relu(conv(x, w2, b2))
    x = jax.nn.sigmoid(conv(x, w3, b3))
    return jnp.transpose(x, (0, 3, 1, 2))


if __name__ == "__main__":
    key = jax.random.PRNGKey(0)
    k_param, k_l, k_r = jax.random.split(key, 3)

    N, H, W = 2, 16, 16
    input_L = jax.random.uniform(k_l, (N, 1, H, W), jnp.float32)
    ratio = jax.random.uniform(k_r, (N, 1, H, W), jnp.float32)

    params = init_params(k_param)

    fwd = jax.jit(illum_forward)
    out = fwd(params, input_L, ratio)
    jax.block_until_ready(out)

    assert out.shape == (N, 1, H, W), out.shape
    assert out.dtype == jnp.float32
    assert bool(jnp.all(out >= 0.0)) and bool(jnp.all(out <= 1.0))

    ref = illum_reference(params, input_L, ratio)
    err = float(jnp.max(jnp.abs(out - ref)))
    assert err < 5e-3, f"max abs error vs reference: {err}"

    print("KERNEL_OK")
</pallas_src>

<mosaic_0001>
module attributes {stable_mosaic.version = 11 : i64} {
  func.func @_illum_kernel(%arg0: i32, %arg1: memref<1x1x256xf32, #tpu.memory_space<vmem>>, %arg2: memref<1x1x256xf32, #tpu.memory_space<vmem>>, %arg3: memref<9x32x2xf32, #tpu.memory_space<vmem>>, %arg4: memref<32x1xf32, #tpu.memory_space<vmem>>, %arg5: memref<9x32x32xf32, #tpu.memory_space<vmem>>, %arg6: memref<32x1xf32, #tpu.memory_space<vmem>>, %arg7: memref<9x32x1xf32, #tpu.memory_space<vmem>>, %arg8: memref<1x1xf32, #tpu.memory_space<vmem>>, %arg9: memref<1x1x256xf32, #tpu.memory_space<vmem>>) attributes {dimension_semantics = [#tpu.dimension_semantics<parallel>], iteration_bounds = array<i64: 2>, scalar_prefetch = 0 : i64, scratch_operands = 0 : i64, tpu.core_type = #tpu.core_type<tc>, window_params = [{transform_indices = @transform_0, window_bounds = array<i64: 1, 1, 256>}, {transform_indices = @transform_1, window_bounds = array<i64: 1, 1, 256>}, {pipeline_mode = #tpu.pipeline_mode<synchronous>, transform_indices = @transform_2, window_bounds = array<i64: 9, 32, 2>}, {pipeline_mode = #tpu.pipeline_mode<synchronous>, transform_indices = @transform_3, window_bounds = array<i64: 32, 1>}, {pipeline_mode = #tpu.pipeline_mode<synchronous>, transform_indices = @transform_4, window_bounds = array<i64: 9, 32, 32>}, {pipeline_mode = #tpu.pipeline_mode<synchronous>, transform_indices = @transform_5, window_bounds = array<i64: 32, 1>}, {pipeline_mode = #tpu.pipeline_mode<synchronous>, transform_indices = @transform_6, window_bounds = array<i64: 9, 32, 1>}, {pipeline_mode = #tpu.pipeline_mode<synchronous>, transform_indices = @transform_7, window_bounds = array<i64: 1, 1>}, {transform_indices = @transform_8, window_bounds = array<i64: 1, 1, 256>}]} {
    %0 = tpu.iota {dimensions = array<i32: 1>} : vector<1x256xi32>
    %c16_i32 = arith.constant 16 : i32
    %c0_i32 = arith.constant 0 : i32
    %1 = arith.cmpi eq, %c16_i32, %c0_i32 : i32
    %c1_i32 = arith.constant 1 : i32
    %2 = arith.select %1, %c1_i32, %c16_i32 : i32
    %3 = vector.broadcast %2 : i32 to vector<1x256xi32>
    %4 = arith.remsi %0, %3 : vector<1x256xi32>
    %c0_i32_0 = arith.constant 0 : i32
    %5 = vector.broadcast %c0_i32_0 : i32 to vector<1x256xi32>
    %6 = arith.cmpi ne, %4, %5 : vector<1x256xi32>
    %c0_i32_1 = arith.constant 0 : i32
    %7 = vector.broadcast %c0_i32_1 : i32 to vector<1x256xi32>
    %8 = arith.cmpi slt, %4, %7 : vector<1x256xi32>
    %c0_i32_2 = arith.constant 0 : i32
    %9 = arith.cmpi slt, %2, %c0_i32_2 : i32
    %10 = vector.broadcast %9 : i1 to vector<1x256xi1>
    %11 = vector.broadcast %10 : vector<1x256xi1> to vector<1x256xi1>
    %12 = arith.xori %8, %11 : vector<1x256xi1>
    %13 = arith.andi %12, %6 : vector<1x256xi1>
    %14 = vector.broadcast %2 : i32 to vector<1x256xi32>
    %15 = arith.addi %4, %14 : vector<1x256xi32>
    %16 = arith.select %13, %15, %4 : vector<1x256xi1>, vector<1x256xi32>
    %c1_i32_3 = arith.constant 1 : i32
    %17 = vector.broadcast %c1_i32_3 : i32 to vector<1x256xi32>
    %18 = arith.cmpi sge, %16, %17 : vector<1x256xi32>
    %19 = arith.extui %18 : vector<1x256xi1> to vector<1x256xi32>
    %20 = arith.sitofp %19 : vector<1x256xi32> to vector<1x256xf32>
    %c14_i32 = arith.constant 14 : i32
    %21 = vector.broadcast %c14_i32 : i32 to vector<1x256xi32>
    %22 = arith.cmpi sle, %16, %21 : vector<1x256xi32>
    %23 = arith.extui %22 : vector<1x256xi1> to vector<1x256xi32>
    %24 = arith.sitofp %23 : vector<1x256xi32> to vector<1x256xf32>
    %c0 = arith.constant 0 : index
    %c0_4 = arith.constant 0 : index
    %c0_5 = arith.constant 0 : index
    %25 = vector.load %arg1[%c0, %c0_4, %c0_5] : memref<1x1x256xf32, #tpu.memory_space<vmem>>, vector<1x1x256xf32>
    %26 = vector.shape_cast %25 : vector<1x1x256xf32> to vector<1x256xf32>
    %cst = arith.constant 0.000000e+00 : f32
    %27 = vector.broadcast %cst : f32 to vector<1x17xf32>
    %28 = tpu.concatenate %27, %26, %27 in 1 : vector<1x17xf32>, vector<1x256xf32>, vector<1x17xf32> -> vector<1x290xf32>
    %c0_6 = arith.constant 0 : index
    %c0_7 = arith.constant 0 : index
    %c0_8 = arith.constant 0 : index
    %29 = vector.load %arg2[%c0_6, %c0_7, %c0_8] : memref<1x1x256xf32, #tpu.memory_space<vmem>>, vector<1x1x256xf32>
    %30 = vector.shape_cast %29 : vector<1x1x256xf32> to vector<1x256xf32>
    %cst_9 = arith.constant 0.000000e+00 : f32
    %31 = vector.broadcast %cst_9 : f32 to vector<1x17xf32>
    %32 = tpu.concatenate %31, %30, %31 in 1 : vector<1x17xf32>, vector<1x256xf32>, vector<1x17xf32> -> vector<1x290xf32>
    %cst_10 = arith.constant 0.000000e+00 : f32
    %33 = vector.broadcast %cst_10 : f32 to vector<32x256xf32>
    %c0_11 = arith.constant 0 : index
    %c0_12 = arith.constant 0 : index
    %c0_13 = arith.constant 0 : index
    %34 = vector.load %arg3[%c0_11, %c0_12, %c0_13] : memref<9x32x2xf32, #tpu.memory_space<vmem>>, vector<1x32x2xf32>
    %35 = vector.shape_cast %34 : vector<1x32x2xf32> to vector<32x2xf32>
    %36 = vector.extract_strided_slice %35 {offsets = [0, 0], sizes = [32, 1], strides = [1, 1]} : vector<32x2xf32> to vector<32x1xf32>
    %37 = vector.extract_strided_slice %28 {offsets = [0, 0], sizes = [1, 256], strides = [1, 1]} : vector<1x290xf32> to vector<1x256xf32>
    %38 = arith.mulf %37, %20 : vector<1x256xf32>
    %39 = vector.broadcast %36 : vector<32x1xf32> to vector<32x256xf32>
    %40 = vector.broadcast %38 : vector<1x256xf32> to vector<32x256xf32>
    %41 = arith.mulf %39, %40 : vector<32x256xf32>
    %42 = arith.addf %33, %41 : vector<32x256xf32>
    %43 = vector.extract_strided_slice %35 {offsets = [0, 1], sizes = [32, 1], strides = [1, 1]} : vector<32x2xf32> to vector<32x1xf32>
    %44 = vector.extract_strided_slice %32 {offsets = [0, 0], sizes = [1, 256], strides = [1, 1]} : vector<1x290xf32> to vector<1x256xf32>
    %45 = arith.mulf %44, %20 : vector<1x256xf32>
    %46 = vector.broadcast %43 : vector<32x1xf32> to vector<32x256xf32>
    %47 = vector.broadcast %45 : vector<1x256xf32> to vector<32x256xf32>
    %48 = arith.mulf %46, %47 : vector<32x256xf32>
    %49 = arith.addf %42, %48 : vector<32x256xf32>
    %c1 = arith.constant 1 : index
    %c0_14 = arith.constant 0 : index
    %c0_15 = arith.constant 0 : index
    %50 = vector.load %arg3[%c1, %c0_14, %c0_15] : memref<9x32x2xf32, #tpu.memory_space<vmem>>, vector<1x32x2xf32>
    %51 = vector.shape_cast %50 : vector<1x32x2xf32> to vector<32x2xf32>
    %52 = vector.extract_strided_slice %51 {offsets = [0, 0], sizes = [32, 1], strides = [1, 1]} : vector<32x2xf32> to vector<32x1xf32>
    %53 = vector.extract_strided_slice %28 {offsets = [0, 1], sizes = [1, 256], strides = [1, 1]} : vector<1x290xf32> to vector<1x256xf32>
    %54 = vector.broadcast %52 : vector<32x1xf32> to vector<32x256xf32>
    %55 = vector.broadcast %53 : vector<1x256xf32> to vector<32x256xf32>
    %56 = arith.mulf %54, %55 : vector<32x256xf32>
    %57 = arith.addf %49, %56 : vector<32x256xf32>
    %58 = vector.extract_strided_slice %51 {offsets = [0, 1], sizes = [32, 1], strides = [1, 1]} : vector<32x2xf32> to vector<32x1xf32>
    %59 = vector.extract_strided_slice %32 {offsets = [0, 1], sizes = [1, 256], strides = [1, 1]} : vector<1x290xf32> to vector<1x256xf32>
    %60 = vector.broadcast %58 : vector<32x1xf32> to vector<32x256xf32>
    %61 = vector.broadcast %59 : vector<1x256xf32> to vector<32x256xf32>
    %62 = arith.mulf %60, %61 : vector<32x256xf32>
    %63 = arith.addf %57, %62 : vector<32x256xf32>
    %c2 = arith.constant 2 : index
    %c0_16 = arith.constant 0 : index
    %c0_17 = arith.constant 0 : index
    %64 = vector.load %arg3[%c2, %c0_16, %c0_17] : memref<9x32x2xf32, #tpu.memory_space<vmem>>, vector<1x32x2xf32>
    %65 = vector.shape_cast %64 : vector<1x32x2xf32> to vector<32x2xf32>
    %66 = vector.extract_strided_slice %65 {offsets = [0, 0], sizes = [32, 1], strides = [1, 1]} : vector<32x2xf32> to vector<32x1xf32>
    %67 = vector.extract_strided_slice %28 {offsets = [0, 2], sizes = [1, 256], strides = [1, 1]} : vector<1x290xf32> to vector<1x256xf32>
    %68 = arith.mulf %67, %24 : vector<1x256xf32>
    %69 = vector.broadcast %66 : vector<32x1xf32> to vector<32x256xf32>
    %70 = vector.broadcast %68 : vector<1x256xf32> to vector<32x256xf32>
    %71 = arith.mulf %69, %70 : vector<32x256xf32>
    %72 = arith.addf %63, %71 : vector<32x256xf32>
    %73 = vector.extract_strided_slice %65 {offsets = [0, 1], sizes = [32, 1], strides = [1, 1]} : vector<32x2xf32> to vector<32x1xf32>
    %74 = vector.extract_strided_slice %32 {offsets = [0, 2], sizes = [1, 256], strides = [1, 1]} : vector<1x290xf32> to vector<1x256xf32>
    %75 = arith.mulf %74, %24 : vector<1x256xf32>
    %76 = vector.broadcast %73 : vector<32x1xf32> to vector<32x256xf32>
    %77 = vector.broadcast %75 : vector<1x256xf32> to vector<32x256xf32>
    %78 = arith.mulf %76, %77 : vector<32x256xf32>
    %79 = arith.addf %72, %78 : vector<32x256xf32>
    %c3 = arith.constant 3 : index
    %c0_18 = arith.constant 0 : index
    %c0_19 = arith.constant 0 : index
    %80 = vector.load %arg3[%c3, %c0_18, %c0_19] : memref<9x32x2xf32, #tpu.memory_space<vmem>>, vector<1x32x2xf32>
    %81 = vector.shape_cast %80 : vector<1x32x2xf32> to vector<32x2xf32>
    %82 = vector.extract_strided_slice %81 {offsets = [0, 0], sizes = [32, 1], strides = [1, 1]} : vector<32x2xf32> to vector<32x1xf32>
    %83 = vector.extract_strided_slice %28 {offsets = [0, 16], sizes = [1, 256], strides = [1, 1]} : vector<1x290xf32> to vector<1x256xf32>
    %84 = arith.mulf %83, %20 : vector<1x256xf32>
    %85 = vector.broadcast %82 : vector<32x1xf32> to vector<32x256xf32>
    %86 = vector.broadcast %84 : vector<1x256xf32> to vector<32x256xf32>
    %87 = arith.mulf %85, %86 : vector<32x256xf32>
    %88 = arith.addf %79, %87 : vector<32x256xf32>
    %89 = vector.extract_strided_slice %81 {offsets = [0, 1], sizes = [32, 1], strides = [1, 1]} : vector<32x2xf32> to vector<32x1xf32>
    %90 = vector.extract_strided_slice %32 {offsets = [0, 16], sizes = [1, 256], strides = [1, 1]} : vector<1x290xf32> to vector<1x256xf32>
    %91 = arith.mulf %90, %20 : vector<1x256xf32>
    %92 = vector.broadcast %89 : vector<32x1xf32> to vector<32x256xf32>
    %93 = vector.broadcast %91 : vector<1x256xf32> to vector<32x256xf32>
    %94 = arith.mulf %92, %93 : vector<32x256xf32>
    %95 = arith.addf %88, %94 : vector<32x256xf32>
    %c4 = arith.constant 4 : index
    %c0_20 = arith.constant 0 : index
    %c0_21 = arith.constant 0 : index
    %96 = vector.load %arg3[%c4, %c0_20, %c0_21] : memref<9x32x2xf32, #tpu.memory_space<vmem>>, vector<1x32x2xf32>
    %97 = vector.shape_cast %96 : vector<1x32x2xf32> to vector<32x2xf32>
    %98 = vector.extract_strided_slice %97 {offsets = [0, 0], sizes = [32, 1], strides = [1, 1]} : vector<32x2xf32> to vector<32x1xf32>
    %99 = vector.extract_strided_slice %28 {offsets = [0, 17], sizes = [1, 256], strides = [1, 1]} : vector<1x290xf32> to vector<1x256xf32>
    %100 = vector.broadcast %98 : vector<32x1xf32> to vector<32x256xf32>
    %101 = vector.broadcast %99 : vector<1x256xf32> to vector<32x256xf32>
    %102 = arith.mulf %100, %101 : vector<32x256xf32>
    %103 = arith.addf %95, %102 : vector<32x256xf32>
    %104 = vector.extract_strided_slice %97 {offsets = [0, 1], sizes = [32, 1], strides = [1, 1]} : vector<32x2xf32> to vector<32x1xf32>
    %105 = vector.extract_strided_slice %32 {offsets = [0, 17], sizes = [1, 256], strides = [1, 1]} : vector<1x290xf32> to vector<1x256xf32>
    %106 = vector.broadcast %104 : vector<32x1xf32> to vector<32x256xf32>
    %107 = vector.broadcast %105 : vector<1x256xf32> to vector<32x256xf32>
    %108 = arith.mulf %106, %107 : vector<32x256xf32>
    %109 = arith.addf %103, %108 : vector<32x256xf32>
    %c5 = arith.constant 5 : index
    %c0_22 = arith.constant 0 : index
    %c0_23 = arith.constant 0 : index
    %110 = vector.load %arg3[%c5, %c0_22, %c0_23] : memref<9x32x2xf32, #tpu.memory_space<vmem>>, vector<1x32x2xf32>
    %111 = vector.shape_cast %110 : vector<1x32x2xf32> to vector<32x2xf32>
    %112 = vector.extract_strided_slice %111 {offsets = [0, 0], sizes = [32, 1], strides = [1, 1]} : vector<32x2xf32> to vector<32x1xf32>
    %113 = vector.extract_strided_slice %28 {offsets = [0, 18], sizes = [1, 256], strides = [1, 1]} : vector<1x290xf32> to vector<1x256xf32>
    %114 = arith.mulf %113, %24 : vector<1x256xf32>
    %115 = vector.broadcast %112 : vector<32x1xf32> to vector<32x256xf32>
    %116 = vector.broadcast %114 : vector<1x256xf32> to vector<32x256xf32>
    %117 = arith.mulf %115, %116 : vector<32x256xf32>
    %118 = arith.addf %109, %117 : vector<32x256xf32>
    %119 = vector.extract_strided_slice %111 {offsets = [0, 1], sizes = [32, 1], strides = [1, 1]} : vector<32x2xf32> to vector<32x1xf32>
    %120 = vector.extract_strided_slice %32 {offsets = [0, 18], sizes = [1, 256], strides = [1, 1]} : vector<1x290xf32> to vector<1x256xf32>
    %121 = arith.mulf %120, %24 : vector<1x256xf32>
    %122 = vector.broadcast %119 : vector<32x1xf32> to vector<32x256xf32>
    %123 = vector.broadcast %121 : vector<1x256xf32> to vector<32x256xf32>
    %124 = arith.mulf %122, %123 : vector<32x256xf32>
    %125 = arith.addf %118, %124 : vector<32x256xf32>
    %c6 = arith.constant 6 : index
    %c0_24 = arith.constant 0 : index
    %c0_25 = arith.constant 0 : index
    %126 = vector.load %arg3[%c6, %c0_24, %c0_25] : memref<9x32x2xf32, #tpu.memory_space<vmem>>, vector<1x32x2xf32>
    %127 = vector.shape_cast %126 : vector<1x32x2xf32> to vector<32x2xf32>
    %128 = vector.extract_strided_slice %127 {offsets = [0, 0], sizes = [32, 1], strides = [1, 1]} : vector<32x2xf32> to vector<32x1xf32>
    %129 = vector.extract_strided_slice %28 {offsets = [0, 32], sizes = [1, 256], strides = [1, 1]} : vector<1x290xf32> to vector<1x256xf32>
    %130 = arith.mulf %129, %20 : vector<1x256xf32>
    %131 = vector.broadcast %128 : vector<32x1xf32> to vector<32x256xf32>
    %132 = vector.broadcast %130 : vector<1x256xf32> to vector<32x256xf32>
    %133 = arith.mulf %131, %132 : vector<32x256xf32>
    %134 = arith.addf %125, %133 : vector<32x256xf32>
    %135 = vector.extract_strided_slice %127 {offsets = [0, 1], sizes = [32, 1], strides = [1, 1]} : vector<32x2xf32> to vector<32x1xf32>
    %136 = vector.extract_strided_slice %32 {offsets = [0, 32], sizes = [1, 256], strides = [1, 1]} : vector<1x290xf32> to vector<1x256xf32>
    %137 = arith.mulf %136, %20 : vector<1x256xf32>
    %138 = vector.broadcast %135 : vector<32x1xf32> to vector<32x256xf32>
    %139 = vector.broadcast %137 : vector<1x256xf32> to vector<32x256xf32>
    %140 = arith.mulf %138, %139 : vector<32x256xf32>
    %141 = arith.addf %134, %140 : vector<32x256xf32>
    %c7 = arith.constant 7 : index
    %c0_26 = arith.constant 0 : index
    %c0_27 = arith.constant 0 : index
    %142 = vector.load %arg3[%c7, %c0_26, %c0_27] : memref<9x32x2xf32, #tpu.memory_space<vmem>>, vector<1x32x2xf32>
    %143 = vector.shape_cast %142 : vector<1x32x2xf32> to vector<32x2xf32>
    %144 = vector.extract_strided_slice %143 {offsets = [0, 0], sizes = [32, 1], strides = [1, 1]} : vector<32x2xf32> to vector<32x1xf32>
    %145 = vector.extract_strided_slice %28 {offsets = [0, 33], sizes = [1, 256], strides = [1, 1]} : vector<1x290xf32> to vector<1x256xf32>
    %146 = vector.broadcast %144 : vector<32x1xf32> to vector<32x256xf32>
    %147 = vector.broadcast %145 : vector<1x256xf32> to vector<32x256xf32>
    %148 = arith.mulf %146, %147 : vector<32x256xf32>
    %149 = arith.addf %141, %148 : vector<32x256xf32>
    %150 = vector.extract_strided_slice %143 {offsets = [0, 1], sizes = [32, 1], strides = [1, 1]} : vector<32x2xf32> to vector<32x1xf32>
    %151 = vector.extract_strided_slice %32 {offsets = [0, 33], sizes = [1, 256], strides = [1, 1]} : vector<1x290xf32> to vector<1x256xf32>
    %152 = vector.broadcast %150 : vector<32x1xf32> to vector<32x256xf32>
    %153 = vector.broadcast %151 : vector<1x256xf32> to vector<32x256xf32>
    %154 = arith.mulf %152, %153 : vector<32x256xf32>
    %155 = arith.addf %149, %154 : vector<32x256xf32>
    %c8 = arith.constant 8 : index
    %c0_28 = arith.constant 0 : index
    %c0_29 = arith.constant 0 : index
    %156 = vector.load %arg3[%c8, %c0_28, %c0_29] : memref<9x32x2xf32, #tpu.memory_space<vmem>>, vector<1x32x2xf32>
    %157 = vector.shape_cast %156 : vector<1x32x2xf32> to vector<32x2xf32>
    %158 = vector.extract_strided_slice %157 {offsets = [0, 0], sizes = [32, 1], strides = [1, 1]} : vector<32x2xf32> to vector<32x1xf32>
    %159 = vector.extract_strided_slice %28 {offsets = [0, 34], sizes = [1, 256], strides = [1, 1]} : vector<1x290xf32> to vector<1x256xf32>
    %160 = arith.mulf %159, %24 : vector<1x256xf32>
    %161 = vector.broadcast %158 : vector<32x1xf32> to vector<32x256xf32>
    %162 = vector.broadcast %160 : vector<1x256xf32> to vector<32x256xf32>
    %163 = arith.mulf %161, %162 : vector<32x256xf32>
    %164 = arith.addf %155, %163 : vector<32x256xf32>
    %165 = vector.extract_strided_slice %157 {offsets = [0, 1], sizes = [32, 1], strides = [1, 1]} : vector<32x2xf32> to vector<32x1xf32>
    %166 = vector.extract_strided_slice %32 {offsets = [0, 34], sizes = [1, 256], strides = [1, 1]} : vector<1x290xf32> to vector<1x256xf32>
    %167 = arith.mulf %166, %24 : vector<1x256xf32>
    %168 = vector.broadcast %165 : vector<32x1xf32> to vector<32x256xf32>
    %169 = vector.broadcast %167 : vector<1x256xf32> to vector<32x256xf32>
    %170 = arith.mulf %168, %169 : vector<32x256xf32>
    %171 = arith.addf %164, %170 : vector<32x256xf32>
    %c0_30 = arith.constant 0 : index
    %c0_31 = arith.constant 0 : index
    %172 = vector.load %arg4[%c0_30, %c0_31] : memref<32x1xf32, #tpu.memory_space<vmem>>, vector<32x1xf32>
    %173 = vector.broadcast %172 : vector<32x1xf32> to vector<32x256xf32>
    %174 = arith.addf %171, %173 : vector<32x256xf32>
    %cst_32 = arith.constant 0.000000e+00 : f32
    %175 = vector.broadcast %cst_32 : f32 to vector<32x256xf32>
    %176 = arith.maximumf %174, %175 : vector<32x256xf32>
    %cst_33 = arith.constant 0.000000e+00 : f32
    %177 = vector.broadcast %cst_33 : f32 to vector<32x17xf32>
    %178 = tpu.concatenate %177, %176, %177 in 1 : vector<32x17xf32>, vector<32x256xf32>, vector<32x17xf32> -> vector<32x290xf32>
    %cst_34 = arith.constant 0.000000e+00 : f32
    %179 = vector.broadcast %cst_34 : f32 to vector<32x256xf32>
    %c0_35 = arith.constant 0 : index
    %c0_36 = arith.constant 0 : index
    %c0_37 = arith.constant 0 : index
    %180 = vector.load %arg5[%c0_35, %c0_36, %c0_37] : memref<9x32x32xf32, #tpu.memory_space<vmem>>, vector<1x32x32xf32>
    %181 = vector.shape_cast %180 : vector<1x32x32xf32> to vector<32x32xf32>
    %182 = vector.extract_strided_slice %178 {offsets = [0, 0], sizes = [32, 256], strides = [1, 1]} : vector<32x290xf32> to vector<32x256xf32>
    %183 = vector.broadcast %20 : vector<1x256xf32> to vector<32x256xf32>
    %184 = arith.mulf %182, %183 : vector<32x256xf32>
    %cst_38 = arith.constant dense<0.000000e+00> : vector<32x256xf32>
    %185 = tpu.matmul %181, %184, %cst_38 {dimension_numbers = #tpu.dot_dimension_numbers<[1], [0], [0], [1], [0, 0, 1, 1], [], []>} : vector<32x32xf32>, vector<32x256xf32>, vector<32x256xf32> -> vector<32x256xf32>
    %186 = arith.addf %179, %185 : vector<32x256xf32>
    %c1_39 = arith.constant 1 : index
    %c0_40 = arith.constant 0 : index
    %c0_41 = arith.constant 0 : index
    %187 = vector.load %arg5[%c1_39, %c0_40, %c0_41] : memref<9x32x32xf32, #tpu.memory_space<vmem>>, vector<1x32x32xf32>
    %188 = vector.shape_cast %187 : vector<1x32x32xf32> to vector<32x32xf32>
    %189 = vector.extract_strided_slice %178 {offsets = [0, 1], sizes = [32, 256], strides = [1, 1]} : vector<32x290xf32> to vector<32x256xf32>
    %cst_42 = arith.constant dense<0.000000e+00> : vector<32x256xf32>
    %190 = tpu.matmul %188, %189, %cst_42 {dimension_numbers = #tpu.dot_dimension_numbers<[1], [0], [0], [1], [0, 0, 1, 1], [], []>} : vector<32x32xf32>, vector<32x256xf32>, vector<32x256xf32> -> vector<32x256xf32>
    %191 = arith.addf %186, %190 : vector<32x256xf32>
    %c2_43 = arith.constant 2 : index
    %c0_44 = arith.constant 0 : index
    %c0_45 = arith.constant 0 : index
    %192 = vector.load %arg5[%c2_43, %c0_44, %c0_45] : memref<9x32x32xf32, #tpu.memory_space<vmem>>, vector<1x32x32xf32>
    %193 = vector.shape_cast %192 : vector<1x32x32xf32> to vector<32x32xf32>
    %194 = vector.extract_strided_slice %178 {offsets = [0, 2], sizes = [32, 256], strides = [1, 1]} : vector<32x290xf32> to vector<32x256xf32>
    %195 = vector.broadcast %24 : vector<1x256xf32> to vector<32x256xf32>
    %196 = arith.mulf %194, %195 : vector<32x256xf32>
    %cst_46 = arith.constant dense<0.000000e+00> : vector<32x256xf32>
    %197 = tpu.matmul %193, %196, %cst_46 {dimension_numbers = #tpu.dot_dimension_numbers<[1], [0], [0], [1], [0, 0, 1, 1], [], []>} : vector<32x32xf32>, vector<32x256xf32>, vector<32x256xf32> -> vector<32x256xf32>
    %198 = arith.addf %191, %197 : vector<32x256xf32>
    %c3_47 = arith.constant 3 : index
    %c0_48 = arith.constant 0 : index
    %c0_49 = arith.constant 0 : index
    %199 = vector.load %arg5[%c3_47, %c0_48, %c0_49] : memref<9x32x32xf32, #tpu.memory_space<vmem>>, vector<1x32x32xf32>
    %200 = vector.shape_cast %199 : vector<1x32x32xf32> to vector<32x32xf32>
    %201 = vector.extract_strided_slice %178 {offsets = [0, 16], sizes = [32, 256], strides = [1, 1]} : vector<32x290xf32> to vector<32x256xf32>
    %202 = vector.broadcast %20 : vector<1x256xf32> to vector<32x256xf32>
    %203 = arith.mulf %201, %202 : vector<32x256xf32>
    %cst_50 = arith.constant dense<0.000000e+00> : vector<32x256xf32>
    %204 = tpu.matmul %200, %203, %cst_50 {dimension_numbers = #tpu.dot_dimension_numbers<[1], [0], [0], [1], [0, 0, 1, 1], [], []>} : vector<32x32xf32>, vector<32x256xf32>, vector<32x256xf32> -> vector<32x256xf32>
    %205 = arith.addf %198, %204 : vector<32x256xf32>
    %c4_51 = arith.constant 4 : index
    %c0_52 = arith.constant 0 : index
    %c0_53 = arith.constant 0 : index
    %206 = vector.load %arg5[%c4_51, %c0_52, %c0_53] : memref<9x32x32xf32, #tpu.memory_space<vmem>>, vector<1x32x32xf32>
    %207 = vector.shape_cast %206 : vector<1x32x32xf32> to vector<32x32xf32>
    %208 = vector.extract_strided_slice %178 {offsets = [0, 17], sizes = [32, 256], strides = [1, 1]} : vector<32x290xf32> to vector<32x256xf32>
    %cst_54 = arith.constant dense<0.000000e+00> : vector<32x256xf32>
    %209 = tpu.matmul %207, %208, %cst_54 {dimension_numbers = #tpu.dot_dimension_numbers<[1], [0], [0], [1], [0, 0, 1, 1], [], []>} : vector<32x32xf32>, vector<32x256xf32>, vector<32x256xf32> -> vector<32x256xf32>
    %210 = arith.addf %205, %209 : vector<32x256xf32>
    %c5_55 = arith.constant 5 : index
    %c0_56 = arith.constant 0 : index
    %c0_57 = arith.constant 0 : index
    %211 = vector.load %arg5[%c5_55, %c0_56, %c0_57] : memref<9x32x32xf32, #tpu.memory_space<vmem>>, vector<1x32x32xf32>
    %212 = vector.shape_cast %211 : vector<1x32x32xf32> to vector<32x32xf32>
    %213 = vector.extract_strided_slice %178 {offsets = [0, 18], sizes = [32, 256], strides = [1, 1]} : vector<32x290xf32> to vector<32x256xf32>
    %214 = vector.broadcast %24 : vector<1x256xf32> to vector<32x256xf32>
    %215 = arith.mulf %213, %214 : vector<32x256xf32>
    %cst_58 = arith.constant dense<0.000000e+00> : vector<32x256xf32>
    %216 = tpu.matmul %212, %215, %cst_58 {dimension_numbers = #tpu.dot_dimension_numbers<[1], [0], [0], [1], [0, 0, 1, 1], [], []>} : vector<32x32xf32>, vector<32x256xf32>, vector<32x256xf32> -> vector<32x256xf32>
    %217 = arith.addf %210, %216 : vector<32x256xf32>
    %c6_59 = arith.constant 6 : index
    %c0_60 = arith.constant 0 : index
    %c0_61 = arith.constant 0 : index
    %218 = vector.load %arg5[%c6_59, %c0_60, %c0_61] : memref<9x32x32xf32, #tpu.memory_space<vmem>>, vector<1x32x32xf32>
    %219 = vector.shape_cast %218 : vector<1x32x32xf32> to vector<32x32xf32>
    %220 = vector.extract_strided_slice %178 {offsets = [0, 32], sizes = [32, 256], strides = [1, 1]} : vector<32x290xf32> to vector<32x256xf32>
    %221 = vector.broadcast %20 : vector<1x256xf32> to vector<32x256xf32>
    %222 = arith.mulf %220, %221 : vector<32x256xf32>
    %cst_62 = arith.constant dense<0.000000e+00> : vector<32x256xf32>
    %223 = tpu.matmul %219, %222, %cst_62 {dimension_numbers = #tpu.dot_dimension_numbers<[1], [0], [0], [1], [0, 0, 1, 1], [], []>} : vector<32x32xf32>, vector<32x256xf32>, vector<32x256xf32> -> vector<32x256xf32>
    %224 = arith.addf %217, %223 : vector<32x256xf32>
    %c7_63 = arith.constant 7 : index
    %c0_64 = arith.constant 0 : index
    %c0_65 = arith.constant 0 : index
    %225 = vector.load %arg5[%c7_63, %c0_64, %c0_65] : memref<9x32x32xf32, #tpu.memory_space<vmem>>, vector<1x32x32xf32>
    %226 = vector.shape_cast %225 : vector<1x32x32xf32> to vector<32x32xf32>
    %227 = vector.extract_strided_slice %178 {offsets = [0, 33], sizes = [32, 256], strides = [1, 1]} : vector<32x290xf32> to vector<32x256xf32>
    %cst_66 = arith.constant dense<0.000000e+00> : vector<32x256xf32>
    %228 = tpu.matmul %226, %227, %cst_66 {dimension_numbers = #tpu.dot_dimension_numbers<[1], [0], [0], [1], [0, 0, 1, 1], [], []>} : vector<32x32xf32>, vector<32x256xf32>, vector<32x256xf32> -> vector<32x256xf32>
    %229 = arith.addf %224, %228 : vector<32x256xf32>
    %c8_67 = arith.constant 8 : index
    %c0_68 = arith.constant 0 : index
    %c0_69 = arith.constant 0 : index
    %230 = vector.load %arg5[%c8_67, %c0_68, %c0_69] : memref<9x32x32xf32, #tpu.memory_space<vmem>>, vector<1x32x32xf32>
    %231 = vector.shape_cast %230 : vector<1x32x32xf32> to vector<32x32xf32>
    %232 = vector.extract_strided_slice %178 {offsets = [0, 34], sizes = [32, 256], strides = [1, 1]} : vector<32x290xf32> to vector<32x256xf32>
    %233 = vector.broadcast %24 : vector<1x256xf32> to vector<32x256xf32>
    %234 = arith.mulf %232, %233 : vector<32x256xf32>
    %cst_70 = arith.constant dense<0.000000e+00> : vector<32x256xf32>
    %235 = tpu.matmul %231, %234, %cst_70 {dimension_numbers = #tpu.dot_dimension_numbers<[1], [0], [0], [1], [0, 0, 1, 1], [], []>} : vector<32x32xf32>, vector<32x256xf32>, vector<32x256xf32> -> vector<32x256xf32>
    %236 = arith.addf %229, %235 : vector<32x256xf32>
    %c0_71 = arith.constant 0 : index
    %c0_72 = arith.constant 0 : index
    %237 = vector.load %arg6[%c0_71, %c0_72] : memref<32x1xf32, #tpu.memory_space<vmem>>, vector<32x1xf32>
    %238 = vector.broadcast %237 : vector<32x1xf32> to vector<32x256xf32>
    %239 = arith.addf %236, %238 : vector<32x256xf32>
    %cst_73 = arith.constant 0.000000e+00 : f32
    %240 = vector.broadcast %cst_73 : f32 to vector<32x256xf32>
    %241 = arith.maximumf %239, %240 : vector<32x256xf32>
    %cst_74 = arith.constant 0.000000e+00 : f32
    %242 = vector.broadcast %cst_74 : f32 to vector<32x17xf32>
    %243 = tpu.concatenate %242, %241, %242 in 1 : vector<32x17xf32>, vector<32x256xf32>, vector<32x17xf32> -> vector<32x290xf32>
    %cst_75 = arith.constant 0.000000e+00 : f32
    %244 = vector.broadcast %cst_75 : f32 to vector<32x256xf32>
    %c0_76 = arith.constant 0 : index
    %c0_77 = arith.constant 0 : index
    %c0_78 = arith.constant 0 : index
    %245 = vector.load %arg7[%c0_76, %c0_77, %c0_78] : memref<9x32x1xf32, #tpu.memory_space<vmem>>, vector<1x32x1xf32>
    %246 = vector.shape_cast %245 : vector<1x32x1xf32> to vector<32x1xf32>
    %247 = vector.extract_strided_slice %243 {offsets = [0, 0], sizes = [32, 256], strides = [1, 1]} : vector<32x290xf32> to vector<32x256xf32>
    %248 = vector.broadcast %20 : vector<1x256xf32> to vector<32x256xf32>
    %249 = arith.mulf %247, %248 : vector<32x256xf32>
    %250 = vector.broadcast %246 : vector<32x1xf32> to vector<32x256xf32>
    %251 = arith.mulf %250, %249 : vector<32x256xf32>
    %252 = arith.addf %244, %251 : vector<32x256xf32>
    %c1_79 = arith.constant 1 : index
    %c0_80 = arith.constant 0 : index
    %c0_81 = arith.constant 0 : index
    %253 = vector.load %arg7[%c1_79, %c0_80, %c0_81] : memref<9x32x1xf32, #tpu.memory_space<vmem>>, vector<1x32x1xf32>
    %254 = vector.shape_cast %253 : vector<1x32x1xf32> to vector<32x1xf32>
    %255 = vector.extract_strided_slice %243 {offsets = [0, 1], sizes = [32, 256], strides = [1, 1]} : vector<32x290xf32> to vector<32x256xf32>
    %256 = vector.broadcast %254 : vector<32x1xf32> to vector<32x256xf32>
    %257 = arith.mulf %256, %255 : vector<32x256xf32>
    %258 = arith.addf %252, %257 : vector<32x256xf32>
    %c2_82 = arith.constant 2 : index
    %c0_83 = arith.constant 0 : index
    %c0_84 = arith.constant 0 : index
    %259 = vector.load %arg7[%c2_82, %c0_83, %c0_84] : memref<9x32x1xf32, #tpu.memory_space<vmem>>, vector<1x32x1xf32>
    %260 = vector.shape_cast %259 : vector<1x32x1xf32> to vector<32x1xf32>
    %261 = vector.extract_strided_slice %243 {offsets = [0, 2], sizes = [32, 256], strides = [1, 1]} : vector<32x290xf32> to vector<32x256xf32>
    %262 = vector.broadcast %24 : vector<1x256xf32> to vector<32x256xf32>
    %263 = arith.mulf %261, %262 : vector<32x256xf32>
    %264 = vector.broadcast %260 : vector<32x1xf32> to vector<32x256xf32>
    %265 = arith.mulf %264, %263 : vector<32x256xf32>
    %266 = arith.addf %258, %265 : vector<32x256xf32>
    %c3_85 = arith.constant 3 : index
    %c0_86 = arith.constant 0 : index
    %c0_87 = arith.constant 0 : index
    %267 = vector.load %arg7[%c3_85, %c0_86, %c0_87] : memref<9x32x1xf32, #tpu.memory_space<vmem>>, vector<1x32x1xf32>
    %268 = vector.shape_cast %267 : vector<1x32x1xf32> to vector<32x1xf32>
    %269 = vector.extract_strided_slice %243 {offsets = [0, 16], sizes = [32, 256], strides = [1, 1]} : vector<32x290xf32> to vector<32x256xf32>
    %270 = vector.broadcast %20 : vector<1x256xf32> to vector<32x256xf32>
    %271 = arith.mulf %269, %270 : vector<32x256xf32>
    %272 = vector.broadcast %268 : vector<32x1xf32> to vector<32x256xf32>
    %273 = arith.mulf %272, %271 : vector<32x256xf32>
    %274 = arith.addf %266, %273 : vector<32x256xf32>
    %c4_88 = arith.constant 4 : index
    %c0_89 = arith.constant 0 : index
    %c0_90 = arith.constant 0 : index
    %275 = vector.load %arg7[%c4_88, %c0_89, %c0_90] : memref<9x32x1xf32, #tpu.memory_space<vmem>>, vector<1x32x1xf32>
    %276 = vector.shape_cast %275 : vector<1x32x1xf32> to vector<32x1xf32>
    %277 = vector.extract_strided_slice %243 {offsets = [0, 17], sizes = [32, 256], strides = [1, 1]} : vector<32x290xf32> to vector<32x256xf32>
    %278 = vector.broadcast %276 : vector<32x1xf32> to vector<32x256xf32>
    %279 = arith.mulf %278, %277 : vector<32x256xf32>
    %280 = arith.addf %274, %279 : vector<32x256xf32>
    %c5_91 = arith.constant 5 : index
    %c0_92 = arith.constant 0 : index
    %c0_93 = arith.constant 0 : index
    %281 = vector.load %arg7[%c5_91, %c0_92, %c0_93] : memref<9x32x1xf32, #tpu.memory_space<vmem>>, vector<1x32x1xf32>
    %282 = vector.shape_cast %281 : vector<1x32x1xf32> to vector<32x1xf32>
    %283 = vector.extract_strided_slice %243 {offsets = [0, 18], sizes = [32, 256], strides = [1, 1]} : vector<32x290xf32> to vector<32x256xf32>
    %284 = vector.broadcast %24 : vector<1x256xf32> to vector<32x256xf32>
    %285 = arith.mulf %283, %284 : vector<32x256xf32>
    %286 = vector.broadcast %282 : vector<32x1xf32> to vector<32x256xf32>
    %287 = arith.mulf %286, %285 : vector<32x256xf32>
    %288 = arith.addf %280, %287 : vector<32x256xf32>
    %c6_94 = arith.constant 6 : index
    %c0_95 = arith.constant 0 : index
    %c0_96 = arith.constant 0 : index
    %289 = vector.load %arg7[%c6_94, %c0_95, %c0_96] : memref<9x32x1xf32, #tpu.memory_space<vmem>>, vector<1x32x1xf32>
    %290 = vector.shape_cast %289 : vector<1x32x1xf32> to vector<32x1xf32>
    %291 = vector.extract_strided_slice %243 {offsets = [0, 32], sizes = [32, 256], strides = [1, 1]} : vector<32x290xf32> to vector<32x256xf32>
    %292 = vector.broadcast %20 : vector<1x256xf32> to vector<32x256xf32>
    %293 = arith.mulf %291, %292 : vector<32x256xf32>
    %294 = vector.broadcast %290 : vector<32x1xf32> to vector<32x256xf32>
    %295 = arith.mulf %294, %293 : vector<32x256xf32>
    %296 = arith.addf %288, %295 : vector<32x256xf32>
    %c7_97 = arith.constant 7 : index
    %c0_98 = arith.constant 0 : index
    %c0_99 = arith.constant 0 : index
    %297 = vector.load %arg7[%c7_97, %c0_98, %c0_99] : memref<9x32x1xf32, #tpu.memory_space<vmem>>, vector<1x32x1xf32>
    %298 = vector.shape_cast %297 : vector<1x32x1xf32> to vector<32x1xf32>
    %299 = vector.extract_strided_slice %243 {offsets = [0, 33], sizes = [32, 256], strides = [1, 1]} : vector<32x290xf32> to vector<32x256xf32>
    %300 = vector.broadcast %298 : vector<32x1xf32> to vector<32x256xf32>
    %301 = arith.mulf %300, %299 : vector<32x256xf32>
    %302 = arith.addf %296, %301 : vector<32x256xf32>
    %c8_100 = arith.constant 8 : index
    %c0_101 = arith.constant 0 : index
    %c0_102 = arith.constant 0 : index
    %303 = vector.load %arg7[%c8_100, %c0_101, %c0_102] : memref<9x32x1xf32, #tpu.memory_space<vmem>>, vector<1x32x1xf32>
    %304 = vector.shape_cast %303 : vector<1x32x1xf32> to vector<32x1xf32>
    %305 = vector.extract_strided_slice %243 {offsets = [0, 34], sizes = [32, 256], strides = [1, 1]} : vector<32x290xf32> to vector<32x256xf32>
    %306 = vector.broadcast %24 : vector<1x256xf32> to vector<32x256xf32>
    %307 = arith.mulf %305, %306 : vector<32x256xf32>
    %308 = vector.broadcast %304 : vector<32x1xf32> to vector<32x256xf32>
    %309 = arith.mulf %308, %307 : vector<32x256xf32>
    %310 = arith.addf %302, %309 : vector<32x256xf32>
    %cst_103 = arith.constant dense<0.000000e+00> : vector<256xf32>
    %311 = vector.multi_reduction <add>, %310, %cst_103 [0] : vector<32x256xf32> to vector<256xf32>
    %312 = vector.shape_cast %311 : vector<256xf32> to vector<1x256xf32>
    %c0_104 = arith.constant 0 : index
    %c0_105 = arith.constant 0 : index
    %313 = vector.load %arg8[%c0_104, %c0_105] : memref<1x1xf32, #tpu.memory_space<vmem>>, vector<1x1xf32>
    %314 = vector.broadcast %313 : vector<1x1xf32> to vector<1x256xf32>
    %315 = arith.addf %312, %314 : vector<1x256xf32>
    %316 = arith.negf %315 : vector<1x256xf32>
    %317 = math.exp %316 : vector<1x256xf32>
    %cst_106 = arith.constant 1.000000e+00 : f32
    %318 = vector.broadcast %cst_106 : f32 to vector<1x256xf32>
    %319 = arith.addf %318, %317 : vector<1x256xf32>
    %320 = arith.divf %318, %319 : vector<1x256xf32>
    %c0_107 = arith.constant 0 : index
    %c0_108 = arith.constant 0 : index
    %c0_109 = arith.constant 0 : index
    %321 = vector.load %arg9[%c0_107, %c0_108, %c0_109] : memref<1x1x256xf32, #tpu.memory_space<vmem>>, vector<1x1x256xf32>
    %322 = vector.shape_cast %321 : vector<1x1x256xf32> to vector<1x256xf32>
    %323 = vector.shape_cast %320 : vector<1x256xf32> to vector<1x1x256xf32>
    tpu.vector_store %arg9[%c0_107, %c0_108, %c0_109], %323 {strides = array<i32>} : memref<1x1x256xf32, #tpu.memory_space<vmem>>, vector<1x1x256xf32>,
    return
  }
  func.func @transform_0(%arg0: i32) -> (i32, i32, i32) {
    %c0_i32 = arith.constant 0 : i32
    %c0_i32_0 = arith.constant 0 : i32
    %c0_i32_1 = arith.constant 0 : i32
    return %arg0, %c0_i32, %c0_i32_0 : i32, i32, i32
  }
  func.func @transform_1(%arg0: i32) -> (i32, i32, i32) {
    %c0_i32 = arith.constant 0 : i32
    %c0_i32_0 = arith.constant 0 : i32
    %c0_i32_1 = arith.constant 0 : i32
    return %arg0, %c0_i32, %c0_i32_0 : i32, i32, i32
  }
  func.func @transform_2(%arg0: i32) -> (i32, i32, i32) {
    %c0_i32 = arith.constant 0 : i32
    %c0_i32_0 = arith.constant 0 : i32
    %c0_i32_1 = arith.constant 0 : i32
    %c0_i32_2 = arith.constant 0 : i32
    return %c0_i32, %c0_i32_0, %c0_i32_1 : i32, i32, i32
  }
  func.func @transform_3(%arg0: i32) -> (i32, i32) {
    %c0_i32 = arith.constant 0 : i32
    %c0_i32_0 = arith.constant 0 : i32
    %c0_i32_1 = arith.constant 0 : i32
    return %c0_i32, %c0_i32_0 : i32, i32
  }
  func.func @transform_4(%arg0: i32) -> (i32, i32, i32) {
    %c0_i32 = arith.constant 0 : i32
    %c0_i32_0 = arith.constant 0 : i32
    %c0_i32_1 = arith.constant 0 : i32
    %c0_i32_2 = arith.constant 0 : i32
    return %c0_i32, %c0_i32_0, %c0_i32_1 : i32, i32, i32
  }
  func.func @transform_5(%arg0: i32) -> (i32, i32) {
    %c0_i32 = arith.constant 0 : i32
    %c0_i32_0 = arith.constant 0 : i32
    %c0_i32_1 = arith.constant 0 : i32
    return %c0_i32, %c0_i32_0 : i32, i32
  }
  func.func @transform_6(%arg0: i32) -> (i32, i32, i32) {
    %c0_i32 = arith.constant 0 : i32
    %c0_i32_0 = arith.constant 0 : i32
    %c0_i32_1 = arith.constant 0 : i32
    %c0_i32_2 = arith.constant 0 : i32
    return %c0_i32, %c0_i32_0, %c0_i32_1 : i32, i32, i32
  }
  func.func @transform_7(%arg0: i32) -> (i32, i32) {
    %c0_i32 = arith.constant 0 : i32
    %c0_i32_0 = arith.constant 0 : i32
    %c0_i32_1 = arith.constant 0 : i32
    return %c0_i32, %c0_i32_0 : i32, i32
  }
  func.func @transform_8(%arg0: i32) -> (i32, i32, i32) {
    %c0_i32 = arith.constant 0 : i32
    %c0_i32_0 = arith.constant 0 : i32
    %c0_i32_1 = arith.constant 0 : i32
    return %arg0, %c0_i32, %c0_i32_0 : i32, i32, i32
  }
}

</mosaic_0001>

<bundles_post_ra>
// kernel: illum_forward.1
= control target key start
LH: loop header
LB: loop body
LE: loop exit
PB: predicated region body
PF: predicated region fallthrough
CT: control target
= control target key end

     0   :  { %s5553_s29 = smov 0   ;;  %s8454_s0 = inlined_call_operand.vmem [shape: f32[2,1,256], index: 0, kind: input, shape index: {}]   ;;  %s8455_s1 = inlined_call_operand.vmem [shape: f32[2,1,256], index: 1, kind: input, shape index: {}]   ;;  %s8456_s2 = inlined_call_operand.vmem [shape: f32[9,32,2], index: 2, kind: input, shape index: {}]   ;;  %s8457_s3 = inlined_call_operand.vmem [shape: f32[32,1], index: 3, kind: input, shape index: {}]   ;;  %s8458_s4 = inlined_call_operand.vmem [shape: f32[9,32,32], index: 4, kind: input, shape index: {}]   ;;  %s8459_s5 = inlined_call_operand.vmem [shape: f32[32,1], index: 5, kind: input, shape index: {}]   ;;  %s8460_s6 = inlined_call_operand.vmem [shape: f32[9,32,1], index: 6, kind: input, shape index: {}]   ;;  %s8461_s7 = inlined_call_operand.<no memory space> [shape: f32[1,1], index: 7, kind: input, shape index: {}]   ;;  %s8462_s8 = inlined_call_operand.vmem [shape: f32[2,1,256], index: 8, kind: output, shape index: {}]  }
   0x1   :  { %v13_v0 = vstv %s8461_s7 }
   0x2   :  { %14 = vst [vmem:[#allocation2] sm:$0x1] %v13_v0 }
   0x3 LB: > { %s4858_s30 = sadd.s32 4294967295, %s5485_s29   ;;  %p4862_p0 = scmp.ge.s32.totalorder %s5485_s29, 1  ;;  %s5485_s29 = sphi %s5553_s29, %s20_s29  }
   0x4   : > { %p272_p1 = scmp.lt.s32.totalorder %s5485_s29, 3 }
   0x6   : > { %p273_p2 = pnand %p4862_p0, %p272_p1 }
   0x8   : > { %276 = sbr.rel (%p273_p2) target bundleno = 3156 (0xc54), region = 52 }
   0xf   : > { %v401_v1 = vld [vmem:[%s8456_s2 + $0x8] sm:$0xff]  ;;  %p308_p3 = scmp.lt.s32.totalorder %s4858_s30, 1  ;;  %v8463_v2 = vlaneseq  ;;  %v8464_v3 = vmov 0   ;;  %v8468_v5 = vmov 0.0   ;;  %s5489_s17 = smov 17   ;;  %v402_v15 = vld [vmem:[%s8456_s2 + $0x10] sm:$0xff] }
  0x10   : > { %5173 = vset.pattern.permute.xlu1 %v8464_v3  ;;  %5172 = vset.pattern.permute.xlu0 %v8464_v3  ;;  %v400_v16 = vld [vmem:[%s8456_s2] sm:$0xff]  ;;  %v403_v18 = vld [vmem:[%s8456_s2 + $0x18] sm:$0xff]  ;;  %v8466_v21 = vmov 1   ;;  %v4871_v27 = vld [vmem:[%s8456_s2 + $0x28] sm:$0xff]  ;;  %s5491_s9 = smov 2   ;;  %vm373_vm2 = vcmask 138240  }
  0x11   : > { %413 = vperm.xlu1 %5173, %v401_v1   ;;  %s8914_s30 = smov (!%p308_p3, %s4858_s30), 1  ;;  %v5567_v4 = vshrl.u32 %v8463_v2, 7  ;;  %2432 = vmatprep.mubr.f32.mxu1 %v8468_v5  ;;  %v5590_v14 = vand.u32 127, %v8463_v2  ;;  %v4870_v22 = vld [vmem:[%s8456_s2 + $0x20] sm:$0xff]  ;;  %v4873_v23 = vld [vmem:[%s8456_s2 + $0x38] sm:$0xff]  ;;  %v5631_v28 = vld [vmem:[%s8456_s2 + $0x48] sm:$0xff] }
  0x12   : > { %3035 = vmatprep.mubr.f32.mxu0 %v8468_v5  ;;  %s5571_s7 = sshll.u32 %s8914_s30, 1  ;;  %v4872_v29 = vld [vmem:[%s8456_s2 + $0x30] sm:$0xff]  ;;  %v5642_v30 = vld [vmem:[%s8456_s2 + $0x40] sm:$0xff]  ;;  %v5655_v32 = vld [vmem:[%s8456_s2 + $0x58] sm:$0xff]  ;;  %s5492_s21 = smov 127   ;;  %vm713_vm3 = vcmask 15360  }
  0x13   : > { %8569 = vst [vmem:[#allocation3_spill] sm:$0xff] %v5567_v4  ;;  %v5574_v6 = vsub.s32 0, %v5567_v4  ;;  %s315_s13 = scalar_lea.vmem %s8455_s1, %s5571_s7  ;;  %v367_v7 = vsub.s32 1, %v5567_v4  ;;  %s311_s16 = scalar_lea.vmem %s8454_s0, %s5571_s7  ;;  %v5601_v17 = vadd.s32 128, %v5590_v14  ;;  %v8471_v19 = vand.u32 15, %v5590_v14  ;;  %v5649_v31 = vld [vmem:[%s8456_s2 + $0x50] sm:$0xff] }
  0x14   : > { %v380_v8 = vld [vmem:[%s315_s13] sm:$0x3]  ;;  %s5493_s22 = smov 126   ;;  %s5494_s25 = smov 16   ;;  %vm940_vm6 = vcmask 130048   ;;  %vm1351_vm7 = vcmask 146432  }
  0x15   : > { %8570 = vst [vmem:[#allocation4_spill] sm:$0xff] %v5574_v6  ;;  %v385_v9 = vrot.slane %v380_v8, %v5574_v6  ;;  %v359_v10 = vld [vmem:[%s311_s16] sm:$0x3]  ;;  %v389_v12 = vrot.slane %v380_v8, %v367_v7  ;;  %v8470_v20 = vand.u32 15, %v5601_v17  ;;  %vm353_vm0 = vcmp.le.s32.totalorder %v8471_v19, 14  ;;  %s5495_s11 = smov 112  }
  0x16   : > { %v364_v11 = vrot.slane %v359_v10, %v5574_v6  ;;  %v368_v13 = vrot.slane %v359_v10, %v367_v7  ;;  %v4868_v24 = vsel %vm353_vm0, 1.0, %v8468_v5  ;;  %s5496_s23 = smov 111   ;;  %s5497_s26 = smov 18   ;;  %vm1576_vm8 = vcmask 261120  }
  0x17   : > { %390 = vrot.lane.b32.xlu1 %v385_v9, %s5489_s17  ;;  %vm354_vm1 = vcmp.le.s32.totalorder %v8470_v20, 14  ;;  %s5498_s13 = smov 110   ;;  %s5499_s16 = smov 32   ;;  %vm1987_vm9 = vcmask 277504   ;;  %vm577_vm10 = vcmask 1039360   ;;  %vm801_vm11 = vcmask 1031168  }
  0x18   : > { %369 = vrot.lane.b32.xlu0 %v364_v11, %s5489_s17  ;;  %v4869_v25 = vsel %vm354_vm1, 1.0, %v8468_v5  ;;  %s5500_s27 = smov 96   ;;  %s5501_s15 = smov 95   ;;  %vm1028_vm12 = vcmask 916480   ;;  %vm1229_vm13 = vcmask 908288   ;;  %vm1439_vm14 = vcmask 900096  }
  0x19   : > { %v5621_v26 = vpack.i.bf16 %v4869_v25, %v4868_v24  ;;  %s5503_s19 = smov 94   ;;  %vm1664_vm15 = vcmask 785408   ;;  %vm1865_vm0 = vcmask 777216   ;;  %vm2075_vm1 = vcmask 769024  }
  0x1b   : > { %392 = vrot.lane.b32.xlu1 %v389_v12, %s5489_s17 }
  0x1c   : > { %371 = vrot.lane.b32.xlu0 %v368_v13, %s5489_s17 }
  0x1f   : > { %418 = vperm.xlu1 %5173, %v402_v15  }
  0x20   : > { %408 = vperm.xlu0 %5172, %v400_v16  }
  0x23   : > { %5174 = vset.pattern.permute.xlu1 %v8466_v21 }
  0x24   : > { %423 = vperm.xlu0 %5172, %v403_v18   ;;  %453 = vperm.xlu1 %5174, %v400_v16  }
  0x28   : > { %499 = vperm.xlu0 %5172, %v4870_v22   ;;  %461 = vperm.xlu1 %5174, %v402_v15  }
  0x2c   : > { %514 = vperm.xlu0 %5172, %v4873_v23   ;;  %465 = vperm.xlu1 %5174, %v403_v18  }
  0x30   : > { %5178 = vrot.lane.b32.xlu0 %v5621_v26, %s5491_s9  ;;  %5175 = vset.pattern.permute.xlu1 %v8464_v3 }
  0x31   : > { %504 = vperm.xlu1 %5175, %v4871_v27  }
  0x34   : > { %728 = vperm.xlu0 %5172, %v5631_v28  }
  0x35   : > { %509 = vperm.xlu1 %5175, %v4872_v29  }
  0x38   : > { %5183 = vset.pattern.permute.xlu0 %v8466_v21 }
  0x39   : > { %457 = vperm.xlu0 %5183, %v401_v1   ;;  %5176 = vset.pattern.permute.xlu1 %v8466_v21 }
  0x3a   : > { %603 = vperm.xlu1 %5176, %v4870_v22  }
  0x3d   : > { %607 = vperm.xlu0 %5183, %v4871_v27  }
  0x3e   : > { %611 = vperm.xlu1 %5176, %v4872_v29  }
  0x42   : > { %615 = vperm.xlu1 %5176, %v4873_v23  }
  0x46   : > { %5182 = vset.pattern.permute.xlu1 %v8464_v3 }
  0x47   : > { %723 = vperm.xlu1 %5182, %v5642_v30  }
  0x4b   : > { %733 = vperm.xlu1 %5182, %v5649_v31  }
  0x4f   : > { %738 = vperm.xlu1 %5182, %v5655_v32  }
  0x53   : > { %5184 = vset.pattern.permute.xlu1 %v8466_v21 }
  0x8a   : > { %v370_v35 = vpop.permute.xlu0 %369 }
  0x8b   : > { %v5670_v42 = vsel %vm373_vm2, 0.0, %v370_v35 }
  0x8c   : > { %v5677_v44 = vrot.slane %v5670_v42, %v5574_v6 }
  0x8e   : > { %v372_v37 = vpop.permute.xlu0 %371 }
  0x8f   : > { %v5673_v43 = vsel %vm373_vm2, %v370_v35, %v372_v37  ;;  %v5684_v46 = vsel %vm373_vm2, %v372_v37, 0.0 }
  0x90   : > { %v5659_v33 = vpop.permute.xlu1 %413  ;;  %v5681_v45 = vrot.slane %v5673_v43, %v5574_v6  ;;  %v5692_v51 = vrot.slane %v5684_v46, %v5574_v6 }
  0x94   : > { %v391_v34 = vpop.permute.xlu1 %390 }
  0x95   : > { %v5728_v12 = vsel %vm373_vm2, 0.0, %v391_v34 }
  0x96   : > { %v5734_v18 = vrot.slane %v5728_v12, %v5574_v6 }
  0x98   : > { %v393_v36 = vpop.permute.xlu1 %392 }
  0x99   : > { %v5715_v1 = vsel %vm373_vm2, %v391_v34, %v393_v36  ;;  %v5739_v22 = vsel %vm373_vm2, %v393_v36, 0.0 }
  0x9a   : > { %v5723_v11 = vrot.slane %v5715_v1, %v5574_v6  ;;  %v5745_v25 = vrot.slane %v5739_v22, %v5574_v6 }
  0x9e   : > { %v5661_v38 = vpop.permute.xlu1 %418 }
  0x9f   : > { %v5663_v39 = vpop.permute.xlu0 %408 }
  0xa3   : > { %v5665_v40 = vpop.permute.xlu0 %423  ;;  %v5667_v41 = vpop.permute.xlu1 %453 }
  0xa7   : > { %v500_v47 = vpop.permute.xlu0 %499  ;;  %v5686_v48 = vpop.permute.xlu1 %461 }
  0xa8   : > { %v530_v49 = vmul.f32 %v5681_v45, %v500_v47  ;;  %v529_v50 = vmul.f32 %v5677_v44, %v500_v47  ;;  %v531_v54 = vmul.f32 %v5692_v51, %v500_v47 }
  0xaa   : > { %555 = vrot.lane.b32.xlu0 %v530_v49, %s5492_s21  ;;  %553 = vrot.lane.b32.xlu1 %v529_v50, %s5492_s21 }
  0xab   : > { %v515_v52 = vpop.permute.xlu0 %514  ;;  %v5696_v53 = vpop.permute.xlu1 %465 }
  0xac   : > { %v539_v8 = vmul.f32 %v5681_v45, %v515_v52  ;;  %v538_v9 = vmul.f32 %v5677_v44, %v515_v52  ;;  %v540_v15 = vmul.f32 %v5692_v51, %v515_v52 }
  0xae   : > { %557 = vrot.lane.b32.xlu1 %v531_v54, %s5492_s21 }
  0xaf   : > { %v5179_v55 = vpop.permute.xlu0 %5178 }
  0xb0   : > { %v505_v56 = vpop.permute.xlu1 %504  ;;  %v5753_v35 = vunpack.i.h.bf16 %v5179_v55  ;;  %v5755_v36 = vunpack.i.l.bf16 %v5179_v55 }
  0xb1   : > { %v532_v57 = vmul.f32 %v5677_v44, %v505_v56  ;;  %v533_v58 = vmul.f32 %v5681_v45, %v505_v56  ;;  %v534_v60 = vmul.f32 %v5692_v51, %v505_v56 }
  0xb2   : > { %8571 = vst [vmem:[#allocation5_spill] sm:$0xff] %v5753_v35  ;;  %8572 = vst [vmem:[#allocation6_spill] sm:$0xff] %v5755_v36  ;;  %v5763_v50 = vsel %vm713_vm3, %v5755_v36, %v5753_v35  ;;  %v826_v19 = vmul.f32 %v5755_v36, %v5728_v12 }
  0xb3   : > { %559 = vrot.lane.b32.xlu0 %v532_v57, %s5492_s21  ;;  %561 = vrot.lane.b32.xlu1 %v533_v58, %s5492_s21  ;;  %v5706_v62 = vpop.permute.xlu0 %728  ;;  %8573 = vst [vmem:[#allocation7_spill] sm:$0xff] %v5763_v50  ;;  %v719_v55 = vmul.f32 %v5763_v50, %v5673_v43  ;;  %v718_v58 = vmul.f32 %v5755_v36, %v5670_v42 }
  0xb4   : > { %v510_v59 = vpop.permute.xlu1 %509  ;;  %v827_v20 = vmul.f32 %v5763_v50, %v5715_v1 }
  0xb5   : > { %v535_v61 = vmul.f32 %v5677_v44, %v510_v59  ;;  %v536_v63 = vmul.f32 %v5681_v45, %v510_v59  ;;  %v537_v0 = vmul.f32 %v5692_v51, %v510_v59 }
  0xb7   : > { %563 = vrot.lane.b32.xlu0 %v534_v60, %s5492_s21  ;;  %565 = vrot.lane.b32.xlu1 %v535_v61, %s5492_s21  ;;  %v748_v60 = vrot.slane %v719_v55, %v5574_v6 }
  0xb8   : > { %v5717_v7 = vpop.permute.xlu0 %457 }
  0xb9   : > { %v604_v10 = vpop.permute.xlu1 %603 }
  0xba   : > { %v631_v13 = vmul.f32 %v5723_v11, %v604_v10  ;;  %v630_v23 = vmul.f32 %v5734_v18, %v604_v10  ;;  %v632_v29 = vmul.f32 %v5745_v25, %v604_v10 }
  0xbb   : > { %567 = vrot.lane.b32.xlu0 %v536_v63, %s5492_s21  ;;  %569 = vrot.lane.b32.xlu1 %v537_v0, %s5492_s21  ;;  %v744_v0 = vrot.slane %v718_v58, %v5574_v6 }
  0xbc   : > { %v608_v16 = vpop.permute.xlu0 %607 }
  0xbd   : > { %v633_v24 = vmul.f32 %v5734_v18, %v608_v16  ;;  %v612_v27 = vpop.permute.xlu1 %611  ;;  %v635_v34 = vmul.f32 %v5745_v25, %v608_v16  ;;  %v634_v37 = vmul.f32 %v5723_v11, %v608_v16  ;;  %v756_v10 = vmul.f32 %v744_v0, %v5706_v62 }
  0xbe   : > { %v637_v47 = vmul.f32 %v5723_v11, %v612_v27  ;;  %v636_v52 = vmul.f32 %v5734_v18, %v612_v27  ;;  %v638_v56 = vmul.f32 %v5745_v25, %v612_v27 }
  0xbf   : > { %573 = vrot.lane.b32.xlu1 %v539_v8, %s5492_s21  ;;  %571 = vrot.lane.b32.xlu0 %v538_v9, %s5492_s21  ;;  %v720_v8 = vmul.f32 %v5753_v35, %v5684_v46 }
  0xc1   : > { %v616_v49 = vpop.permute.xlu1 %615 }
  0xc2   : > { %v639_v54 = vmul.f32 %v5734_v18, %v616_v49  ;;  %v641_v57 = vmul.f32 %v5745_v25, %v616_v49  ;;  %v640_v61 = vmul.f32 %v5723_v11, %v616_v49 }
  0xc3   : > { %656 = vrot.lane.b32.xlu1 %v631_v13, %s5492_s21  ;;  %575 = vrot.lane.b32.xlu0 %v540_v15, %s5492_s21  ;;  %v752_v13 = vrot.slane %v720_v8, %v5574_v6 }
  0xc6   : > { %v724_v59 = vpop.permute.xlu1 %723 }
  0xc7   : > { %654 = vrot.lane.b32.xlu0 %v630_v23, %s5492_s21  ;;  %660 = vrot.lane.b32.xlu1 %v633_v24, %s5492_s21  ;;  %v754_v63 = vmul.f32 %v748_v60, %v724_v59  ;;  %v753_v9 = vmul.f32 %v744_v0, %v724_v59  ;;  %v755_v16 = vmul.f32 %v752_v13, %v724_v59 }
  0xc8   : > { %v758_v23 = vmul.f32 %v752_v13, %v5706_v62  ;;  %v757_v24 = vmul.f32 %v748_v60, %v5706_v62 }
  0xca   : > { %v734_v15 = vpop.permute.xlu1 %733 }
  0xcb   : > { %658 = vrot.lane.b32.xlu0 %v632_v29, %s5492_s21  ;;  %664 = vrot.lane.b32.xlu1 %v635_v34, %s5492_s21  ;;  %v760_v27 = vmul.f32 %v748_v60, %v734_v15  ;;  %v759_v34 = vmul.f32 %v744_v0, %v734_v15 }
  0xce   : > { %v739_v29 = vpop.permute.xlu1 %738 }
  0xcf   : > { %662 = vrot.lane.b32.xlu0 %v634_v37, %s5492_s21  ;;  %668 = vrot.lane.b32.xlu1 %v637_v47, %s5492_s21  ;;  %v762_v37 = vmul.f32 %v744_v0, %v739_v29  ;;  %v761_v47 = vmul.f32 %v752_v13, %v734_v15  ;;  %v763_v49 = vmul.f32 %v748_v60, %v739_v29 }
  0xd3   : > { %666 = vrot.lane.b32.xlu0 %v636_v52, %s5492_s21  ;;  %672 = vrot.lane.b32.xlu1 %v639_v54, %s5492_s21  ;;  %v764_v52 = vmul.f32 %v752_v13, %v739_v29 }
  0xd7   : > { %670 = vrot.lane.b32.xlu0 %v638_v56, %s5492_s21  ;;  %676 = vrot.lane.b32.xlu1 %v641_v57, %s5492_s21 }
  0xdb   : > { %674 = vrot.lane.b32.xlu0 %v640_v61, %s5492_s21  ;;  %779 = vrot.lane.b32.xlu1 %v754_v63, %s5493_s22 }
  0xdf   : > { %777 = vrot.lane.b32.xlu0 %v753_v9, %s5493_s22  ;;  %783 = vrot.lane.b32.xlu1 %v756_v10, %s5493_s22 }
  0xe3   : > { %781 = vrot.lane.b32.xlu0 %v755_v16, %s5493_s22  ;;  %787 = vrot.lane.b32.xlu1 %v758_v23, %s5493_s22 }
  0xe7   : > { %785 = vrot.lane.b32.xlu0 %v757_v24, %s5493_s22  ;;  %791 = vrot.lane.b32.xlu1 %v760_v27, %s5493_s22 }
  0xeb   : > { %789 = vrot.lane.b32.xlu0 %v759_v34, %s5493_s22  ;;  %795 = vrot.lane.b32.xlu1 %v762_v37, %s5493_s22 }
  0xef   : > { %793 = vrot.lane.b32.xlu0 %v761_v47, %s5493_s22  ;;  %834 = vperm.xlu1 %5184, %v5631_v28  }
  0xf3   : > { %797 = vrot.lane.b32.xlu0 %v763_v49, %s5493_s22  ;;  %799 = vrot.lane.b32.xlu1 %v764_v52, %s5493_s22 }
  0xf7   : > { %830 = vperm.xlu0 %5183, %v5642_v30   ;;  %838 = vperm.xlu1 %5184, %v5649_v31  }
  0xfb   : > { %842 = vperm.xlu0 %5183, %v5655_v32   ;;  %5191 = vset.pattern.permute.xlu1 %v8464_v3 }
  0xff   : > { %5190 = vset.pattern.permute.xlu0 %v8464_v3 }
 0x11c   : > { %v5805_v62 = vpop.permute.xlu1 %553  ;;  %v5807_v54 = vpop.permute.xlu0 %555 }
 0x120   : > { %v5809_v28 = vpop.permute.xlu1 %557 }
 0x125   : > { %v5811_v55 = vpop.permute.xlu1 %561  ;;  %v5813_v56 = vpop.permute.xlu0 %559 }
 0x129   : > { %v5815_v57 = vpop.permute.xlu1 %565  ;;  %v5817_v30 = vpop.permute.xlu0 %563 }
 0x12d   : > { %v5819_v31 = vpop.permute.xlu1 %569  ;;  %v5821_v32 = vpop.permute.xlu0 %567 }
 0x131   : > { %v5823_v58 = vpop.permute.xlu1 %573  ;;  %v5825_v59 = vpop.permute.xlu0 %571 }
 0x135   : > { %v5827_v60 = vpop.permute.xlu1 %656  ;;  %v5829_v61 = vpop.permute.xlu0 %575 }
 0x139   : > { %v5831_v63 = vpop.permute.xlu0 %654  ;;  %v5833_v0 = vpop.permute.xlu1 %660 }
 0x13a   : > { %8574 = vst [vmem:[#allocation8_spill] sm:$0xff] %v5833_v0 }
 0x13d   : > { %v5835_v8 = vpop.permute.xlu0 %658  ;;  %v5837_v9 = vpop.permute.xlu1 %664 }
 0x13e   : > { %8575 = vst [vmem:[#allocation9_spill] sm:$0xff] %v5837_v9 }
 0x141   : > { %v5839_v10 = vpop.permute.xlu0 %662  ;;  %v5843_v15 = vpop.permute.xlu1 %668 }
 0x142   : > { %8576 = vst [vmem:[#allocation10_spill] sm:$0xff] %v5839_v10  ;;  %8578 = vst [vmem:[#allocation12_spill] sm:$0xff] %v5843_v15 }
 0x145   : > { %v5841_v13 = vpop.permute.xlu0 %666  ;;  %v5847_v23 = vpop.permute.xlu1 %672 }
 0x146   : > { %8577 = vst [vmem:[#allocation11_spill] sm:$0xff] %v5841_v13  ;;  %8580 = vst [vmem:[#allocation14_spill] sm:$0xff] %v5847_v23 }
 0x149   : > { %v5845_v16 = vpop.permute.xlu0 %670  ;;  %v5851_v27 = vpop.permute.xlu1 %676 }
 0x14a   : > { %8579 = vst [vmem:[#allocation13_spill] sm:$0xff] %v5845_v16  ;;  %8582 = vst [vmem:[#allocation16_spill] sm:$0xff] %v5851_v27 }
 0x14d   : > { %v5849_v24 = vpop.permute.xlu0 %674  ;;  %v5855_v34 = vpop.permute.xlu1 %779 }
 0x14e   : > { %8581 = vst [vmem:[#allocation15_spill] sm:$0xff] %v5849_v24  ;;  %8584 = vst [vmem:[#allocation18_spill] sm:$0xff] %v5855_v34 }
 0x151   : > { %v5853_v29 = vpop.permute.xlu0 %777  ;;  %v5859_v47 = vpop.permute.xlu1 %783 }
 0x152   : > { %8583 = vst [vmem:[#allocation17_spill] sm:$0xff] %v5853_v29  ;;  %8586 = vst [vmem:[#allocation20_spill] sm:$0xff] %v5859_v47 }
 0x155   : > { %v5857_v37 = vpop.permute.xlu0 %781  ;;  %v5863_v52 = vpop.permute.xlu1 %787 }
 0x156   : > { %8585 = vst [vmem:[#allocation19_spill] sm:$0xff] %v5857_v37  ;;  %8588 = vst [vmem:[#allocation22_spill] sm:$0xff] %v5863_v52  ;;  %v848_v52 = vrot.slane %v826_v19, %v5574_v6 }
 0x159   : > { %v5861_v49 = vpop.permute.xlu0 %785  ;;  %v5867_v3 = vpop.permute.xlu1 %791 }
 0x15a   : > { %8587 = vst [vmem:[#allocation21_spill] sm:$0xff] %v5861_v49  ;;  %8590 = vst [vmem:[#allocation24_spill] sm:$0xff] %v5867_v3  ;;  %v852_v49 = vrot.slane %v827_v20, %v5574_v6 }
 0x15d   : > { %v5865_v2 = vpop.permute.xlu0 %789  ;;  %v5871_v5 = vpop.permute.xlu1 %795 }
 0x15e   : > { %8589 = vst [vmem:[#allocation23_spill] sm:$0xff] %v5865_v2  ;;  %8592 = vst [vmem:[#allocation26_spill] sm:$0xff] %v5871_v5  ;;  %v828_v2 = vmul.f32 %v5753_v35, %v5739_v22 }
 0x160   : > { %v856_v50 = vrot.slane %v828_v2, %v5574_v6 }
 0x161   : > { %v5869_v21 = vpop.permute.xlu0 %793 }
 0x162   : > { %8591 = vst [vmem:[#allocation25_spill] sm:$0xff] %v5869_v21 }
 0x165   : > { %v5877_v4 = vpop.permute.xlu0 %797 }
 0x166   : > { %8593 = vst [vmem:[#allocation27_spill] sm:$0xff] %v5877_v4 }
 0x16e   : > { %v835_v47 = vpop.permute.xlu1 %834 }
 0x16f   : > { %v860_v4 = vmul.f32 %v848_v52, %v835_v47  ;;  %v861_v19 = vmul.f32 %v852_v49, %v835_v47  ;;  %v862_v20 = vmul.f32 %v856_v50, %v835_v47 }
 0x172   : > { %v5886_v36 = vpop.permute.xlu1 %799 }
 0x173   : > { %8594 = vst [vmem:[#allocation28_spill] sm:$0xff] %v5886_v36 }
 0x176   : > { %v831_v3 = vpop.permute.xlu0 %830  ;;  %v839_v35 = vpop.permute.xlu1 %838 }
 0x177   : > { %v858_v21 = vmul.f32 %v852_v49, %v831_v3  ;;  %v857_v37 = vmul.f32 %v848_v52, %v831_v3  ;;  %v859_v5 = vmul.f32 %v856_v50, %v831_v3  ;;  %v863_v29 = vmul.f32 %v848_v52, %v839_v35 }
 0x178   : > { %v865_v3 = vmul.f32 %v856_v50, %v839_v35 }
 0x179   : > { %883 = vrot.lane.b32.xlu0 %v858_v21, %s5493_s22  ;;  %881 = vrot.lane.b32.xlu1 %v857_v37, %s5493_s22  ;;  %v864_v21 = vmul.f32 %v852_v49, %v839_v35  ;;  %v5922_v35 = vld [vmem:[%s8456_s2 + $0x78] sm:$0xff] }
 0x17a   : > { %v843_v37 = vpop.permute.xlu0 %842 }
 0x17b   : > { %v866_v2 = vmul.f32 %v848_v52, %v843_v37  ;;  %v868_v47 = vmul.f32 %v856_v50, %v843_v37  ;;  %v4879_v50 = vld [vmem:[%s8456_s2 + $0x68] sm:$0xff] }
 0x17d   : > { %885 = vrot.lane.b32.xlu1 %v859_v5, %s5493_s22  ;;  %887 = vrot.lane.b32.xlu0 %v860_v4, %s5493_s22  ;;  %v8595_v5 = vand.u32 15, %v5590_v14  ;;  %v8596_v4 = vand.u32 15, %v5601_v17  ;;  %v5915_v17 = vld [vmem:[%s8456_s2 + $0x60] sm:$0xff] }
 0x17f   : > { %vm347_vm4 = vcmp.ge.s32.totalorder %v8595_v5, 1  ;;  %vm348_vm5 = vcmp.ge.s32.totalorder %v8596_v4, 1 }
 0x181   : > { %889 = vrot.lane.b32.xlu1 %v861_v19, %s5493_s22  ;;  %891 = vrot.lane.b32.xlu0 %v862_v20, %s5493_s22  ;;  %v867_v19 = vmul.f32 %v852_v49, %v843_v37  ;;  %v8597_v20 = vmov 0.0   ;;  %v8600_v49 = vmov 1  }
 0x182   : > { %v5901_v36 = vsel %vm347_vm4, 1.0, %v8597_v20 }
 0x183   : > { %8598 = vst [vmem:[#allocation29_spill] sm:$0xff] %v5901_v36 }
 0x185   : > { %895 = vrot.lane.b32.xlu0 %v864_v21, %s5493_s22  ;;  %893 = vrot.lane.b32.xlu1 %v863_v29, %s5493_s22  ;;  %v5904_v21 = vsel %vm348_vm5, 1.0, %v8597_v20  ;;  %v4880_v29 = vld [vmem:[%s8456_s2 + $0x70] sm:$0xff] }
 0x186   : > { %8599 = vst [vmem:[#allocation30_spill] sm:$0xff] %v5904_v21  ;;  %v5910_v14 = vpack.i.bf16 %v5904_v21, %v5901_v36 }
 0x189   : > { %899 = vrot.lane.b32.xlu0 %v866_v2, %s5493_s22  ;;  %897 = vrot.lane.b32.xlu1 %v865_v3, %s5493_s22 }
 0x18d   : > { %903 = vrot.lane.b32.xlu0 %v868_v47, %s5493_s22  ;;  %901 = vrot.lane.b32.xlu1 %v867_v19, %s5493_s22 }
 0x191   : > { %950 = vperm.xlu0 %5190, %v5915_v17   ;;  %5186 = vrot.lane.b32.xlu1 %v5910_v14, %s5494_s25 }
 0x195   : > { %965 = vperm.xlu0 %5190, %v5922_v35   ;;  %955 = vperm.xlu1 %5191, %v4879_v50  }
 0x199   : > { %960 = vperm.xlu1 %5191, %v4880_v29   ;;  %5193 = vset.pattern.permute.xlu0 %v8600_v49 }
 0x19d   : > { %5192 = vset.pattern.permute.xlu1 %v8600_v49 }
 0x1eb   : > { %v5933_v52 = vpop.permute.xlu1 %881  ;;  %v5935_v37 = vpop.permute.xlu0 %883 }
 0x1ec   : > { %8601 = vst [vmem:[#allocation31_spill] sm:$0xff] %v5933_v52  ;;  %8602 = vst [vmem:[#allocation32_spill] sm:$0xff] %v5935_v37 }
 0x1ef   : > { %v5937_v2 = vpop.permute.xlu1 %885  ;;  %v5941_v5 = vpop.permute.xlu0 %887 }
 0x1f0   : > { %8603 = vst [vmem:[#allocation33_spill] sm:$0xff] %v5937_v2  ;;  %8605 = vst [vmem:[#allocation35_spill] sm:$0xff] %v5941_v5 }
 0x1f3   : > { %v5939_v3 = vpop.permute.xlu1 %889  ;;  %v5945_v47 = vpop.permute.xlu0 %891 }
 0x1f4   : > { %8604 = vst [vmem:[#allocation34_spill] sm:$0xff] %v5939_v3  ;;  %8607 = vst [vmem:[#allocation37_spill] sm:$0xff] %v5945_v47 }
 0x1f7   : > { %v5943_v4 = vpop.permute.xlu1 %893  ;;  %v5951_v34 = vpop.permute.xlu0 %895 }
 0x1f8   : > { %8606 = vst [vmem:[#allocation36_spill] sm:$0xff] %v5943_v4  ;;  %8610 = vst [vmem:[#allocation40_spill] sm:$0xff] %v5951_v34 }
 0x1fb   : > { %v5947_v19 = vpop.permute.xlu1 %897  ;;  %v5957_v2 = vpop.permute.xlu0 %899 }
 0x1fc   : > { %8608 = vst [vmem:[#allocation38_spill] sm:$0xff] %v5947_v19  ;;  %8613 = vst [vmem:[#allocation43_spill] sm:$0xff] %v5957_v2 }
 0x1ff   : > { %v5949_v20 = vpop.permute.xlu1 %901  ;;  %v5967_v19 = vpop.permute.xlu0 %903 }
 0x200   : > { %8609 = vst [vmem:[#allocation39_spill] sm:$0xff] %v5949_v20  ;;  %8615 = vst [vmem:[#allocation45_spill] sm:$0xff] %v5967_v19 }
 0x203   : > { %v5187_v27 = vpop.permute.xlu1 %5186 }
 0x204   : > { %v5953_v52 = vunpack.i.h.bf16 %v5187_v27  ;;  %v5955_v37 = vunpack.i.l.bf16 %v5187_v27 }
 0x206   : > { %8611 = vst [vmem:[#allocation41_spill] sm:$0xff] %v5953_v52  ;;  %8612 = vst [vmem:[#allocation42_spill] sm:$0xff] %v5955_v37  ;;  %v5961_v5 = vsel %vm940_vm6, %v5955_v37, %v5953_v52  ;;  %v945_v4 = vmul.f32 %v5955_v37, %v5670_v42  ;;  %v947_v47 = vmul.f32 %v5953_v52, %v5684_v46 }
 0x207   : > { %8614 = vst [vmem:[#allocation44_spill] sm:$0xff] %v5961_v5  ;;  %v946_v20 = vmul.f32 %v5961_v5, %v5673_v43 }
 0x208   : > { %v971_v34 = vrot.slane %v945_v4, %v5574_v6  ;;  %v979_v24 = vrot.slane %v947_v47, %v5574_v6  ;;  %v8616_v47 = vmov 0  }
 0x209   : > { %v975_v27 = vrot.slane %v946_v20, %v5574_v6 }
 0x210   : > { %v951_v2 = vpop.permute.xlu0 %950 }
 0x211   : > { %v980_v3 = vmul.f32 %v971_v34, %v951_v2  ;;  %v981_v23 = vmul.f32 %v975_v27, %v951_v2  ;;  %v982_v13 = vmul.f32 %v979_v24, %v951_v2 }
 0x213   : > { %1004 = vrot.lane.b32.xlu1 %v980_v3, %s5495_s11  ;;  %1006 = vrot.lane.b32.xlu0 %v981_v23, %s5495_s11 }
 0x214   : > { %v956_v16 = vpop.permute.xlu1 %955  ;;  %v966_v0 = vpop.permute.xlu0 %965 }
 0x215   : > { %v983_v19 = vmul.f32 %v971_v34, %v956_v16  ;;  %v984_v20 = vmul.f32 %v975_v27, %v956_v16  ;;  %v985_v4 = vmul.f32 %v979_v24, %v956_v16  ;;  %v989_v2 = vmul.f32 %v971_v34, %v966_v0 }
 0x216   : > { %v991_v16 = vmul.f32 %v979_v24, %v966_v0 }
 0x217   : > { %1008 = vrot.lane.b32.xlu1 %v982_v13, %s5495_s11  ;;  %1010 = vrot.lane.b32.xlu0 %v983_v19, %s5495_s11  ;;  %v990_v13 = vmul.f32 %v975_v27, %v966_v0 }
 0x218   : > { %v961_v15 = vpop.permute.xlu1 %960 }
 0x219   : > { %v986_v9 = vmul.f32 %v971_v34, %v961_v15  ;;  %v987_v3 = vmul.f32 %v975_v27, %v961_v15  ;;  %v988_v23 = vmul.f32 %v979_v24, %v961_v15  ;;  %v1054_v27 = vmul.f32 %v5961_v5, %v5715_v1 }
 0x21b   : > { %1012 = vrot.lane.b32.xlu1 %v984_v20, %s5495_s11  ;;  %1014 = vrot.lane.b32.xlu0 %v985_v4, %s5495_s11  ;;  %v1053_v20 = vmul.f32 %v5955_v37, %v5728_v12 }
 0x21f   : > { %1016 = vrot.lane.b32.xlu1 %v986_v9, %s5495_s11  ;;  %1018 = vrot.lane.b32.xlu0 %v987_v3, %s5495_s11 }
 0x223   : > { %1020 = vrot.lane.b32.xlu1 %v988_v23, %s5495_s11  ;;  %1022 = vrot.lane.b32.xlu0 %v989_v2, %s5495_s11  ;;  %v1079_v23 = vrot.slane %v1054_v27, %v5574_v6  ;;  %v1055_v2 = vmul.f32 %v5953_v52, %v5739_v22 }
 0x225   : > { %v1083_v5 = vrot.slane %v1055_v2, %v5574_v6 }
 0x227   : > { %1024 = vrot.lane.b32.xlu1 %v990_v13, %s5495_s11  ;;  %1026 = vrot.lane.b32.xlu0 %v991_v16, %s5495_s11  ;;  %v1075_v13 = vrot.slane %v1053_v20, %v5574_v6 }
 0x22b   : > { %1057 = vperm.xlu1 %5192, %v5915_v17   ;;  %1061 = vperm.xlu0 %5193, %v4879_v50  }
 0x22f   : > { %1065 = vperm.xlu1 %5192, %v4880_v29   ;;  %5194 = vset.pattern.permute.xlu0 %v8616_v47 }
 0x233   : > { %1069 = vperm.xlu1 %5192, %v5922_v35  }
 0x237   : > { %5195 = vset.pattern.permute.xlu1 %v8616_v47 }
 0x285   : > { %v5990_v9 = vpop.permute.xlu1 %1004  ;;  %v5992_v15 = vpop.permute.xlu0 %1006 }
 0x286   : > { %8617 = vst [vmem:[#allocation46_spill] sm:$0xff] %v5990_v9  ;;  %8618 = vst [vmem:[#allocation47_spill] sm:$0xff] %v5992_v15 }
 0x289   : > { %v5994_v34 = vpop.permute.xlu1 %1008  ;;  %v5996_v0 = vpop.permute.xlu0 %1010 }
 0x28a   : > { %8619 = vst [vmem:[#allocation48_spill] sm:$0xff] %v5994_v34  ;;  %8620 = vst [vmem:[#allocation49_spill] sm:$0xff] %v5996_v0 }
 0x28d   : > { %v5998_v24 = vpop.permute.xlu1 %1012  ;;  %v6000_v19 = vpop.permute.xlu0 %1014 }
 0x28e   : > { %8621 = vst [vmem:[#allocation50_spill] sm:$0xff] %v5998_v24  ;;  %8622 = vst [vmem:[#allocation51_spill] sm:$0xff] %v6000_v19 }
 0x291   : > { %v6002_v17 = vpop.permute.xlu1 %1016  ;;  %v6004_v50 = vpop.permute.xlu0 %1018 }
 0x292   : > { %8623 = vst [vmem:[#allocation52_spill] sm:$0xff] %v6002_v17  ;;  %8624 = vst [vmem:[#allocation53_spill] sm:$0xff] %v6004_v50 }
 0x295   : > { %v6006_v29 = vpop.permute.xlu1 %1020  ;;  %v6008_v35 = vpop.permute.xlu0 %1022 }
 0x296   : > { %8625 = vst [vmem:[#allocation54_spill] sm:$0xff] %v6006_v29  ;;  %8626 = vst [vmem:[#allocation55_spill] sm:$0xff] %v6008_v35 }
 0x299   : > { %v6014_v4 = vpop.permute.xlu1 %1024  ;;  %v6016_v3 = vpop.permute.xlu0 %1026 }
 0x29a   : > { %8627 = vst [vmem:[#allocation56_spill] sm:$0xff] %v6014_v4  ;;  %8628 = vst [vmem:[#allocation57_spill] sm:$0xff] %v6016_v3 }
 0x2aa   : > { %v1058_v16 = vpop.permute.xlu1 %1057  ;;  %v1062_v17 = vpop.permute.xlu0 %1061 }
 0x2ab   : > { %v1085_v29 = vmul.f32 %v1079_v23, %v1058_v16  ;;  %v1084_v35 = vmul.f32 %v1075_v13, %v1058_v16  ;;  %v1087_v37 = vmul.f32 %v1075_v13, %v1062_v17  ;;  %v1086_v4 = vmul.f32 %v1083_v5, %v1058_v16 }
 0x2ac   : > { %v1089_v52 = vmul.f32 %v1083_v5, %v1062_v17  ;;  %v1088_v3 = vmul.f32 %v1079_v23, %v1062_v17  ;;  %v4883_v17 = vld [vmem:[%s8456_s2 + $0x88] sm:$0xff] }
 0x2ad   : > { %1110 = vrot.lane.b32.xlu1 %v1085_v29, %s5495_s11  ;;  %1108 = vrot.lane.b32.xlu0 %v1084_v35, %s5495_s11 }
 0x2ae   : > { %v1066_v27 = vpop.permute.xlu1 %1065 }
 0x2af   : > { %v1091_v20 = vmul.f32 %v1079_v23, %v1066_v27  ;;  %v1090_v50 = vmul.f32 %v1075_v13, %v1066_v27  ;;  %v1092_v29 = vmul.f32 %v1083_v5, %v1066_v27 }
 0x2b1   : > { %1112 = vrot.lane.b32.xlu0 %v1086_v4, %s5495_s11  ;;  %1114 = vrot.lane.b32.xlu1 %v1087_v37, %s5495_s11 }
 0x2b2   : > { %v1070_v2 = vpop.permute.xlu1 %1069 }
 0x2b3   : > { %v1093_v35 = vmul.f32 %v1075_v13, %v1070_v2  ;;  %v1094_v37 = vmul.f32 %v1079_v23, %v1070_v2  ;;  %v1095_v4 = vmul.f32 %v1083_v5, %v1070_v2  ;;  %v4884_v5 = vld [vmem:[%s8456_s2 + $0x90] sm:$0xff] }
 0x2b5   : > { %1116 = vrot.lane.b32.xlu0 %v1088_v3, %s5495_s11  ;;  %1118 = vrot.lane.b32.xlu1 %v1089_v52, %s5495_s11  ;;  %v4882_v52 = vld [vmem:[%s8456_s2 + $0x80] sm:$0xff] }
 0x2b9   : > { %1120 = vrot.lane.b32.xlu0 %v1090_v50, %s5495_s11  ;;  %1122 = vrot.lane.b32.xlu1 %v1091_v20, %s5495_s11  ;;  %v4885_v50 = vld [vmem:[%s8456_s2 + $0x98] sm:$0xff] }
 0x2bd   : > { %1124 = vrot.lane.b32.xlu0 %v1092_v29, %s5495_s11  ;;  %1126 = vrot.lane.b32.xlu1 %v1093_v35, %s5495_s11 }
 0x2c1   : > { %1128 = vrot.lane.b32.xlu0 %v1094_v37, %s5495_s11  ;;  %1130 = vrot.lane.b32.xlu1 %v1095_v4, %s5495_s11 }
 0x2c5   : > { %1163 = vperm.xlu0 %5194, %v4882_v52   ;;  %1168 = vperm.xlu1 %5195, %v4883_v17  }
 0x2c9   : > { %1178 = vperm.xlu0 %5194, %v4885_v50   ;;  %1173 = vperm.xlu1 %5195, %v4884_v5  }
 0x2cd   : > { %5197 = vset.pattern.permute.xlu0 %v8600_v49  ;;  %5196 = vset.pattern.permute.xlu1 %v8600_v49 }
 0x31f   : > { %v6049_v3 = vpop.permute.xlu0 %1108  ;;  %v6051_v23 = vpop.permute.xlu1 %1110 }
 0x320   : > { %8629 = vst [vmem:[#allocation58_spill] sm:$0xff] %v6049_v3  ;;  %8630 = vst [vmem:[#allocation59_spill] sm:$0xff] %v6051_v23 }
 0x323   : > { %v6053_v13 = vpop.permute.xlu0 %1112  ;;  %v6055_v16 = vpop.permute.xlu1 %1114 }
 0x324   : > { %8631 = vst [vmem:[#allocation60_spill] sm:$0xff] %v6053_v13  ;;  %8632 = vst [vmem:[#allocation61_spill] sm:$0xff] %v6055_v16 }
 0x327   : > { %v6057_v27 = vpop.permute.xlu0 %1116  ;;  %v6059_v20 = vpop.permute.xlu1 %1118 }
 0x328   : > { %8633 = vst [vmem:[#allocation62_spill] sm:$0xff] %v6057_v27  ;;  %8634 = vst [vmem:[#allocation63_spill] sm:$0xff] %v6059_v20 }
 0x32b   : > { %v6061_v2 = vpop.permute.xlu0 %1120  ;;  %v6063_v29 = vpop.permute.xlu1 %1122 }
 0x32c   : > { %8635 = vst [vmem:[#allocation64_spill] sm:$0xff] %v6061_v2  ;;  %8636 = vst [vmem:[#allocation65_spill] sm:$0xff] %v6063_v29 }
 0x32f   : > { %v6065_v35 = vpop.permute.xlu0 %1124  ;;  %v6067_v37 = vpop.permute.xlu1 %1126 }
 0x330   : > { %8637 = vst [vmem:[#allocation66_spill] sm:$0xff] %v6065_v35  ;;  %8638 = vst [vmem:[#allocation67_spill] sm:$0xff] %v6067_v37 }
 0x333   : > { %v6069_v4 = vpop.permute.xlu0 %1128  ;;  %v6071_v19 = vpop.permute.xlu1 %1130 }
 0x334   : > { %8639 = vst [vmem:[#allocation68_spill] sm:$0xff] %v6069_v4  ;;  %8640 = vst [vmem:[#allocation69_spill] sm:$0xff] %v6071_v19 }
 0x344   : > { %v1164_v3 = vpop.permute.xlu0 %1163  ;;  %v1169_v27 = vpop.permute.xlu1 %1168 }
 0x345   : > { %v1181_v13 = vmul.f32 %v1164_v3, %v5677_v44  ;;  %v1182_v16 = vmul.f32 %v1164_v3, %v5681_v45  ;;  %v1183_v2 = vmul.f32 %v1164_v3, %v5692_v51  ;;  %v1184_v35 = vmul.f32 %v1169_v27, %v5677_v44 }
 0x346   : > { %v1185_v19 = vmul.f32 %v1169_v27, %v5681_v45  ;;  %v1186_v37 = vmul.f32 %v1169_v27, %v5692_v51 }
 0x347   : > { %1205 = vrot.lane.b32.xlu1 %v1181_v13, %s5496_s23  ;;  %1207 = vrot.lane.b32.xlu0 %v1182_v16, %s5496_s23 }
 0x348   : > { %v1174_v4 = vpop.permute.xlu1 %1173  ;;  %v1179_v3 = vpop.permute.xlu0 %1178 }
 0x349   : > { %v1187_v13 = vmul.f32 %v1174_v4, %v5677_v44  ;;  %v1188_v16 = vmul.f32 %v1174_v4, %v5681_v45  ;;  %v1192_v27 = vmul.f32 %v1179_v3, %v5692_v51 }
 0x34b   : > { %1209 = vrot.lane.b32.xlu1 %v1183_v2, %s5496_s23  ;;  %1211 = vrot.lane.b32.xlu0 %v1184_v35, %s5496_s23  ;;  %v1189_v2 = vmul.f32 %v1174_v4, %v5692_v51  ;;  %v1190_v35 = vmul.f32 %v1179_v3, %v5677_v44 }
 0x34f   : > { %1213 = vrot.lane.b32.xlu1 %v1185_v19, %s5496_s23  ;;  %1215 = vrot.lane.b32.xlu0 %v1186_v37, %s5496_s23  ;;  %v1191_v19 = vmul.f32 %v1179_v3, %v5681_v45 }
 0x353   : > { %1217 = vrot.lane.b32.xlu1 %v1187_v13, %s5496_s23  ;;  %1219 = vrot.lane.b32.xlu0 %v1188_v16, %s5496_s23 }
 0x357   : > { %1221 = vrot.lane.b32.xlu1 %v1189_v2, %s5496_s23  ;;  %1223 = vrot.lane.b32.xlu0 %v1190_v35, %s5496_s23 }
 0x35b   : > { %1225 = vrot.lane.b32.xlu1 %v1191_v19, %s5496_s23  ;;  %1227 = vrot.lane.b32.xlu0 %v1192_v27, %s5496_s23 }
 0x35f   : > { %1255 = vperm.xlu1 %5196, %v4882_v52   ;;  %1259 = vperm.xlu0 %5197, %v4883_v17  }
 0x363   : > { %1263 = vperm.xlu1 %5196, %v4884_v5   ;;  %5204 = vset.pattern.permute.xlu0 %v8616_v47 }
 0x367   : > { %1267 = vperm.xlu1 %5196, %v4885_v50  }
 0x36b   : > { %5203 = vset.pattern.permute.xlu1 %v8616_v47 }
 0x3b9   : > { %v6099_v37 = vpop.permute.xlu1 %1205  ;;  %v6101_v4 = vpop.permute.xlu0 %1207 }
 0x3ba   : > { %8641 = vst [vmem:[#allocation70_spill] sm:$0xff] %v6099_v37  ;;  %8642 = vst [vmem:[#allocation71_spill] sm:$0xff] %v6101_v4 }
 0x3bd   : > { %v6103_v13 = vpop.permute.xlu1 %1209  ;;  %v6105_v16 = vpop.permute.xlu0 %1211 }
 0x3be   : > { %8643 = vst [vmem:[#allocation72_spill] sm:$0xff] %v6103_v13  ;;  %8644 = vst [vmem:[#allocation73_spill] sm:$0xff] %v6105_v16 }
 0x3c1   : > { %v6107_v3 = vpop.permute.xlu1 %1213  ;;  %v6109_v2 = vpop.permute.xlu0 %1215 }
 0x3c2   : > { %8645 = vst [vmem:[#allocation74_spill] sm:$0xff] %v6107_v3  ;;  %8646 = vst [vmem:[#allocation75_spill] sm:$0xff] %v6109_v2 }
 0x3c5   : > { %v6111_v52 = vpop.permute.xlu1 %1217  ;;  %v6113_v17 = vpop.permute.xlu0 %1219 }
 0x3c6   : > { %8647 = vst [vmem:[#allocation76_spill] sm:$0xff] %v6111_v52  ;;  %8648 = vst [vmem:[#allocation77_spill] sm:$0xff] %v6113_v17 }
 0x3c9   : > { %v6115_v5 = vpop.permute.xlu1 %1221  ;;  %v6117_v50 = vpop.permute.xlu0 %1223 }
 0x3ca   : > { %8649 = vst [vmem:[#allocation78_spill] sm:$0xff] %v6115_v5  ;;  %8650 = vst [vmem:[#allocation79_spill] sm:$0xff] %v6117_v50 }
 0x3cd   : > { %v6119_v35 = vpop.permute.xlu1 %1225  ;;  %v6121_v19 = vpop.permute.xlu0 %1227 }
 0x3ce   : > { %8651 = vst [vmem:[#allocation80_spill] sm:$0xff] %v6119_v35  ;;  %8652 = vst [vmem:[#allocation81_spill] sm:$0xff] %v6121_v19 }
 0x3de   : > { %v1256_v27 = vpop.permute.xlu1 %1255  ;;  %v1260_v3 = vpop.permute.xlu0 %1259 }
 0x3df   : > { %v1270_v29 = vmul.f32 %v1256_v27, %v5734_v18  ;;  %v1271_v16 = vmul.f32 %v1256_v27, %v5723_v11  ;;  %v1272_v52 = vmul.f32 %v1256_v27, %v5745_v25  ;;  %v1273_v5 = vmul.f32 %v1260_v3, %v5734_v18 }
 0x3e0   : > { %v1274_v19 = vmul.f32 %v1260_v3, %v5723_v11  ;;  %v1275_v35 = vmul.f32 %v1260_v3, %v5745_v25 }
 0x3e1   : > { %1296 = vrot.lane.b32.xlu1 %v1271_v16, %s5496_s23  ;;  %1294 = vrot.lane.b32.xlu0 %v1270_v29, %s5496_s23 }
 0x3e2   : > { %v1264_v50 = vpop.permute.xlu1 %1263 }
 0x3e3   : > { %v1276_v16 = vmul.f32 %v1264_v50, %v5734_v18  ;;  %v1277_v29 = vmul.f32 %v1264_v50, %v5723_v11 }
 0x3e5   : > { %1298 = vrot.lane.b32.xlu0 %v1272_v52, %s5496_s23  ;;  %1300 = vrot.lane.b32.xlu1 %v1273_v5, %s5496_s23  ;;  %v1278_v52 = vmul.f32 %v1264_v50, %v5745_v25  ;;  %v4887_v50 = vld [vmem:[%s8456_s2 + $0xa8] sm:$0xff] }
 0x3e6   : > { %v1268_v27 = vpop.permute.xlu1 %1267 }
 0x3e7   : > { %v1279_v5 = vmul.f32 %v1268_v27, %v5734_v18  ;;  %v1280_v3 = vmul.f32 %v1268_v27, %v5723_v11 }
 0x3e9   : > { %1302 = vrot.lane.b32.xlu0 %v1274_v19, %s5496_s23  ;;  %1304 = vrot.lane.b32.xlu1 %v1275_v35, %s5496_s23  ;;  %v1281_v35 = vmul.f32 %v1268_v27, %v5745_v25  ;;  %v6150_v19 = vld [vmem:[%s8456_s2 + $0xa0] sm:$0xff] }
 0x3ed   : > { %1306 = vrot.lane.b32.xlu0 %v1276_v16, %s5496_s23  ;;  %1308 = vrot.lane.b32.xlu1 %v1277_v29, %s5496_s23  ;;  %v4888_v16 = vld [vmem:[%s8456_s2 + $0xb0] sm:$0xff]  ;;  %v4889_v29 = vld [vmem:[%s8456_s2 + $0xb8] sm:$0xff] }
 0x3f1   : > { %1310 = vrot.lane.b32.xlu0 %v1278_v52, %s5496_s23  ;;  %1312 = vrot.lane.b32.xlu1 %v1279_v5, %s5496_s23 }
 0x3f5   : > { %1314 = vrot.lane.b32.xlu0 %v1280_v3, %s5496_s23  ;;  %1316 = vrot.lane.b32.xlu1 %v1281_v35, %s5496_s23 }
 0x3f9   : > { %5199 = vrot.lane.b32.xlu0 %v5621_v26, %s5497_s26  ;;  %1361 = vperm.xlu1 %5203, %v6150_v19  }
 0x3fd   : > { %1366 = vperm.xlu0 %5204, %v4887_v50   ;;  %1371 = vperm.xlu1 %5203, %v4888_v16  }
 0x401   : > { %1376 = vperm.xlu1 %5203, %v4889_v29   ;;  %5205 = vset.pattern.permute.xlu0 %v8600_v49 }
 0x405   : > { %5206 = vset.pattern.permute.xlu1 %v8600_v49 }
 0x453   : > { %v6165_v27 = vpop.permute.xlu0 %1294  ;;  %v6167_v52 = vpop.permute.xlu1 %1296 }
 0x454   : > { %8653 = vst [vmem:[#allocation82_spill] sm:$0xff] %v6165_v27  ;;  %8654 = vst [vmem:[#allocation83_spill] sm:$0xff] %v6167_v52 }
 0x457   : > { %v6169_v5 = vpop.permute.xlu0 %1298  ;;  %v6173_v35 = vpop.permute.xlu1 %1300 }
 0x458   : > { %8655 = vst [vmem:[#allocation84_spill] sm:$0xff] %v6169_v5  ;;  %8657 = vst [vmem:[#allocation86_spill] sm:$0xff] %v6173_v35 }
 0x45b   : > { %v6171_v3 = vpop.permute.xlu0 %1302  ;;  %v6177_v2 = vpop.permute.xlu1 %1304 }
 0x45c   : > { %8656 = vst [vmem:[#allocation85_spill] sm:$0xff] %v6171_v3  ;;  %8659 = vst [vmem:[#allocation88_spill] sm:$0xff] %v6177_v2 }
 0x45f   : > { %v6175_v17 = vpop.permute.xlu0 %1306  ;;  %v6183_v37 = vpop.permute.xlu1 %1308 }
 0x460   : > { %8658 = vst [vmem:[#allocation87_spill] sm:$0xff] %v6175_v17  ;;  %8662 = vst [vmem:[#allocation91_spill] sm:$0xff] %v6183_v37 }
 0x463   : > { %v6179_v20 = vpop.permute.xlu0 %1310  ;;  %v6189_v5 = vpop.permute.xlu1 %1312 }
 0x464   : > { %8660 = vst [vmem:[#allocation89_spill] sm:$0xff] %v6179_v20  ;;  %8665 = vst [vmem:[#allocation94_spill] sm:$0xff] %v6189_v5 }
 0x467   : > { %v6181_v13 = vpop.permute.xlu0 %1314  ;;  %v6199_v20 = vpop.permute.xlu1 %1316 }
 0x468   : > { %8661 = vst [vmem:[#allocation90_spill] sm:$0xff] %v6181_v13  ;;  %8667 = vst [vmem:[#allocation96_spill] sm:$0xff] %v6199_v20 }
 0x46b   : > { %v5200_v4 = vpop.permute.xlu0 %5199 }
 0x46c   : > { %v6185_v27 = vunpack.i.h.bf16 %v5200_v4  ;;  %v6187_v52 = vunpack.i.l.bf16 %v5200_v4 }
 0x46e   : > { %8663 = vst [vmem:[#allocation92_spill] sm:$0xff] %v6185_v27  ;;  %8664 = vst [vmem:[#allocation93_spill] sm:$0xff] %v6187_v52  ;;  %v6193_v35 = vsel %vm1351_vm7, %v6187_v52, %v6185_v27  ;;  %v1356_v17 = vmul.f32 %v6187_v52, %v5670_v42  ;;  %v1358_v37 = vmul.f32 %v6185_v27, %v5684_v46 }
 0x46f   : > { %8666 = vst [vmem:[#allocation95_spill] sm:$0xff] %v6193_v35  ;;  %v1357_v13 = vmul.f32 %v6193_v35, %v5673_v43 }
 0x470   : > { %v1382_v4 = vrot.slane %v1356_v17, %v5574_v6  ;;  %v1390_v0 = vrot.slane %v1358_v37, %v5574_v6 }
 0x471   : > { %v1386_v2 = vrot.slane %v1357_v13, %v5574_v6 }
 0x478   : > { %v1362_v5 = vpop.permute.xlu1 %1361 }
 0x479   : > { %v1391_v3 = vmul.f32 %v1382_v4, %v1362_v5  ;;  %v1392_v23 = vmul.f32 %v1386_v2, %v1362_v5  ;;  %v1393_v34 = vmul.f32 %v1390_v0, %v1362_v5 }
 0x47b   : > { %1415 = vrot.lane.b32.xlu0 %v1391_v3, %s5498_s13  ;;  %1417 = vrot.lane.b32.xlu1 %v1392_v23, %s5498_s13  ;;  %v1464_v3 = vmul.f32 %v6187_v52, %v5728_v12 }
 0x47c   : > { %v1367_v24 = vpop.permute.xlu0 %1366  ;;  %v1372_v17 = vpop.permute.xlu1 %1371 }
 0x47d   : > { %v1394_v20 = vmul.f32 %v1382_v4, %v1367_v24  ;;  %v1395_v9 = vmul.f32 %v1386_v2, %v1367_v24  ;;  %v1396_v13 = vmul.f32 %v1390_v0, %v1367_v24  ;;  %v1397_v37 = vmul.f32 %v1382_v4, %v1372_v17 }
 0x47e   : > { %v1398_v15 = vmul.f32 %v1386_v2, %v1372_v17  ;;  %v1399_v23 = vmul.f32 %v1390_v0, %v1372_v17 }
 0x47f   : > { %1419 = vrot.lane.b32.xlu0 %v1393_v34, %s5498_s13  ;;  %1421 = vrot.lane.b32.xlu1 %v1394_v20, %s5498_s13 }
 0x480   : > { %v1377_v10 = vpop.permute.xlu1 %1376 }
 0x481   : > { %v1400_v5 = vmul.f32 %v1382_v4, %v1377_v10  ;;  %v1401_v34 = vmul.f32 %v1386_v2, %v1377_v10  ;;  %v1402_v20 = vmul.f32 %v1390_v0, %v1377_v10  ;;  %v1465_v4 = vmul.f32 %v6193_v35, %v5715_v1 }
 0x483   : > { %1423 = vrot.lane.b32.xlu0 %v1395_v9, %s5498_s13  ;;  %1425 = vrot.lane.b32.xlu1 %v1396_v13, %s5498_s13 }
 0x487   : > { %1427 = vrot.lane.b32.xlu0 %v1397_v37, %s5498_s13  ;;  %1429 = vrot.lane.b32.xlu1 %v1398_v15, %s5498_s13  ;;  %v1466_v37 = vmul.f32 %v6185_v27, %v5739_v22 }
 0x489   : > { %v1494_v52 = vrot.slane %v1466_v37, %v5574_v6 }
 0x48b   : > { %1431 = vrot.lane.b32.xlu0 %v1399_v23, %s5498_s13  ;;  %1433 = vrot.lane.b32.xlu1 %v1400_v5, %s5498_s13  ;;  %v1486_v23 = vrot.slane %v1464_v3, %v5574_v6  ;;  %v1490_v5 = vrot.slane %v1465_v4, %v5574_v6 }
 0x48f   : > { %1435 = vrot.lane.b32.xlu0 %v1401_v34, %s5498_s13  ;;  %1437 = vrot.lane.b32.xlu1 %v1402_v20, %s5498_s13 }
 0x493   : > { %1468 = vperm.xlu0 %5205, %v6150_v19   ;;  %1472 = vperm.xlu1 %5206, %v4887_v50  }
 0x497   : > { %1480 = vperm.xlu0 %5205, %v4889_v29   ;;  %1476 = vperm.xlu1 %5206, %v4888_v16  }
 0x49b   : > { %5212 = vset.pattern.permute.xlu0 %v8616_v47  ;;  %5213 = vset.pattern.permute.xlu1 %v8616_v47 }
 0x4ed   : > { %v6221_v9 = vpop.permute.xlu0 %1415  ;;  %v6223_v15 = vpop.permute.xlu1 %1417 }
 0x4ee   : > { %8668 = vst [vmem:[#allocation97_spill] sm:$0xff] %v6221_v9 }
 0x4f1   : > { %v6225_v24 = vpop.permute.xlu0 %1419  ;;  %v6227_v10 = vpop.permute.xlu1 %1421 }
 0x4f2   : > { %8669 = vst [vmem:[#allocation98_spill] sm:$0xff] %v6225_v24  ;;  %8670 = vst [vmem:[#allocation99_spill] sm:$0xff] %v6227_v10 }
 0x4f5   : > { %v6229_v0 = vpop.permute.xlu0 %1423  ;;  %v6231_v2 = vpop.permute.xlu1 %1425 }
 0x4f6   : > { %8671 = vst [vmem:[#allocation100_spill] sm:$0xff] %v6229_v0  ;;  %8672 = vst [vmem:[#allocation101_spill] sm:$0xff] %v6231_v2 }
 0x4f9   : > { %v6233_v19 = vpop.permute.xlu0 %1427  ;;  %v6235_v50 = vpop.permute.xlu1 %1429 }
 0x4fa   : > { %8673 = vst [vmem:[#allocation102_spill] sm:$0xff] %v6233_v19  ;;  %8674 = vst [vmem:[#allocation103_spill] sm:$0xff] %v6235_v50 }
 0x4fd   : > { %v6237_v16 = vpop.permute.xlu0 %1431  ;;  %v6239_v29 = vpop.permute.xlu1 %1433 }
 0x4fe   : > { %8675 = vst [vmem:[#allocation104_spill] sm:$0xff] %v6237_v16  ;;  %8676 = vst [vmem:[#allocation105_spill] sm:$0xff] %v6239_v29 }
 0x501   : > { %v6245_v17 = vpop.permute.xlu0 %1435  ;;  %v6247_v13 = vpop.permute.xlu1 %1437 }
 0x502   : > { %8677 = vst [vmem:[#allocation106_spill] sm:$0xff] %v6245_v17  ;;  %8678 = vst [vmem:[#allocation107_spill] sm:$0xff] %v6247_v13 }
 0x512   : > { %v1469_v34 = vpop.permute.xlu0 %1468  ;;  %v1473_v16 = vpop.permute.xlu1 %1472 }
 0x513   : > { %v1495_v20 = vmul.f32 %v1486_v23, %v1469_v34  ;;  %v1496_v29 = vmul.f32 %v1490_v5, %v1469_v34  ;;  %v1497_v35 = vmul.f32 %v1494_v52, %v1469_v34  ;;  %v1498_v17 = vmul.f32 %v1486_v23, %v1473_v16 }
 0x514   : > { %v1499_v27 = vmul.f32 %v1490_v5, %v1473_v16  ;;  %v1500_v3 = vmul.f32 %v1494_v52, %v1473_v16 }
 0x515   : > { %1521 = vrot.lane.b32.xlu0 %v1496_v29, %s5498_s13  ;;  %1519 = vrot.lane.b32.xlu1 %v1495_v20, %s5498_s13 }
 0x516   : > { %v1477_v13 = vpop.permute.xlu1 %1476  ;;  %v1481_v37 = vpop.permute.xlu0 %1480 }
 0x517   : > { %v1501_v4 = vmul.f32 %v1486_v23, %v1477_v13  ;;  %v1502_v19 = vmul.f32 %v1490_v5, %v1477_v13  ;;  %v1504_v29 = vmul.f32 %v1486_v23, %v1481_v37  ;;  %v1503_v34 = vmul.f32 %v1494_v52, %v1477_v13 }
 0x518   : > { %v1506_v16 = vmul.f32 %v1494_v52, %v1481_v37  ;;  %v4891_v52 = vld [vmem:[%s8456_s2 + $0xc8] sm:$0xff] }
 0x519   : > { %1523 = vrot.lane.b32.xlu1 %v1497_v35, %s5498_s13  ;;  %1525 = vrot.lane.b32.xlu0 %v1498_v17, %s5498_s13  ;;  %v1505_v35 = vmul.f32 %v1490_v5, %v1481_v37  ;;  %v4892_v17 = vld [vmem:[%s8456_s2 + $0xd0] sm:$0xff] }
 0x51d   : > { %1527 = vrot.lane.b32.xlu1 %v1499_v27, %s5498_s13  ;;  %1529 = vrot.lane.b32.xlu0 %v1500_v3, %s5498_s13  ;;  %v6269_v27 = vld [vmem:[%s8456_s2 + $0xc0] sm:$0xff] }
 0x521   : > { %1533 = vrot.lane.b32.xlu0 %v1502_v19, %s5498_s13  ;;  %1531 = vrot.lane.b32.xlu1 %v1501_v4, %s5498_s13  ;;  %v6276_v19 = vld [vmem:[%s8456_s2 + $0xd8] sm:$0xff] }
 0x525   : > { %1537 = vrot.lane.b32.xlu0 %v1504_v29, %s5498_s13  ;;  %1535 = vrot.lane.b32.xlu1 %v1503_v34, %s5498_s13 }
 0x529   : > { %1541 = vrot.lane.b32.xlu0 %v1506_v16, %s5498_s13  ;;  %1539 = vrot.lane.b32.xlu1 %v1505_v35, %s5498_s13 }
 0x52d   : > { %1586 = vperm.xlu0 %5212, %v6269_v27   ;;  %5208 = vrot.lane.b32.xlu1 %v5910_v14, %s5499_s16  ;;  %s5502_s16 = smov 34  }
 0x531   : > { %1601 = vperm.xlu0 %5212, %v6276_v19   ;;  %1591 = vperm.xlu1 %5213, %v4891_v52  }
 0x535   : > { %1596 = vperm.xlu1 %5213, %v4892_v17   ;;  %5215 = vset.pattern.permute.xlu0 %v8600_v49 }
 0x539   : > { %5214 = vset.pattern.permute.xlu1 %v8600_v49 }
 0x587   : > { %v6287_v14 = vpop.permute.xlu1 %1519  ;;  %v6289_v13 = vpop.permute.xlu0 %1521 }
 0x588   : > { %8679 = vst [vmem:[#allocation108_spill] sm:$0xff] %v6287_v14  ;;  %8680 = vst [vmem:[#allocation109_spill] sm:$0xff] %v6289_v13 }
 0x58b   : > { %v6291_v23 = vpop.permute.xlu1 %1523  ;;  %v6295_v20 = vpop.permute.xlu0 %1525 }
 0x58c   : > { %8681 = vst [vmem:[#allocation110_spill] sm:$0xff] %v6291_v23  ;;  %8683 = vst [vmem:[#allocation112_spill] sm:$0xff] %v6295_v20 }
 0x58f   : > { %v6293_v5 = vpop.permute.xlu1 %1527  ;;  %v6299_v4 = vpop.permute.xlu0 %1529 }
 0x590   : > { %8682 = vst [vmem:[#allocation111_spill] sm:$0xff] %v6293_v5  ;;  %8685 = vst [vmem:[#allocation114_spill] sm:$0xff] %v6299_v4 }
 0x593   : > { %v6297_v3 = vpop.permute.xlu1 %1531  ;;  %v6305_v34 = vpop.permute.xlu0 %1533 }
 0x594   : > { %8684 = vst [vmem:[#allocation113_spill] sm:$0xff] %v6297_v3  ;;  %8688 = vst [vmem:[#allocation117_spill] sm:$0xff] %v6305_v34 }
 0x597   : > { %v6301_v37 = vpop.permute.xlu1 %1535  ;;  %v6311_v2 = vpop.permute.xlu0 %1537 }
 0x598   : > { %8686 = vst [vmem:[#allocation115_spill] sm:$0xff] %v6301_v37  ;;  %8691 = vst [vmem:[#allocation120_spill] sm:$0xff] %v6311_v2 }
 0x59b   : > { %v6303_v29 = vpop.permute.xlu1 %1539  ;;  %v6322_v34 = vpop.permute.xlu0 %1541 }
 0x59c   : > { %8687 = vst [vmem:[#allocation116_spill] sm:$0xff] %v6303_v29  ;;  %8693 = vst [vmem:[#allocation122_spill] sm:$0xff] %v6322_v34 }
 0x59f   : > { %v5209_v35 = vpop.permute.xlu1 %5208 }
 0x5a0   : > { %v6307_v16 = vunpack.i.h.bf16 %v5209_v35  ;;  %v6309_v50 = vunpack.i.l.bf16 %v5209_v35 }
 0x5a2   : > { %8689 = vst [vmem:[#allocation118_spill] sm:$0xff] %v6307_v16  ;;  %8690 = vst [vmem:[#allocation119_spill] sm:$0xff] %v6309_v50  ;;  %v6316_v3 = vsel %vm1576_vm8, %v6309_v50, %v6307_v16  ;;  %v1581_v37 = vmul.f32 %v6309_v50, %v5670_v42  ;;  %v1583_v35 = vmul.f32 %v6307_v16, %v5684_v46 }
 0x5a3   : > { %8692 = vst [vmem:[#allocation121_spill] sm:$0xff] %v6316_v3  ;;  %v1582_v29 = vmul.f32 %v6316_v3, %v5673_v43 }
 0x5a4   : > { %v1607_v4 = vrot.slane %v1581_v37, %v5574_v6  ;;  %v1615_v0 = vrot.slane %v1583_v35, %v5574_v6 }
 0x5a5   : > { %v1611_v2 = vrot.slane %v1582_v29, %v5574_v6 }
 0x5ac   : > { %v1587_v20 = vpop.permute.xlu0 %1586 }
 0x5ad   : > { %v1616_v5 = vmul.f32 %v1607_v4, %v1587_v20  ;;  %v1617_v10 = vmul.f32 %v1611_v2, %v1587_v20  ;;  %v1618_v14 = vmul.f32 %v1615_v0, %v1587_v20 }
 0x5af   : > { %1640 = vrot.lane.b32.xlu1 %v1616_v5, %s5500_s27  ;;  %1642 = vrot.lane.b32.xlu0 %v1617_v10, %s5500_s27 }
 0x5b0   : > { %v1592_v23 = vpop.permute.xlu1 %1591  ;;  %v1602_v9 = vpop.permute.xlu0 %1601 }
 0x5b1   : > { %v1619_v34 = vmul.f32 %v1607_v4, %v1592_v23  ;;  %v1620_v37 = vmul.f32 %v1611_v2, %v1592_v23  ;;  %v1621_v13 = vmul.f32 %v1615_v0, %v1592_v23  ;;  %v1625_v10 = vmul.f32 %v1607_v4, %v1602_v9 }
 0x5b2   : > { %v1627_v23 = vmul.f32 %v1615_v0, %v1602_v9 }
 0x5b3   : > { %1644 = vrot.lane.b32.xlu1 %v1618_v14, %s5500_s27  ;;  %1646 = vrot.lane.b32.xlu0 %v1619_v34, %s5500_s27  ;;  %v1626_v14 = vmul.f32 %v1611_v2, %v1602_v9  ;;  %v1690_v34 = vmul.f32 %v6316_v3, %v5715_v1 }
 0x5b4   : > { %v1597_v29 = vpop.permute.xlu1 %1596 }
 0x5b5   : > { %v1622_v35 = vmul.f32 %v1607_v4, %v1597_v29  ;;  %v1623_v24 = vmul.f32 %v1611_v2, %v1597_v29  ;;  %v1624_v5 = vmul.f32 %v1615_v0, %v1597_v29  ;;  %v1689_v4 = vmul.f32 %v6309_v50, %v5728_v12 }
 0x5b7   : > { %1648 = vrot.lane.b32.xlu1 %v1620_v37, %s5500_s27  ;;  %1650 = vrot.lane.b32.xlu0 %v1621_v13, %s5500_s27 }
 0x5bb   : > { %1652 = vrot.lane.b32.xlu1 %v1622_v35, %s5500_s27  ;;  %1654 = vrot.lane.b32.xlu0 %v1623_v24, %s5500_s27  ;;  %v1691_v35 = vmul.f32 %v6307_v16, %v5739_v22 }
 0x5bd   : > { %v1719_v50 = vrot.slane %v1691_v35, %v5574_v6 }
 0x5bf   : > { %1656 = vrot.lane.b32.xlu1 %v1624_v5, %s5500_s27  ;;  %1658 = vrot.lane.b32.xlu0 %v1625_v10, %s5500_s27  ;;  %v1711_v10 = vrot.slane %v1689_v4, %v5574_v6  ;;  %v1715_v5 = vrot.slane %v1690_v34, %v5574_v6 }
 0x5c3   : > { %1660 = vrot.lane.b32.xlu1 %v1626_v14, %s5500_s27  ;;  %1662 = vrot.lane.b32.xlu0 %v1627_v23, %s5500_s27 }
 0x5c7   : > { %1693 = vperm.xlu1 %5214, %v6269_v27   ;;  %1697 = vperm.xlu0 %5215, %v4891_v52  }
 0x5cb   : > { %1701 = vperm.xlu1 %5214, %v4892_v17   ;;  %5216 = vset.pattern.permute.xlu0 %v8616_v47 }
 0x5cf   : > { %1705 = vperm.xlu1 %5214, %v6276_v19  }
 0x5d3   : > { %5217 = vset.pattern.permute.xlu1 %v8616_v47 }
 0x621   : > { %v6345_v24 = vpop.permute.xlu1 %1640  ;;  %v6347_v13 = vpop.permute.xlu0 %1642 }
 0x625   : > { %v6349_v2 = vpop.permute.xlu1 %1644  ;;  %v6351_v9 = vpop.permute.xlu0 %1646 }
 0x629   : > { %v6353_v0 = vpop.permute.xlu1 %1648  ;;  %v6355_v20 = vpop.permute.xlu0 %1650 }
 0x62a   : > { %8694 = vst [vmem:[#allocation123_spill] sm:$0xff] %v6355_v20 }
 0x62d   : > { %v6357_v27 = vpop.permute.xlu1 %1652  ;;  %v6359_v52 = vpop.permute.xlu0 %1654 }
 0x62e   : > { %8695 = vst [vmem:[#allocation124_spill] sm:$0xff] %v6357_v27  ;;  %8696 = vst [vmem:[#allocation125_spill] sm:$0xff] %v6359_v52 }
 0x631   : > { %v6361_v17 = vpop.permute.xlu1 %1656  ;;  %v6363_v19 = vpop.permute.xlu0 %1658 }
 0x632   : > { %8697 = vst [vmem:[#allocation126_spill] sm:$0xff] %v6361_v17  ;;  %8698 = vst [vmem:[#allocation127_spill] sm:$0xff] %v6363_v19 }
 0x635   : > { %v6369_v37 = vpop.permute.xlu1 %1660  ;;  %v6371_v29 = vpop.permute.xlu0 %1662 }
 0x636   : > { %8699 = vst [vmem:[#allocation128_spill] sm:$0xff] %v6369_v37  ;;  %8700 = vst [vmem:[#allocation129_spill] sm:$0xff] %v6371_v29 }
 0x646   : > { %v1694_v14 = vpop.permute.xlu1 %1693  ;;  %v1698_v17 = vpop.permute.xlu0 %1697 }
 0x647   : > { %v1720_v23 = vmul.f32 %v1711_v10, %v1694_v14  ;;  %v1721_v19 = vmul.f32 %v1715_v5, %v1694_v14  ;;  %v1722_v3 = vmul.f32 %v1719_v50, %v1694_v14  ;;  %v1723_v37 = vmul.f32 %v1711_v10, %v1698_v17 }
 0x648   : > { %v1724_v4 = vmul.f32 %v1715_v5, %v1698_v17  ;;  %v1725_v29 = vmul.f32 %v1719_v50, %v1698_v17  ;;  %v4894_v17 = vld [vmem:[%s8456_s2 + $0xe0] sm:$0xff] }
 0x649   : > { %1746 = vrot.lane.b32.xlu1 %v1721_v19, %s5500_s27  ;;  %1744 = vrot.lane.b32.xlu0 %v1720_v23, %s5500_s27 }
 0x64a   : > { %v1702_v16 = vpop.permute.xlu1 %1701 }
 0x64b   : > { %v1726_v34 = vmul.f32 %v1711_v10, %v1702_v16  ;;  %v1727_v27 = vmul.f32 %v1715_v5, %v1702_v16  ;;  %v1728_v19 = vmul.f32 %v1719_v50, %v1702_v16  ;;  %v4896_v16 = vld [vmem:[%s8456_s2 + $0xf0] sm:$0xff] }
 0x64d   : > { %1748 = vrot.lane.b32.xlu0 %v1722_v3, %s5500_s27  ;;  %1750 = vrot.lane.b32.xlu1 %v1723_v37, %s5500_s27 }
 0x64e   : > { %v1706_v35 = vpop.permute.xlu1 %1705 }
 0x64f   : > { %v1729_v14 = vmul.f32 %v1711_v10, %v1706_v35  ;;  %v1730_v3 = vmul.f32 %v1715_v5, %v1706_v35  ;;  %v1731_v37 = vmul.f32 %v1719_v50, %v1706_v35 }
 0x651   : > { %1752 = vrot.lane.b32.xlu0 %v1724_v4, %s5500_s27  ;;  %1754 = vrot.lane.b32.xlu1 %v1725_v29, %s5500_s27 }
 0x655   : > { %1756 = vrot.lane.b32.xlu0 %v1726_v34, %s5500_s27  ;;  %1758 = vrot.lane.b32.xlu1 %v1727_v27, %s5500_s27  ;;  %v4895_v27 = vld [vmem:[%s8456_s2 + $0xe8] sm:$0xff] }
 0x659   : > { %1760 = vrot.lane.b32.xlu0 %v1728_v19, %s5500_s27  ;;  %1762 = vrot.lane.b32.xlu1 %v1729_v14, %s5500_s27 }
 0x65d   : > { %1764 = vrot.lane.b32.xlu0 %v1730_v3, %s5500_s27  ;;  %1766 = vrot.lane.b32.xlu1 %v1731_v37, %s5500_s27 }
 0x661   : > { %1799 = vperm.xlu0 %5216, %v4894_v17   ;;  %1804 = vperm.xlu1 %5217, %v4895_v27  }
 0x665   : > { %1809 = vperm.xlu1 %5217, %v4896_v16   ;;  %5218 = vset.pattern.permute.xlu0 %v8600_v49 }
 0x669   : > { %5219 = vset.pattern.permute.xlu1 %v8600_v49 }
 0x6bb   : > { %v6401_v50 = vpop.permute.xlu0 %1744  ;;  %v6403_v29 = vpop.permute.xlu1 %1746 }
 0x6bf   : > { %v6405_v10 = vpop.permute.xlu0 %1748  ;;  %v6407_v5 = vpop.permute.xlu1 %1750 }
 0x6c0   : > { %8701 = vst [vmem:[#allocation130_spill] sm:$0xff] %v6407_v5 }
 0x6c3   : > { %v6409_v23 = vpop.permute.xlu0 %1752  ;;  %v6411_v4 = vpop.permute.xlu1 %1754 }
 0x6c4   : > { %8702 = vst [vmem:[#allocation131_spill] sm:$0xff] %v6409_v23  ;;  %8703 = vst [vmem:[#allocation132_spill] sm:$0xff] %v6411_v4 }
 0x6c7   : > { %v6413_v34 = vpop.permute.xlu0 %1756  ;;  %v6415_v35 = vpop.permute.xlu1 %1758 }
 0x6c8   : > { %8704 = vst [vmem:[#allocation133_spill] sm:$0xff] %v6413_v34  ;;  %8705 = vst [vmem:[#allocation134_spill] sm:$0xff] %v6415_v35 }
 0x6cb   : > { %v6417_v19 = vpop.permute.xlu0 %1760  ;;  %v6419_v14 = vpop.permute.xlu1 %1762 }
 0x6cc   : > { %8706 = vst [vmem:[#allocation135_spill] sm:$0xff] %v6417_v19  ;;  %8707 = vst [vmem:[#allocation136_spill] sm:$0xff] %v6419_v14 }
 0x6cf   : > { %v6421_v3 = vpop.permute.xlu0 %1764  ;;  %v6423_v37 = vpop.permute.xlu1 %1766 }
 0x6d0   : > { %8708 = vst [vmem:[#allocation137_spill] sm:$0xff] %v6421_v3  ;;  %8709 = vst [vmem:[#allocation138_spill] sm:$0xff] %v6423_v37 }
 0x6e0   : > { %v1800_v52 = vpop.permute.xlu0 %1799  ;;  %v1805_v23 = vpop.permute.xlu1 %1804 }
 0x6e1   : > { %v1817_v20 = vmul.f32 %v1800_v52, %v5677_v44  ;;  %v1818_v5 = vmul.f32 %v1800_v52, %v5681_v45  ;;  %v1819_v34 = vmul.f32 %v1800_v52, %v5692_v51  ;;  %v1820_v19 = vmul.f32 %v1805_v23, %v5677_v44  ;;  %v4898_v52 = vld [vmem:[%s8456_s2 + $0x100] sm:$0xff] }
 0x6e2   : > { %v1821_v37 = vmul.f32 %v1805_v23, %v5681_v45 }
 0x6e3   : > { %1841 = vrot.lane.b32.xlu1 %v1817_v20, %s5501_s15  ;;  %1843 = vrot.lane.b32.xlu0 %v1818_v5, %s5501_s15  ;;  %v4899_v20 = vld [vmem:[%s8456_s2 + $0x108] sm:$0xff] }
 0x6e4   : > { %v1810_v5 = vpop.permute.xlu1 %1809 }
 0x6e7   : > { %1845 = vrot.lane.b32.xlu1 %v1819_v34, %s5501_s15  ;;  %1847 = vrot.lane.b32.xlu0 %v1820_v19, %s5501_s15  ;;  %v4901_v34 = vld [vmem:[%s8456_s2 + $0x118] sm:$0xff]  ;;  %v1825_v19 = vmul.f32 %v1810_v5, %v5692_v51 }
 0x6eb   : > { %1849 = vrot.lane.b32.xlu1 %v1821_v37, %s5501_s15  ;;  %1891 = vperm.xlu0 %5218, %v4894_v17   ;;  %v4900_v17 = vld [vmem:[%s8456_s2 + $0x110] sm:$0xff] }
 0x6ef   : > { %1895 = vperm.xlu1 %5219, %v4895_v27   ;;  %5223 = vrot.lane.b32.xlu0 %v5621_v26, %s5502_s16  ;;  %v4897_v26 = vld [vmem:[%s8456_s2 + $0xf8] sm:$0xff]  ;;  %v1822_v27 = vmul.f32 %v1805_v23, %v5692_v51  ;;  %v1823_v23 = vmul.f32 %v1810_v5, %v5677_v44 }
 0x6f3   : > { %5220 = vset.pattern.permute.xlu1 %v8616_v47  ;;  %2108 = vperm.xlu0 %5218, %v4899_v20  }
 0x6f4   : > { %1997 = vperm.xlu1 %5220, %v4898_v52  }
 0x6f7   : > { %2112 = vperm.xlu0 %5218, %v4900_v17  }
 0x6f8   : > { %5221 = vset.pattern.permute.xlu1 %v8600_v49 }
 0x6f9   : > { %1899 = vperm.xlu1 %5221, %v4896_v16   ;;  %v1824_v16 = vmul.f32 %v1810_v5, %v5681_v45 }
 0x6fb   : > { %5228 = vset.pattern.permute.xlu0 %v8616_v47 }
 0x6fc   : > { %1814 = vperm.xlu0 %5228, %v4897_v26  }
 0x6fd   : > { %1903 = vperm.xlu1 %5221, %v4897_v26  }
 0x700   : > { %2002 = vperm.xlu0 %5228, %v4899_v20  }
 0x701   : > { %2104 = vperm.xlu1 %5221, %v4898_v52  }
 0x704   : > { %1851 = vrot.lane.b32.xlu0 %v1822_v27, %s5501_s15 }
 0x705   : > { %5227 = vset.pattern.permute.xlu1 %v8616_v47 }
 0x706   : > { %2007 = vperm.xlu1 %5227, %v4900_v17  }
 0x708   : > { %1855 = vrot.lane.b32.xlu0 %v1824_v16, %s5501_s15 }
 0x70a   : > { %2012 = vperm.xlu1 %5227, %v4901_v34  }
 0x70e   : > { %5229 = vset.pattern.permute.xlu1 %v8600_v49 }
 0x70f   : > { %2116 = vperm.xlu1 %5229, %v4901_v34  }
 0x713   : > { %1853 = vrot.lane.b32.xlu1 %v1823_v23, %s5501_s15 }
 0x714   : > { %5230 = vset.pattern.permute.xlu1 %v8616_v47 }
 0x717   : > { %1857 = vrot.lane.b32.xlu1 %v1825_v19, %s5501_s15 }
 0x755   : > { %v6465_v37 = vpop.permute.xlu0 %1843  ;;  %v6471_v49 = vpop.permute.xlu1 %1841 }
 0x759   : > { %v6467_v20 = vpop.permute.xlu0 %1847  ;;  %v6475_v16 = vpop.permute.xlu1 %1845 }
 0x75a   : > { %8710 = vst [vmem:[#allocation139_spill] sm:$0xff] %v6467_v20 }
 0x75d   : > { %v6483_v14 = vpop.permute.xlu1 %1849 }
 0x75e   : > { %8711 = vst [vmem:[#allocation140_spill] sm:$0xff] %v6483_v14 }
 0x76a   : > { %v1892_v52 = vpop.permute.xlu0 %1891 }
 0x76b   : > { %v1906_v23 = vmul.f32 %v1892_v52, %v5734_v18  ;;  %v1907_v3 = vmul.f32 %v1892_v52, %v5723_v11 }
 0x76e   : > { %v5224_v17 = vpop.permute.xlu0 %5223 }
 0x76f   : > { %v6489_v35 = vunpack.i.l.bf16 %v5224_v17 }
 0x771   : > { %8712 = vst [vmem:[#allocation141_spill] sm:$0xff] %v6489_v35  ;;  %v2100_v14 = vmul.f32 %v6489_v35, %v5728_v12 }
 0x772   : > { %v6469_v26 = vpop.permute.xlu0 %2108 }
 0x776   : > { %v6473_v27 = vpop.permute.xlu0 %2112 }
 0x77b   : > { %v1815_v34 = vpop.permute.xlu0 %1814 }
 0x77c   : > { %v1826_v47 = vmul.f32 %v1815_v34, %v5677_v44  ;;  %v1827_v5 = vmul.f32 %v1815_v34, %v5681_v45  ;;  %v1828_v19 = vmul.f32 %v1815_v34, %v5692_v51  ;;  %v1908_v44 = vmul.f32 %v1892_v52, %v5745_v25 }
 0x77d   : > { %v6491_v45 = vunpack.i.h.bf16 %v5224_v17 }
 0x77e   : > { %1859 = vrot.lane.b32.xlu0 %v1826_v47, %s5501_s15  ;;  %1861 = vrot.lane.b32.xlu1 %v1827_v5, %s5501_s15  ;;  %v1896_v47 = vpop.permute.xlu1 %1895  ;;  %v1992_v5 = vmul.f32 %v6489_v35, %v5670_v42 }
 0x77f   : > { %8713 = vst [vmem:[#allocation142_spill] sm:$0xff] %v6491_v45  ;;  %v1909_v51 = vmul.f32 %v1896_v47, %v5734_v18  ;;  %v1910_v34 = vmul.f32 %v1896_v47, %v5723_v11  ;;  %v6501_v52 = vsel %vm1987_vm9, %v6489_v35, %v6491_v45  ;;  %v1911_v17 = vmul.f32 %v1896_v47, %v5745_v25 }
 0x780   : > { %8714 = vst [vmem:[#allocation143_spill] sm:$0xff] %v6501_v52 }
 0x782   : > { %1863 = vrot.lane.b32.xlu0 %v1828_v19, %s5501_s15  ;;  %1930 = vrot.lane.b32.xlu1 %v1906_v23, %s5501_s15  ;;  %v1993_v23 = vmul.f32 %v6501_v52, %v5673_v43  ;;  %v1994_v19 = vmul.f32 %v6491_v45, %v5684_v46  ;;  %v1998_v4 = vpop.permute.xlu1 %1997 }
 0x784   : > { %v6524_v47 = vrot.slane %v1994_v19, %v5574_v6 }
 0x786   : > { %1932 = vrot.lane.b32.xlu0 %v1907_v3, %s5501_s15  ;;  %1934 = vrot.lane.b32.xlu1 %v1908_v44, %s5501_s15  ;;  %v2203_v3 = vld [vmem:[%s8457_s3] sm:$0xff]  ;;  %v6514_v44 = vrot.slane %v1992_v5, %v5574_v6  ;;  %v2029_v5 = vmul.f32 %v6524_v47, %v1998_v4  ;;  %v1900_v19 = vpop.permute.xlu1 %1899 }
 0x788   : > { %v2027_v20 = vmul.f32 %v6514_v44, %v1998_v4 }
 0x78a   : > { %1938 = vrot.lane.b32.xlu1 %v1910_v34, %s5501_s15  ;;  %1936 = vrot.lane.b32.xlu0 %v1909_v51, %s5501_s15  ;;  %v2204_v51 = vld [vmem:[%s8457_s3 + $0x8] sm:$0xff]  ;;  %v6521_v34 = vrot.slane %v1993_v23, %v5574_v6 }
 0x78c   : > { %v2028_v46 = vmul.f32 %v6521_v34, %v1998_v4  ;;  %v1904_v4 = vpop.permute.xlu1 %1903 }
 0x78e   : > { %2209 = vperm.xlu1 %5230, %v2203_v3   ;;  %1940 = vrot.lane.b32.xlu0 %v1911_v17, %s5501_s15  ;;  %v2003_v3 = vpop.permute.xlu0 %2002 }
 0x78f   : > { %v2030_v17 = vmul.f32 %v6514_v44, %v2003_v3  ;;  %v2031_v23 = vmul.f32 %v6521_v34, %v2003_v3 }
 0x792   : > { %2214 = vperm.xlu0 %5228, %v2204_v51   ;;  %2051 = vrot.lane.b32.xlu1 %v2027_v20, %s5503_s19  ;;  %v1912_v20 = vmul.f32 %v1900_v19, %v5734_v18  ;;  %v2032_v51 = vmul.f32 %v6524_v47, %v2003_v3  ;;  %v1916_v3 = vmul.f32 %v1904_v4, %v5723_v11 }
 0x796   : > { %2055 = vrot.lane.b32.xlu0 %v2029_v5, %s5503_s19  ;;  %2053 = vrot.lane.b32.xlu1 %v2028_v46, %s5503_s19  ;;  %v1913_v46 = vmul.f32 %v1900_v19, %v5723_v11  ;;  %v1914_v5 = vmul.f32 %v1900_v19, %v5745_v25  ;;  %v2122_v19 = vrot.slane %v2100_v14, %v5574_v6 }
 0x79a   : > { %2059 = vrot.lane.b32.xlu0 %v2031_v23, %s5503_s19  ;;  %2057 = vrot.lane.b32.xlu1 %v2030_v17, %s5503_s19  ;;  %v1915_v17 = vmul.f32 %v1904_v4, %v5734_v18  ;;  %v2105_v23 = vpop.permute.xlu1 %2104 }
 0x79e   : > { %2061 = vrot.lane.b32.xlu1 %v2032_v51, %s5503_s19  ;;  %1942 = vrot.lane.b32.xlu0 %v1912_v20, %s5501_s15  ;;  %v2101_v20 = vmul.f32 %v6501_v52, %v5715_v1  ;;  %v2102_v51 = vmul.f32 %v6491_v45, %v5739_v22  ;;  %v2134_v22 = vmul.f32 %v2122_v19, %v6469_v26 }
 0x7a0   : > { %v2126_v18 = vrot.slane %v2101_v20, %v5574_v6  ;;  %v2130_v11 = vrot.slane %v2102_v51, %v5574_v6 }
 0x7a2   : > { %1944 = vrot.lane.b32.xlu1 %v1913_v46, %s5501_s15  ;;  %1946 = vrot.lane.b32.xlu0 %v1914_v5, %s5501_s15  ;;  %v1917_v46 = vmul.f32 %v1904_v4, %v5745_v25  ;;  %v2131_v5 = vmul.f32 %v2122_v19, %v2105_v23  ;;  %v2132_v35 = vmul.f32 %v2126_v18, %v2105_v23  ;;  %v2205_v25 = vld [vmem:[%s8457_s3 + $0x10] sm:$0xff] }
 0x7a3   : > { %v2133_v52 = vmul.f32 %v2130_v11, %v2105_v23  ;;  %v2135_v14 = vmul.f32 %v2126_v18, %v6469_v26  ;;  %v2136_v4 = vmul.f32 %v2130_v11, %v6469_v26 }
 0x7a6   : > { %1950 = vrot.lane.b32.xlu0 %v1916_v3, %s5501_s15  ;;  %1948 = vrot.lane.b32.xlu1 %v1915_v17, %s5501_s15  ;;  %v2008_v17 = vpop.permute.xlu1 %2007 }
 0x7a7   : > { %v2034_v3 = vmul.f32 %v6521_v34, %v2008_v17  ;;  %v2035_v23 = vmul.f32 %v6524_v47, %v2008_v17 }
 0x7aa   : > { %1952 = vrot.lane.b32.xlu1 %v1917_v46, %s5501_s15  ;;  %2155 = vrot.lane.b32.xlu0 %v2131_v5, %s5503_s19  ;;  %v2013_v20 = vpop.permute.xlu1 %2012  ;;  %v2137_v46 = vmul.f32 %v2122_v19, %v6473_v27 }
 0x7ab   : > { %v2036_v26 = vmul.f32 %v6514_v44, %v2013_v20  ;;  %v2037_v51 = vmul.f32 %v6521_v34, %v2013_v20  ;;  %v2038_v5 = vmul.f32 %v6524_v47, %v2013_v20  ;;  %v451_v20 = vmul.f32 %v5904_v21, %v5715_v1 }
 0x7ae   : > { %2157 = vrot.lane.b32.xlu1 %v2132_v35, %s5503_s19  ;;  %2159 = vrot.lane.b32.xlu0 %v2133_v52, %s5503_s19  ;;  %v2206_v35 = vld [vmem:[%s8457_s3 + $0x18] sm:$0xff]  ;;  %v2033_v52 = vmul.f32 %v6514_v44, %v2008_v17 }
 0x7b2   : > { %2161 = vrot.lane.b32.xlu1 %v2134_v22, %s5503_s19  ;;  %2163 = vrot.lane.b32.xlu0 %v2135_v14, %s5503_s19  ;;  %v2138_v22 = vmul.f32 %v2126_v18, %v6473_v27  ;;  %v2139_v14 = vmul.f32 %v2130_v11, %v6473_v27 }
 0x7b6   : > { %2165 = vrot.lane.b32.xlu1 %v2136_v4, %s5503_s19  ;;  %2219 = vperm.xlu0 %5228, %v2205_v25   ;;  %v2117_v25 = vpop.permute.xlu1 %2116  ;;  %v6595_v4 = vpop.permute.xlu0 %1851 }
 0x7b7   : > { %v2140_v44 = vmul.f32 %v2122_v19, %v2117_v25  ;;  %v2141_v34 = vmul.f32 %v2126_v18, %v2117_v25  ;;  %v2142_v47 = vmul.f32 %v2130_v11, %v2117_v25  ;;  %v404_v19 = vmul.f32 %v5901_v36, %v5670_v42 }
 0x7b8   : > { %v405_v11 = vmul.f32 %v5904_v21, %v5673_v43 }
 0x7ba   : > { %2224 = vperm.xlu1 %5230, %v2206_v35   ;;  %2063 = vrot.lane.b32.xlu0 %v2033_v52, %s5503_s19  ;;  %v6597_v17 = vpop.permute.xlu1 %1853  ;;  %v6599_v35 = vpop.permute.xlu0 %1855 }
 0x7be   : > { %2065 = vrot.lane.b32.xlu1 %v2034_v3, %s5503_s19  ;;  %2067 = vrot.lane.b32.xlu0 %v2035_v23, %s5503_s19  ;;  %v6601_v27 = vpop.permute.xlu1 %1857 }
 0x7c2   : > { %2071 = vrot.lane.b32.xlu0 %v2037_v51, %s5503_s19  ;;  %2069 = vrot.lane.b32.xlu1 %v2036_v26, %s5503_s19  ;;  %v450_v26 = vmul.f32 %v5901_v36, %v5728_v12  ;;  %v429_v51 = vrot.slane %v404_v19, %v5574_v6 }
 0x7c4   : > { %v471_v42 = vrot.slane %v450_v26, %v5574_v6  ;;  %v436_v43 = vmul.f32 %v429_v51, %v5659_v33 }
 0x7c6   : > { %2167 = vrot.lane.b32.xlu0 %v2137_v46, %s5503_s19  ;;  %2073 = vrot.lane.b32.xlu1 %v2038_v5, %s5503_s19  ;;  %v433_v46 = vrot.slane %v405_v11, %v5574_v6  ;;  %v476_v1 = vmul.f32 %v471_v42, %v5667_v41  ;;  %v438_v11 = vmul.f32 %v429_v51, %v5661_v38 }
 0x7c8   : > { %v437_v25 = vmul.f32 %v433_v46, %v5659_v33  ;;  %v435_v26 = vmul.f32 %v433_v46, %v5663_v39  ;;  %v478_v33 = vmul.f32 %v471_v42, %v5717_v7  ;;  %v441_v36 = vmul.f32 %v433_v46, %v5665_v40 }
 0x7ca   : > { %2171 = vrot.lane.b32.xlu0 %v2139_v14, %s5503_s19  ;;  %2169 = vrot.lane.b32.xlu1 %v2138_v22, %s5503_s19  ;;  %v475_v22 = vrot.slane %v451_v20, %v5574_v6  ;;  %v434_v20 = vmul.f32 %v429_v51, %v5663_v39  ;;  %v439_v6 = vmul.f32 %v433_v46, %v5661_v38 }
 0x7cb   : > { %v579_v38 = vsel %vm577_vm10, %v5807_v54, %v5809_v28  ;;  %v581_v46 = vsel %vm577_vm10, %v5811_v55, %v5817_v30  ;;  %v584_v28 = vsel %vm577_vm10, %v5825_v59, %v5823_v58 }
 0x7cc   : > { %v477_v12 = vmul.f32 %v475_v22, %v5667_v41  ;;  %v483_v19 = vmul.f32 %v475_v22, %v5696_v53  ;;  %v440_v41 = vmul.f32 %v429_v51, %v5665_v40  ;;  %v486_v40 = vadd.f32 %v478_v33, %v436_v43  ;;  %v8718_v43 = vld [vmem:[#allocation10_spill] sm:$0xff]  ;;  %v8726_v33 = vld [vmem:[#allocation16_spill] sm:$0xff] }
 0x7ce   : > { %2175 = vrot.lane.b32.xlu0 %v2141_v34, %s5503_s19  ;;  %2173 = vrot.lane.b32.xlu1 %v2140_v44, %s5503_s19  ;;  %v480_v44 = vmul.f32 %v471_v42, %v5686_v48  ;;  %v481_v34 = vmul.f32 %v475_v22, %v5686_v48  ;;  %v479_v48 = vmul.f32 %v475_v22, %v5717_v7 }
 0x7cf   : > { %v491_v51 = vadd.f32 %v483_v19, %v441_v36  ;;  %v580_v7 = vsel %vm577_vm10, %v5813_v56, %v5811_v55  ;;  %v583_v36 = vsel %vm577_vm10, %v5821_v32, %v5819_v31  ;;  %v585_v55 = vsel %vm577_vm10, %v5823_v58, %v5829_v61  ;;  %v8720_v61 = vld [vmem:[#allocation9_spill] sm:$0xff] }
 0x7d0   : > { %v488_v45 = vadd.f32 %v480_v44, %v438_v11  ;;  %v489_v39 = vadd.f32 %v481_v34, %v439_v6  ;;  %v582_v6 = vsel %vm577_vm10, %v5815_v57, %v5821_v32  ;;  %v487_v22 = vadd.f32 %v479_v48, %v437_v25  ;;  %v8719_v25 = vld [vmem:[#allocation8_spill] sm:$0xff]  ;;  %v8724_v11 = vld [vmem:[#allocation15_spill] sm:$0xff]  ;;  %v8727_v48 = vld [vmem:[#allocation18_spill] sm:$0xff] }
 0x7d1   : > { %v678_v56 = vsel %vm577_vm10, %v5831_v63, %v5827_v60  ;;  %v596_v57 = vadd.f32 %v580_v7, %v486_v40  ;;  %v679_v31 = vsel %vm577_vm10, %v5827_v60, %v5835_v8  ;;  %v680_v58 = vsel %vm577_vm10, %v8719_v25, %v8718_v43  ;;  %v8723_v8 = vld [vmem:[#allocation13_spill] sm:$0xff]  ;;  %v8729_v40 = vld [vmem:[#allocation19_spill] sm:$0xff] }
 0x7d2   : > { %2177 = vrot.lane.b32.xlu1 %v2142_v47, %s5503_s19  ;;  %v482_v47 = vmul.f32 %v471_v42, %v5696_v53  ;;  %v484_v53 = vadd.f32 %v476_v1, %v434_v20  ;;  %v597_v30 = vadd.f32 %v581_v46, %v487_v22  ;;  %v599_v59 = vadd.f32 %v583_v36, %v489_v39  ;;  %v8721_v1 = vld [vmem:[#allocation12_spill] sm:$0xff]  ;;  %v8725_v20 = vld [vmem:[#allocation14_spill] sm:$0xff]  ;;  %v8730_v22 = vld [vmem:[#allocation21_spill] sm:$0xff] }
 0x7d3   : > { %v681_v63 = vsel %vm577_vm10, %v8718_v43, %v8720_v61  ;;  %v601_v34 = vadd.f32 %v585_v55, %v491_v51  ;;  %v803_v7 = vsel %vm801_vm11, %v8727_v48, %v8729_v40  ;;  %v8731_v36 = vld [vmem:[#allocation20_spill] sm:$0xff] }
 0x7d4   : > { %v490_v42 = vadd.f32 %v482_v47, %v440_v41  ;;  %v683_v47 = vsel %vm577_vm10, %v8721_v1, %v8723_v8  ;;  %v685_v41 = vsel %vm577_vm10, %v8724_v11, %v8726_v33  ;;  %v8736_v61 = vld [vmem:[#allocation32_spill] sm:$0xff]  ;;  %v8742_v33 = vld [vmem:[#allocation35_spill] sm:$0xff] }
 0x7d6   : > { %v600_v44 = vadd.f32 %v584_v28, %v490_v42  ;;  %v697_v42 = vadd.f32 %v681_v63, %v597_v30  ;;  %v8732_v28 = vld [vmem:[#allocation22_spill] sm:$0xff]  ;;  %v8737_v63 = vld [vmem:[#allocation31_spill] sm:$0xff] }
 0x7d7   : > { %v805_v55 = vsel %vm801_vm11, %v8730_v22, %v8732_v28  ;;  %v8747_v28 = vld [vmem:[#allocation50_spill] sm:$0xff] }
 0x7f0   : > { %v6603_v52 = vpop.permute.xlu0 %1859  ;;  %v6605_v3 = vpop.permute.xlu1 %1861 }
 0x7f1   : > { %8715 = vst [vmem:[#allocation144_spill] sm:$0xff] %v6603_v52  ;;  %8716 = vst [vmem:[#allocation145_spill] sm:$0xff] %v6605_v3  ;;  %v485_v52 = vadd.f32 %v477_v12, %v435_v26  ;;  %v8722_v12 = vld [vmem:[#allocation11_spill] sm:$0xff]  ;;  %v684_v26 = vsel %vm577_vm10, %v8725_v20, %v8724_v11 }
 0x7f4   : > { %v6609_v18 = vpop.permute.xlu0 %1863  ;;  %v6613_v23 = vpop.permute.xlu1 %1930 }
 0x7f5   : > { %8717 = vst [vmem:[#allocation146_spill] sm:$0xff] %v6609_v18  ;;  %v578_v18 = vsel %vm577_vm10, %v5805_v62, %v5807_v54  ;;  %v595_v54 = vadd.f32 %v579_v38, %v485_v52  ;;  %v696_v38 = vadd.f32 %v680_v58, %v596_v57  ;;  %v8734_v57 = vld [vmem:[#allocation23_spill] sm:$0xff]  ;;  %v8735_v58 = vld [vmem:[#allocation25_spill] sm:$0xff] }
 0x7f6   : > { %v594_v62 = vadd.f32 %v578_v18, %v484_v53  ;;  %v598_v18 = vadd.f32 %v582_v6, %v488_v45  ;;  %v682_v45 = vsel %vm577_vm10, %v8722_v12, %v8721_v1  ;;  %v8728_v53 = vld [vmem:[#allocation17_spill] sm:$0xff]  ;;  %v905_v1 = vsel %vm801_vm11, %v8737_v63, %v8736_v61 }
 0x7f7   : > { %v695_v19 = vadd.f32 %v679_v31, %v595_v54  ;;  %v802_v39 = vsel %vm801_vm11, %v8728_v53, %v8727_v48  ;;  %v804_v54 = vsel %vm801_vm11, %v8731_v36, %v8730_v22  ;;  %v701_v31 = vadd.f32 %v685_v41, %v601_v34  ;;  %v8738_v12 = vld [vmem:[#allocation33_spill] sm:$0xff]  ;;  %v8740_v34 = vld [vmem:[#allocation26_spill] sm:$0xff] }
 0x7f8   : > { %v6621_v5 = vpop.permute.xlu0 %1932  ;;  %v6626_v14 = vpop.permute.xlu1 %1934  ;;  %v694_v60 = vadd.f32 %v678_v56, %v594_v62  ;;  %v698_v51 = vadd.f32 %v682_v45, %v598_v18  ;;  %v699_v62 = vadd.f32 %v683_v47, %v599_v59  ;;  %v8733_v56 = vld [vmem:[#allocation24_spill] sm:$0xff]  ;;  %v700_v18 = vadd.f32 %v684_v26, %v600_v44  ;;  %v8739_v44 = vld [vmem:[#allocation27_spill] sm:$0xff]  ;;  %v8741_v26 = vld [vmem:[#allocation34_spill] sm:$0xff] }
 0x7f9   : > { %v806_v30 = vsel %vm801_vm11, %v8734_v57, %v8733_v56  ;;  %v819_v25 = vadd.f32 %v803_v7, %v695_v19  ;;  %v807_v59 = vsel %vm801_vm11, %v8733_v56, %v8735_v58  ;;  %v906_v45 = vsel %vm801_vm11, %v8736_v61, %v8738_v12  ;;  %v8743_v48 = vld [vmem:[#allocation37_spill] sm:$0xff]  ;;  %v8749_v57 = vld [vmem:[#allocation59_spill] sm:$0xff]  ;;  %v8751_v61 = vld [vmem:[#allocation60_spill] sm:$0xff] }
 0x7fa   : > { %v818_v43 = vadd.f32 %v802_v39, %v694_v60  ;;  %v820_v8 = vadd.f32 %v804_v54, %v696_v38  ;;  %v821_v47 = vadd.f32 %v805_v55, %v697_v42  ;;  %v6727_v11 = vadd.f32 %v806_v30, %v698_v51  ;;  %v8744_v39 = vld [vmem:[#allocation47_spill] sm:$0xff]  ;;  %v8745_v38 = vld [vmem:[#allocation46_spill] sm:$0xff]  ;;  %v8746_v51 = vld [vmem:[#allocation48_spill] sm:$0xff] }
 0x7fb   : > { %v808_v60 = vsel %vm801_vm11, %v8740_v34, %v8739_v44  ;;  %v907_v41 = vsel %vm801_vm11, %v8742_v33, %v8741_v26  ;;  %v908_v53 = vsel %vm801_vm11, %v8741_v26, %v8743_v48  ;;  %v1029_v42 = vsel %vm1028_vm12, %v8745_v38, %v8744_v39  ;;  %v8748_v55 = vld [vmem:[#allocation49_spill] sm:$0xff]  ;;  %v8750_v30 = vld [vmem:[#allocation58_spill] sm:$0xff]  ;;  %v8755_v33 = vld [vmem:[#allocation71_spill] sm:$0xff] }
 0x7fc   : > { %v6643_v21 = vpop.permute.xlu0 %1936  ;;  %v6651_v3 = vpop.permute.xlu1 %1938  ;;  %v1030_v40 = vsel %vm1028_vm12, %v8744_v39, %v8746_v51  ;;  %v6748_v7 = vadd.f32 %v807_v59, %v699_v62  ;;  %v921_v22 = vadd.f32 %v905_v1, %v818_v43  ;;  %v922_v36 = vadd.f32 %v906_v45, %v819_v25  ;;  %v8752_v1 = vld [vmem:[#allocation51_spill] sm:$0xff]  ;;  %v8753_v34 = vld [vmem:[#allocation62_spill] sm:$0xff] }
 0x7fd   : > { %v6750_v54 = vadd.f32 %v808_v60, %v700_v18  ;;  %v1031_v56 = vsel %vm1028_vm12, %v8748_v55, %v8747_v28  ;;  %v1132_v58 = vsel %vm1028_vm12, %v8750_v30, %v8749_v57  ;;  %v1133_v63 = vsel %vm1028_vm12, %v8749_v57, %v8751_v61  ;;  %v8754_v60 = vld [vmem:[#allocation61_spill] sm:$0xff]  ;;  %v8756_v48 = vld [vmem:[#allocation70_spill] sm:$0xff]  ;;  %v8762_v57 = vld [vmem:[#allocation84_spill] sm:$0xff] }
 0x7fe   : > { %v923_v12 = vadd.f32 %v907_v41, %v820_v8  ;;  %v924_v62 = vadd.f32 %v908_v53, %v821_v47  ;;  %v1045_v59 = vadd.f32 %v1029_v42, %v921_v22  ;;  %v1046_v43 = vadd.f32 %v1030_v40, %v922_v36  ;;  %v8757_v8 = vld [vmem:[#allocation72_spill] sm:$0xff]  ;;  %v8759_v40 = vld [vmem:[#allocation63_spill] sm:$0xff] }
 0x7ff   : > { %v1032_v45 = vsel %vm1028_vm12, %v8747_v28, %v8752_v1  ;;  %v1134_v26 = vsel %vm1028_vm12, %v8754_v60, %v8753_v34  ;;  %v1230_v39 = vsel %vm1229_vm13, %v8756_v48, %v8755_v33  ;;  %v1231_v47 = vsel %vm1229_vm13, %v8755_v33, %v8757_v8  ;;  %v8758_v42 = vld [vmem:[#allocation28_spill] sm:$0xff]  ;;  %v8760_v36 = vld [vmem:[#allocation83_spill] sm:$0xff]  ;;  %v8761_v28 = vld [vmem:[#allocation82_spill] sm:$0xff] }
 0x800   : > { %v6677_v32 = vpop.permute.xlu0 %1940  ;;  %v1047_v41 = vadd.f32 %v1031_v56, %v923_v12  ;;  %v1148_v53 = vadd.f32 %v1132_v58, %v1045_v59  ;;  %v1149_v38 = vadd.f32 %v1133_v63, %v1046_v43  ;;  %v809_v51 = vsel %vm801_vm11, %v8739_v44, %v8758_v42  ;;  %v8763_v44 = vld [vmem:[#allocation74_spill] sm:$0xff]  ;;  %v8764_v43 = vld [vmem:[#allocation73_spill] sm:$0xff] }
 0x801   : > { %v1135_v22 = vsel %vm1028_vm12, %v8753_v34, %v8759_v40  ;;  %v1318_v55 = vsel %vm1229_vm13, %v8761_v28, %v8760_v36  ;;  %v1319_v30 = vsel %vm1229_vm13, %v8760_v36, %v8762_v57  ;;  %v1048_v56 = vadd.f32 %v1032_v45, %v924_v62  ;;  %v8765_v34 = vld [vmem:[#allocation75_spill] sm:$0xff]  ;;  %v8766_v33 = vld [vmem:[#allocation97_spill] sm:$0xff]  ;;  %v8767_v62 = vld [vmem:[#allocation98_spill] sm:$0xff] }
 0x802   : > { %v1150_v58 = vadd.f32 %v1134_v26, %v1047_v41  ;;  %v1246_v61 = vadd.f32 %v1230_v39, %v1148_v53  ;;  %v1247_v63 = vadd.f32 %v1231_v47, %v1149_v38  ;;  %v1232_v1 = vsel %vm1229_vm13, %v8764_v43, %v8763_v44  ;;  %v8768_v41 = vld [vmem:[#allocation85_spill] sm:$0xff]  ;;  %v8769_v53 = vld [vmem:[#allocation86_spill] sm:$0xff]  ;;  %v8771_v40 = vld [vmem:[#allocation108_spill] sm:$0xff] }
 0x803   : > { %v1233_v60 = vsel %vm1229_vm13, %v8763_v44, %v8765_v34  ;;  %v1440_v48 = vsel %vm1439_vm14, %v8766_v33, %v6223_v15  ;;  %v1441_v45 = vsel %vm1439_vm14, %v6223_v15, %v8767_v62  ;;  %v1151_v26 = vadd.f32 %v1135_v22, %v1048_v56  ;;  %v8770_v42 = vld [vmem:[#allocation109_spill] sm:$0xff]  ;;  %v8772_v28 = vld [vmem:[#allocation110_spill] sm:$0xff]  ;;  %v8777_v62 = vld [vmem:[#allocation36_spill] sm:$0xff] }
 0x804   : > { %v1334_v39 = vadd.f32 %v1318_v55, %v1246_v61  ;;  %v1335_v8 = vadd.f32 %v1319_v30, %v1247_v63  ;;  %v6805_v47 = vadd.f32 %v809_v51, %v701_v31  ;;  %v1320_v38 = vsel %vm1229_vm13, %v8769_v53, %v8768_v41  ;;  %v8773_v51 = vld [vmem:[#allocation88_spill] sm:$0xff]  ;;  %v8775_v63 = vld [vmem:[#allocation99_spill] sm:$0xff] }
 0x805   : > { %v1543_v36 = vsel %vm1439_vm14, %v8771_v40, %v8770_v42  ;;  %v1544_v57 = vsel %vm1439_vm14, %v8770_v42, %v8772_v28  ;;  %v1248_v44 = vadd.f32 %v1232_v1, %v1150_v58  ;;  %v1249_v15 = vadd.f32 %v1233_v60, %v1151_v26  ;;  %v8774_v61 = vld [vmem:[#allocation100_spill] sm:$0xff]  ;;  %v8778_v26 = vld [vmem:[#allocation111_spill] sm:$0xff] }
 0x806   : > { %v1456_v22 = vadd.f32 %v1440_v48, %v1334_v39  ;;  %v1457_v55 = vadd.f32 %v1441_v45, %v1335_v8  ;;  %v1321_v56 = vsel %vm1229_vm13, %v8768_v41, %v8773_v51  ;;  %v1442_v43 = vsel %vm1439_vm14, %v8775_v63, %v8774_v61  ;;  %v8776_v48 = vld [vmem:[#allocation40_spill] sm:$0xff]  ;;  %v8782_v51 = vld [vmem:[#allocation131_spill] sm:$0xff] }
 0x807   : > { %v1665_v34 = vsel %vm1664_vm15, %v6345_v24, %v6347_v13  ;;  %v1666_v58 = vsel %vm1664_vm15, %v6347_v13, %v6349_v2  ;;  %v1336_v1 = vadd.f32 %v1320_v38, %v1248_v44  ;;  %v909_v45 = vsel %vm801_vm11, %v8777_v62, %v8776_v48  ;;  %v8779_v39 = vld [vmem:[#allocation112_spill] sm:$0xff]  ;;  %v8786_v62 = vld [vmem:[#allocation139_spill] sm:$0xff] }
 0x808   : > { %v1559_v60 = vadd.f32 %v1543_v36, %v1456_v22  ;;  %v1560_v33 = vadd.f32 %v1544_v57, %v1457_v55  ;;  %v1545_v8 = vsel %vm1439_vm14, %v8779_v39, %v8778_v26  ;;  %v1768_v24 = vsel %vm1664_vm15, %v6401_v50, %v6403_v29  ;;  %v8780_v36 = vld [vmem:[#allocation101_spill] sm:$0xff]  ;;  %v8781_v22 = vld [vmem:[#allocation114_spill] sm:$0xff] }
 0x809   : > { %v1769_v13 = vsel %vm1664_vm15, %v6403_v29, %v6405_v10  ;;  %v1337_v2 = vadd.f32 %v1321_v56, %v1249_v15  ;;  %v1458_v41 = vadd.f32 %v1442_v43, %v1336_v1  ;;  %v1443_v28 = vsel %vm1439_vm14, %v8774_v61, %v8780_v36  ;;  %v8783_v56 = vld [vmem:[#allocation130_spill] sm:$0xff]  ;;  %v8784_v1 = vld [vmem:[#allocation123_spill] sm:$0xff] }
 0x80a   : > { %v1681_v53 = vadd.f32 %v1665_v34, %v1559_v60  ;;  %v1682_v38 = vadd.f32 %v1666_v58, %v1560_v33  ;;  %v1667_v50 = vsel %vm1664_vm15, %v6351_v9, %v6353_v0  ;;  %v1866_v29 = vsel %vm1865_vm0, %v6471_v49, %v6465_v37  ;;  %v8785_v33 = vld [vmem:[#allocation140_spill] sm:$0xff] }
 0x80b   : > { %v1867_v10 = vsel %vm1865_vm0, %v6465_v37, %v6475_v16  ;;  %v1561_v57 = vadd.f32 %v1545_v8, %v1458_v41  ;;  %v1546_v55 = vsel %vm1439_vm14, %v8778_v26, %v8781_v22  ;;  %v1770_v9 = vsel %vm1664_vm15, %v8783_v56, %v8782_v51  ;;  %v8788_v41 = vld [vmem:[#allocation132_spill] sm:$0xff]  ;;  %v8789_v22 = vld [vmem:[#allocation39_spill] sm:$0xff]  ;;  %v8791_v56 = vld [vmem:[#allocation53_spill] sm:$0xff] }
 0x80c   : > { %v1784_v44 = vadd.f32 %v1768_v24, %v1681_v53  ;;  %v1785_v15 = vadd.f32 %v1769_v13, %v1682_v38  ;;  %v1954_v49 = vsel %vm1865_vm0, %v6613_v23, %v6621_v5  ;;  %v1955_v37 = vsel %vm1865_vm0, %v6621_v5, %v6626_v14 }
 0x80d   : > { %v6679_v52 = vpop.permute.xlu1 %2209  ;;  %v1459_v16 = vadd.f32 %v1443_v28, %v1337_v2  ;;  %v1683_v61 = vadd.f32 %v1667_v50, %v1561_v57  ;;  %v1668_v60 = vsel %vm1664_vm15, %v6353_v0, %v8784_v1  ;;  %v1868_v26 = vsel %vm1865_vm0, %v8786_v62, %v8785_v33  ;;  %v8787_v2 = vld [vmem:[#allocation38_spill] sm:$0xff] }
 0x80e   : > { %v1882_v63 = vadd.f32 %v1866_v29, %v1784_v44  ;;  %v1883_v43 = vadd.f32 %v1867_v10, %v1785_v15  ;;  %v925_v13 = vadd.f32 %v909_v45, %v6727_v11  ;;  %v910_v0 = vsel %vm801_vm11, %v8776_v48, %v8787_v2  ;;  %v8794_v1 = vld [vmem:[#allocation54_spill] sm:$0xff] }
 0x80f   : > { %v1562_v14 = vadd.f32 %v1546_v55, %v1459_v16  ;;  %v1786_v39 = vadd.f32 %v1770_v9, %v1683_v61  ;;  %v1771_v53 = vsel %vm1664_vm15, %v8782_v51, %v8788_v41  ;;  %v1869_v11 = vsel %vm1865_vm0, %v8785_v33, %v6595_v4  ;;  %v8790_v55 = vld [vmem:[#allocation43_spill] sm:$0xff]  ;;  %v8792_v4 = vld [vmem:[#allocation52_spill] sm:$0xff] }
 0x810   : > { %v1970_v8 = vadd.f32 %v1954_v49, %v1882_v63  ;;  %v1971_v24 = vadd.f32 %v1955_v37, %v1883_v43  ;;  %v926_v15 = vadd.f32 %v910_v0, %v6748_v7  ;;  %v911_v51 = vsel %vm801_vm11, %v8790_v55, %v8789_v22  ;;  %v8793_v43 = vld [vmem:[#allocation45_spill] sm:$0xff] }
 0x811   : > { %v6705_v46 = vpop.permute.xlu0 %2214  ;;  %v6707_v6 = vpop.permute.xlu1 %2051  ;;  %v1684_v38 = vadd.f32 %v1668_v60, %v1562_v14  ;;  %v1033_v9 = vsel %vm1028_vm12, %v8792_v4, %v8791_v56  ;;  %v1034_v60 = vsel %vm1028_vm12, %v8791_v56, %v8794_v1  ;;  %v8795_v14 = vld [vmem:[#allocation65_spill] sm:$0xff]  ;;  %v8812_v1 = vld [vmem:[#allocation102_spill] sm:$0xff] }
 0x812   : > { %v1050_v0 = vadd.f32 %v1034_v60, %v926_v15  ;;  %v8805_v15 = vld [vmem:[#allocation91_spill] sm:$0xff] }
 0x813   : > { %v1787_v10 = vadd.f32 %v1771_v53, %v1684_v38  ;;  %v8799_v53 = vld [vmem:[#allocation55_spill] sm:$0xff]  ;;  %v8800_v38 = vld [vmem:[#allocation77_spill] sm:$0xff] }
 0x815   : > { %v6732_v19 = vpop.permute.xlu0 %2055  ;;  %v6734_v20 = vpop.permute.xlu1 %2053  ;;  %v1885_v49 = vadd.f32 %v1869_v11, %v1787_v10 }
 0x816   : > { %v2076_v23 = vsel %vm2075_vm1, %v6707_v6, %v6734_v20  ;;  %v2077_v5 = vsel %vm2075_vm1, %v6734_v20, %v6732_v19  ;;  %v1956_v6 = vsel %vm1865_vm0, %v6643_v21, %v6651_v3  ;;  %v1884_v19 = vadd.f32 %v1868_v26, %v1786_v39  ;;  %v8796_v39 = vld [vmem:[#allocation64_spill] sm:$0xff] }
 0x817   : > { %v2092_v20 = vadd.f32 %v2076_v23, %v1970_v8  ;;  %v2093_v36 = vadd.f32 %v2077_v5, %v1971_v24  ;;  %v927_v23 = vadd.f32 %v911_v51, %v6750_v54  ;;  %v1049_v5 = vadd.f32 %v1033_v9, %v925_v13  ;;  %v8797_v24 = vld [vmem:[#allocation66_spill] sm:$0xff]  ;;  %v8798_v13 = vld [vmem:[#allocation56_spill] sm:$0xff]  ;;  %v8807_v51 = vld [vmem:[#allocation89_spill] sm:$0xff] }
 0x818   : > { %v1972_v21 = vadd.f32 %v1956_v6, %v1884_v19  ;;  %v1136_v8 = vsel %vm1028_vm12, %v8796_v39, %v8795_v14  ;;  %v1137_v2 = vsel %vm1028_vm12, %v8795_v14, %v8797_v24  ;;  %v1035_v6 = vsel %vm1028_vm12, %v8799_v53, %v8798_v13  ;;  %v8801_v19 = vld [vmem:[#allocation76_spill] sm:$0xff]  ;;  %v8816_v14 = vld [vmem:[#allocation94_spill] sm:$0xff]  ;;  %v8818_v24 = vld [vmem:[#allocation113_spill] sm:$0xff] }
 0x819   : > { %v6761_v25 = vpop.permute.xlu0 %2059  ;;  %v6763_v18 = vpop.permute.xlu1 %2057  ;;  %v1152_v11 = vadd.f32 %v1136_v8, %v1049_v5  ;;  %v1323_v56 = vsel %vm1229_vm13, %v8805_v15, %v8807_v51  ;;  %v1051_v4 = vadd.f32 %v1035_v6, %v927_v23  ;;  %v8815_v5 = vld [vmem:[#allocation90_spill] sm:$0xff]  ;;  %v8817_v8 = vld [vmem:[#allocation117_spill] sm:$0xff]  ;;  %v8827_v51 = vld [vmem:[#allocation116_spill] sm:$0xff] }
 0x81a   : > { %v2078_v48 = vsel %vm2075_vm1, %v6763_v18, %v6761_v25  ;;  %v1957_v18 = vsel %vm1865_vm0, %v6651_v3, %v6677_v32  ;;  %v1324_v39 = vsel %vm1229_vm13, %v8816_v14, %v8815_v5 }
 0x81b   : > { %v2094_v37 = vadd.f32 %v2078_v48, %v1972_v21  ;;  %v1973_v33 = vadd.f32 %v1957_v18, %v1885_v49  ;;  %v1153_v48 = vadd.f32 %v1137_v2, %v1050_v0  ;;  %v8803_v21 = vld [vmem:[#allocation68_spill] sm:$0xff]  ;;  %v1547_v2 = vsel %vm1439_vm14, %v8818_v24, %v8817_v8  ;;  %v8819_v0 = vld [vmem:[#allocation115_spill] sm:$0xff] }
 0x81d   : > { %v6789_v12 = vpop.permute.xlu0 %1942  ;;  %v6791_v59 = vpop.permute.xlu1 %2061 }
 0x81e   : > { %v2079_v3 = vsel %vm2075_vm1, %v6761_v25, %v6791_v59 }
 0x81f   : > { %v2095_v41 = vadd.f32 %v2079_v3, %v1973_v33  ;;  %v8813_v3 = vld [vmem:[#allocation104_spill] sm:$0xff] }
 0x821   : > { %v6816_v30 = vpop.permute.xlu0 %1946  ;;  %v6818_v31 = vpop.permute.xlu1 %1944 }
 0x825   : > { %v6844_v42 = vpop.permute.xlu0 %1950  ;;  %v6846_v40 = vpop.permute.xlu1 %1948 }
 0x829   : > { %v2156_v34 = vpop.permute.xlu0 %2155  ;;  %v6872_v58 = vpop.permute.xlu1 %1952 }
 0x82d   : > { %v2160_v28 = vpop.permute.xlu0 %2159  ;;  %v2158_v50 = vpop.permute.xlu1 %2157 }
 0x82e   : > { %v2179_v45 = vsel %vm2075_vm1, %v2156_v34, %v2158_v50  ;;  %v2180_v29 = vsel %vm2075_vm1, %v2158_v50, %v2160_v28  ;;  %v912_v34 = vsel %vm801_vm11, %v8789_v22, %v8793_v43  ;;  %v8806_v22 = vld [vmem:[#allocation87_spill] sm:$0xff] }
 0x82f   : > { %v2195_v57 = vadd.f32 %v2179_v45, %v2092_v20  ;;  %v2196_v44 = vadd.f32 %v2180_v29, %v2093_v36  ;;  %v1234_v20 = vsel %vm1229_vm13, %v8801_v19, %v8800_v38  ;;  %v8802_v36 = vld [vmem:[#allocation78_spill] sm:$0xff]  ;;  %v928_v10 = vadd.f32 %v912_v34, %v6805_v47  ;;  %v8811_v34 = vld [vmem:[#allocation103_spill] sm:$0xff]  ;;  %v8820_v19 = vld [vmem:[#allocation81_spill] sm:$0xff] }
 0x830   : > { %v1235_v28 = vsel %vm1229_vm13, %v8800_v38, %v8802_v36  ;;  %v1322_v55 = vsel %vm1229_vm13, %v8806_v22, %v8805_v15  ;;  %v1250_v9 = vadd.f32 %v1234_v20, %v1152_v11  ;;  %v1444_v60 = vsel %vm1439_vm14, %v8812_v1, %v8811_v34  ;;  %v8821_v36 = vld [vmem:[#allocation106_spill] sm:$0xff]  ;;  %v8823_v11 = vld [vmem:[#allocation125_spill] sm:$0xff]  ;;  %v8826_v22 = vld [vmem:[#allocation96_spill] sm:$0xff] }
 0x831   : > { %v2227_v16 = vadd.f32 %v6679_v52, %v2195_v57  ;;  %v2228_v61 = vadd.f32 %v6679_v52, %v2196_v44  ;;  %v2164_v63 = vpop.permute.xlu0 %2163  ;;  %v2162_v7 = vpop.permute.xlu1 %2161  ;;  %v8804_v57 = vld [vmem:[#allocation67_spill] sm:$0xff]  ;;  %v1251_v18 = vadd.f32 %v1235_v28, %v1153_v48  ;;  %v8822_v28 = vld [vmem:[#allocation105_spill] sm:$0xff]  ;;  %v8824_v48 = vld [vmem:[#allocation124_spill] sm:$0xff] }
 0x832   : > { %v2181_v32 = vsel %vm2075_vm1, %v2162_v7, %v2164_v63  ;;  %v1138_v44 = vsel %vm1028_vm12, %v8804_v57, %v8803_v21  ;;  %v8810_v7 = vld [vmem:[#allocation79_spill] sm:$0xff]  ;;  %v1338_v33 = vadd.f32 %v1322_v55, %v1250_v9  ;;  %v1325_v55 = vsel %vm1229_vm13, %v8815_v5, %v8826_v22  ;;  %v8829_v9 = vld [vmem:[#allocation134_spill] sm:$0xff] }
 0x833   : > { %v2235_v62 = vmax.f32 %v2227_v16, 0.0  ;;  %v2236_v26 = vmax.f32 %v2228_v61, 0.0  ;;  %v2197_v52 = vadd.f32 %v2181_v32, %v2094_v37  ;;  %v8808_v16 = vld [vmem:[#allocation57_spill] sm:$0xff]  ;;  %v1154_v32 = vadd.f32 %v1138_v44, %v1051_v4 }
 0x834   : > { %v1036_v61 = vsel %vm1028_vm12, %v8798_v13, %v8808_v16  ;;  %v1460_v13 = vadd.f32 %v1444_v60, %v1338_v33  ;;  %v8831_v16 = vld [vmem:[#allocation135_spill] sm:$0xff] }
 0x835   : > { %v2229_v25 = vadd.f32 %v6705_v46, %v2197_v52  ;;  %v6934_v59 = vpop.permute.xlu0 %2219  ;;  %2253 = vrot.lane.b32.xlu1 %v2236_v26, %s5489_s17  ;;  %2251 = vrot.lane.b32.xlu0 %v2235_v62, %s5489_s17  ;;  %v2166_v54 = vpop.permute.xlu1 %2165  ;;  %v1339_v62 = vadd.f32 %v1323_v56, %v1251_v18  ;;  %v8814_v52 = vld [vmem:[#allocation69_spill] sm:$0xff]  ;;  %v8828_v56 = vld [vmem:[#allocation120_spill] sm:$0xff]  ;;  %v8834_v33 = vld [vmem:[#allocation127_spill] sm:$0xff] }
 0x836   : > { %v2182_v50 = vsel %vm2075_vm1, %v2164_v63, %v2166_v54  ;;  %v8809_v63 = vld [vmem:[#allocation80_spill] sm:$0xff]  ;;  %v1139_v23 = vsel %vm1028_vm12, %v8803_v21, %v8814_v52  ;;  %v1563_v44 = vadd.f32 %v1547_v2, %v1460_v13  ;;  %v1549_v4 = vsel %vm1439_vm14, %v8828_v56, %v8827_v51  ;;  %v8830_v18 = vld [vmem:[#allocation133_spill] sm:$0xff]  ;;  %v8842_v56 = vld [vmem:[#allocation146_spill] sm:$0xff] }
 0x837   : > { %v2237_v45 = vmax.f32 %v2229_v25, 0.0  ;;  %v2198_v29 = vadd.f32 %v2182_v50, %v2095_v41  ;;  %v1236_v43 = vsel %vm1229_vm13, %v8810_v7, %v8809_v63  ;;  %v1548_v41 = vsel %vm1439_vm14, %v8817_v8, %v8819_v0  ;;  %v8835_v8 = vld [vmem:[#allocation122_spill] sm:$0xff]  ;;  %v8836_v2 = vld [vmem:[#allocation137_spill] sm:$0xff]  ;;  %v8837_v0 = vld [vmem:[#allocation136_spill] sm:$0xff] }
 0x838   : > { %v1052_v25 = vadd.f32 %v1036_v61, %v928_v10  ;;  %v1252_v54 = vadd.f32 %v1236_v43, %v1154_v32  ;;  %v1237_v20 = vsel %vm1229_vm13, %v8809_v63, %v8820_v19  ;;  %v1446_v50 = vsel %vm1439_vm14, %v8822_v28, %v8821_v36  ;;  %v8833_v32 = vld [vmem:[#allocation128_spill] sm:$0xff]  ;;  %v8839_v28 = vld [vmem:[#allocation145_spill] sm:$0xff] }
 0x839   : > { %v2230_v49 = vadd.f32 %v6705_v46, %v2198_v29  ;;  %v2064_v37 = vpop.permute.xlu0 %2063  ;;  %2255 = vrot.lane.b32.xlu0 %v2237_v45, %s5489_s17  ;;  %v6960_v47 = vpop.permute.xlu1 %2224  ;;  %v1445_v46 = vsel %vm1439_vm14, %v8811_v34, %v8813_v3  ;;  %v1669_v45 = vsel %vm1664_vm15, %v8824_v48, %v8823_v11  ;;  %v8825_v29 = vld [vmem:[#allocation126_spill] sm:$0xff]  ;;  %v1773_v61 = vsel %vm1664_vm15, %v8829_v9, %v8831_v16  ;;  %v8832_v3 = vld [vmem:[#allocation107_spill] sm:$0xff] }
 0x83a   : > { %v1461_v53 = vadd.f32 %v1445_v46, %v1339_v62  ;;  %v1670_v10 = vsel %vm1664_vm15, %v8823_v11, %v8825_v29  ;;  %v1155_v21 = vadd.f32 %v1139_v23, %v1052_v25  ;;  %v1340_v57 = vadd.f32 %v1324_v39, %v1252_v54 }
 0x83b   : > { %v2238_v26 = vmax.f32 %v2230_v49, 0.0  ;;  %v1772_v49 = vsel %vm1664_vm15, %v8830_v18, %v8829_v9  ;;  %v1685_v43 = vadd.f32 %v1669_v45, %v1563_v44  ;;  %v1447_v46 = vsel %vm1439_vm14, %v8821_v36, %v8832_v3 }
 0x83c   : > { %v1564_v15 = vadd.f32 %v1548_v41, %v1461_v53  ;;  %v1253_v63 = vadd.f32 %v1237_v20, %v1155_v21  ;;  %v1462_v7 = vadd.f32 %v1446_v50, %v1340_v57  ;;  %v1671_v62 = vsel %vm1664_vm15, %v8834_v33, %v8833_v32  ;;  %v8838_v20 = vld [vmem:[#allocation129_spill] sm:$0xff]  ;;  %v8840_v50 = vld [vmem:[#allocation144_spill] sm:$0xff] }
 0x83d   : > { %v2068_v6 = vpop.permute.xlu0 %2067  ;;  %2257 = vrot.lane.b32.xlu1 %v2238_v26, %s5489_s17  ;;  %v2066_v38 = vpop.permute.xlu1 %2065  ;;  %v1870_v26 = vsel %vm1865_vm0, %v6597_v17, %v6599_v35  ;;  %v1871_v52 = vsel %vm1865_vm0, %v6599_v35, %v6601_v27  ;;  %v1788_v14 = vadd.f32 %v1772_v49, %v1685_v43  ;;  %v1550_v24 = vsel %vm1439_vm14, %v8827_v51, %v8835_v8 }
 0x83e   : > { %v1686_v34 = vadd.f32 %v1670_v10, %v1564_v15  ;;  %v1341_v23 = vadd.f32 %v1325_v55, %v1253_v63  ;;  %v1565_v5 = vadd.f32 %v1549_v4, %v1462_v7  ;;  %v1774_v41 = vsel %vm1664_vm15, %v8837_v0, %v8836_v2  ;;  %v8841_v10 = vld [vmem:[#allocation138_spill] sm:$0xff] }
 0x83f   : > { %v1958_v17 = vsel %vm1865_vm0, %v6789_v12, %v6818_v31  ;;  %v1959_v35 = vsel %vm1865_vm0, %v6818_v31, %v6816_v30  ;;  %v1886_v54 = vadd.f32 %v1870_v26, %v1788_v14  ;;  %v1672_v36 = vsel %vm1664_vm15, %v8833_v32, %v8838_v20 }
 0x840   : > { %v1789_v39 = vadd.f32 %v1773_v61, %v1686_v34  ;;  %v1463_v27 = vadd.f32 %v1447_v46, %v1341_v23  ;;  %v1687_v25 = vadd.f32 %v1671_v62, %v1565_v5  ;;  %v1872_v11 = vsel %vm1865_vm0, %v8840_v50, %v8839_v28 }
 0x841   : > { %v2072_v1 = vpop.permute.xlu0 %2071  ;;  %v2070_v60 = vpop.permute.xlu1 %2069  ;;  %v2080_v12 = vsel %vm2075_vm1, %v2064_v37, %v2066_v38  ;;  %v2081_v48 = vsel %vm2075_vm1, %v2066_v38, %v2068_v6  ;;  %v1974_v31 = vadd.f32 %v1958_v17, %v1886_v54  ;;  %v1775_v21 = vsel %vm1664_vm15, %v8836_v2, %v8841_v10 }
 0x842   : > { %v1887_v13 = vadd.f32 %v1871_v52, %v1789_v39  ;;  %v1566_v45 = vadd.f32 %v1550_v24, %v1463_v27  ;;  %v1790_v30 = vadd.f32 %v1774_v41, %v1687_v25  ;;  %v1960_v57 = vsel %vm1865_vm0, %v6846_v40, %v6844_v42  ;;  %v8844_v25 = vld [vmem:[#allocation5_spill] sm:$0xff] }
 0x843   : > { %v2096_v22 = vadd.f32 %v2080_v12, %v1974_v31  ;;  %v1873_v6 = vsel %vm1865_vm0, %v8839_v28, %v8842_v56  ;;  %v2082_v38 = vsel %vm2075_vm1, %v2070_v60, %v2072_v1  ;;  %v1961_v61 = vsel %vm1865_vm0, %v6844_v42, %v6872_v58  ;;  %v8846_v28 = vld [vmem:[#allocation6_spill] sm:$0xff] }
 0x844   : > { %v1975_v29 = vadd.f32 %v1959_v35, %v1887_v13  ;;  %v1688_v44 = vadd.f32 %v1672_v36, %v1566_v45  ;;  %v1888_v15 = vadd.f32 %v1872_v11, %v1790_v30  ;;  %v8843_v35 = vld [vmem:[#allocation7_spill] sm:$0xff]  ;;  %v8847_v45 = vld [vmem:[#allocation41_spill] sm:$0xff] }
 0x845   : > { %v2168_v53 = vpop.permute.xlu0 %2167  ;;  %v2074_v19 = vpop.permute.xlu1 %2073 }
 0x846   : > { %v2097_v55 = vadd.f32 %v2081_v48, %v1975_v29  ;;  %v1791_v18 = vadd.f32 %v1775_v21, %v1688_v44  ;;  %v1976_v49 = vadd.f32 %v1960_v57, %v1888_v15  ;;  %v2083_v46 = vsel %vm2075_vm1, %v2072_v1, %v2074_v19  ;;  %v8845_v19 = vld [vmem:[#allocation44_spill] sm:$0xff]  ;;  %v8848_v29 = vld [vmem:[#allocation42_spill] sm:$0xff] }
 0x848   : > { %v1889_v63 = vadd.f32 %v1873_v6, %v1791_v18  ;;  %v2098_v7 = vadd.f32 %v2082_v38, %v1976_v49 }
 0x849   : > { %v2172_v51 = vpop.permute.xlu0 %2171  ;;  %v2170_v37 = vpop.permute.xlu1 %2169 }
 0x84a   : > { %v2183_v4 = vsel %vm2075_vm1, %v2168_v53, %v2170_v37  ;;  %v2184_v9 = vsel %vm2075_vm1, %v2170_v37, %v2172_v51  ;;  %v1977_v33 = vadd.f32 %v1961_v61, %v1889_v63 }
 0x84b   : > { %v2199_v16 = vadd.f32 %v2183_v4, %v2096_v22  ;;  %v2200_v40 = vadd.f32 %v2184_v9, %v2097_v55  ;;  %v8849_v9 = vld [vmem:[#allocation143_spill] sm:$0xff] }
 0x84c   : > { %v2099_v23 = vadd.f32 %v2083_v46, %v1977_v33 }
 0x84d   : > { %v2231_v43 = vadd.f32 %v6934_v59, %v2199_v16  ;;  %v2232_v34 = vadd.f32 %v6934_v59, %v2200_v40  ;;  %v2176_v3 = vpop.permute.xlu0 %2175  ;;  %v2174_v60 = vpop.permute.xlu1 %2173  ;;  %v8850_v16 = vld [vmem:[#allocation142_spill] sm:$0xff] }
 0x84e   : > { %v2185_v32 = vsel %vm2075_vm1, %v2174_v60, %v2176_v3 }
 0x84f   : > { %v2239_v62 = vmax.f32 %v2231_v43, 0.0  ;;  %v2240_v26 = vmax.f32 %v2232_v34, 0.0  ;;  %v2201_v52 = vadd.f32 %v2185_v32, %v2098_v7  ;;  %v8851_v7 = vld [vmem:[#allocation141_spill] sm:$0xff] }
 0x851   : > { %v2233_v5 = vadd.f32 %v6960_v47, %v2201_v52  ;;  %2261 = vrot.lane.b32.xlu1 %v2240_v26, %s5489_s17  ;;  %2259 = vrot.lane.b32.xlu0 %v2239_v62, %s5489_s17  ;;  %v2178_v42 = vpop.permute.xlu1 %2177  ;;  %v8855_v62 = vld [vmem:[#allocation29_spill] sm:$0xff] }
 0x852   : > { %v2186_v58 = vsel %vm2075_vm1, %v2176_v3, %v2178_v42  ;;  %v8852_v3 = vld [vmem:[#allocation30_spill] sm:$0xff] }
 0x853   : > { %v2241_v59 = vmax.f32 %v2233_v5, 0.0  ;;  %v2202_v14 = vadd.f32 %v2186_v58, %v2099_v23 }
 0x855   : > { %v2234_v1 = vadd.f32 %v6960_v47, %v2202_v14  ;;  %2263 = vrot.lane.b32.xlu0 %v2241_v59, %s5489_s17 }
 0x857   : > { %v2242_v39 = vmax.f32 %v2234_v1, 0.0 }
 0x859   : > { %2265 = vrot.lane.b32.xlu1 %v2242_v39, %s5489_s17 }
 0x8a7   : > { %v2252_v8 = vpop.permute.xlu0 %2251  ;;  %v2254_v24 = vpop.permute.xlu1 %2253 }
 0x8a8   : > { %v7070_v2 = vsel %vm373_vm2, 0.0, %v2252_v8  ;;  %v7073_v0 = vsel %vm373_vm2, %v2252_v8, %v2254_v24  ;;  %v7076_v41 = vsel %vm373_vm2, %v2254_v24, 0.0 }
 0x8a9   : > { %v5231_v17 = vpack.i.bf16 %v7073_v0, %v7070_v2  ;;  %v7083_v27 = vmul.f32 %v7073_v0, %v8843_v35  ;;  %v7087_v54 = vmul.f32 %v8844_v25, %v7076_v41  ;;  %v7094_v53 = vpack.i.bf16 %v7076_v41, %v7073_v0 }
 0x8aa   : > { %v7098_v20 = vmul.f32 %v7073_v0, %v8845_v19  ;;  %v7104_v50 = vmul.f32 %v8846_v28, %v7070_v2  ;;  %v7118_v30 = vmul.f32 %v8847_v45, %v7076_v41  ;;  %v7149_v37 = vmul.f32 %v8848_v29, %v7070_v2 }
 0x8ab   : > { %v2256_v47 = vpop.permute.xlu0 %2255  ;;  %5232 = vrot.lane.b32.xlu0 %v5231_v17, %s5492_s21  ;;  %v7167_v18 = vmul.f32 %v7073_v0, %v8849_v9  ;;  %v7173_v40 = vmul.f32 %v8850_v16, %v7076_v41  ;;  %v7185_v43 = vmul.f32 %v8851_v7, %v7070_v2  ;;  %v7193_v60 = vmul.f32 %v8852_v3, %v7073_v0 }
 0x8ac   : > { %v7090_v13 = vsel %vm373_vm2, 0.0, %v2256_v47  ;;  %v7205_v26 = vmul.f32 %v8855_v62, %v7070_v2 }
 0x8ad   : > { %v5236_v36 = vpack.i.bf16 %v7090_v13, %v7076_v41  ;;  %v7110_v12 = vmul.f32 %v8846_v28, %v7090_v13  ;;  %v7114_v48 = vpack.i.bf16 %v7090_v13, %v7070_v2  ;;  %v7123_v10 = vmul.f32 %v8848_v29, %v7090_v13  ;;  %8853 = vst [vmem:[#allocation10_spill] sm:$0xff] %v7193_v60 }
 0x8ae   : > { %v7189_v34 = vmul.f32 %v8851_v7, %v7090_v13  ;;  %8856 = vst [vmem:[#allocation9_spill] sm:$0xff] %v7205_v26  ;;  %v7209_v52 = vmul.f32 %v8855_v62, %v7090_v13 }
 0x8af   : > { %5237 = vrot.lane.b32.xlu1 %v5236_v36, %s5492_s21  ;;  %v2258_v31 = vpop.permute.xlu1 %2257 }
 0x8b0   : > { %v7126_v21 = vsel %vm373_vm2, %v2256_v47, %v2258_v31  ;;  %v7129_v57 = vsel %vm373_vm2, %v2258_v31, 0.0  ;;  %8857 = vst [vmem:[#allocation12_spill] sm:$0xff] %v7209_v52 }
 0x8b1   : > { %v7137_v22 = vpack.i.bf16 %v7129_v57, %v7126_v21  ;;  %v7141_v55 = vmul.f32 %v7126_v21, %v8843_v35  ;;  %v7145_v51 = vmul.f32 %v8844_v25, %v7129_v57  ;;  %v7155_v56 = vmul.f32 %v7126_v21, %v8845_v19 }
 0x8b2   : > { %v7159_v6 = vmul.f32 %v8847_v45, %v7129_v57  ;;  %v7177_v61 = vmul.f32 %v7126_v21, %v8849_v9  ;;  %v7181_v63 = vmul.f32 %v8850_v16, %v7129_v57  ;;  %v7197_v46 = vmul.f32 %v8852_v3, %v7126_v21 }
 0x8b3   : > { %5242 = vrot.lane.b32.xlu0 %v7137_v22, %s5492_s21 }
 0x8b4   : > { %8854 = vst [vmem:[#allocation8_spill] sm:$0xff] %v7197_v46 }
 0x8c3   : > { %v2260_v58 = vpop.permute.xlu0 %2259  ;;  %v2262_v59 = vpop.permute.xlu1 %2261 }
 0x8c4   : > { %v7218_v14 = vsel %vm373_vm2, 0.0, %v2260_v58  ;;  %v7221_v1 = vsel %vm373_vm2, %v2260_v58, %v2262_v59  ;;  %v7226_v8 = vsel %vm373_vm2, %v2262_v59, 0.0 }
 0x8c5   : > { %v5246_v39 = vpack.i.bf16 %v7221_v1, %v7218_v14  ;;  %v7234_v47 = vmul.f32 %v7221_v1, %v8845_v19  ;;  %v7244_v58 = vmul.f32 %v8847_v45, %v7226_v8  ;;  %v7283_v5 = vmul.f32 %v7221_v1, %v8849_v9 }
 0x8c6   : > { %v7287_v4 = vmul.f32 %v8850_v16, %v7226_v8  ;;  %v7301_v32 = vmul.f32 %v8851_v7, %v7218_v14  ;;  %v7309_v11 = vmul.f32 %v8852_v3, %v7221_v1 }
 0x8c7   : > { %v2264_v24 = vpop.permute.xlu0 %2263  ;;  %5247 = vrot.lane.b32.xlu1 %v5246_v39, %s5492_s21 }
 0x8c8   : > { %v7230_v17 = vsel %vm373_vm2, 0.0, %v2264_v24  ;;  %8859 = vst [vmem:[#allocation13_spill] sm:$0xff] %v7301_v32  ;;  %8861 = vst [vmem:[#allocation14_spill] sm:$0xff] %v7309_v11 }
 0x8c9   : > { %v5251_v36 = vpack.i.bf16 %v7230_v17, %v7226_v8  ;;  %v7240_v31 = vpack.i.bf16 %v7230_v17, %v7218_v14  ;;  %v7257_v23 = vmul.f32 %v8848_v29, %v7230_v17  ;;  %v7305_v38 = vmul.f32 %v8851_v7, %v7230_v17  ;;  %v8863_v7 = vld [vmem:[#allocation95_spill] sm:$0xff] }
 0x8ca   : > { %v7333_v44 = vmul.f32 %v8855_v62, %v7230_v17  ;;  %v3077_v46 = vmul.f32 %v7126_v21, %v8863_v7 }
 0x8cb   : > { %5252 = vrot.lane.b32.xlu0 %v5251_v36, %s5492_s21  ;;  %v2266_v59 = vpop.permute.xlu1 %2265  ;;  %v7265_v36 = vmul.f32 %v8848_v29, %v7218_v14  ;;  %8860 = vst [vmem:[#allocation15_spill] sm:$0xff] %v7305_v38  ;;  %v7329_v29 = vmul.f32 %v8855_v62, %v7218_v14  ;;  %v8867_v62 = vld [vmem:[#allocation93_spill] sm:$0xff] }
 0x8cc   : > { %v7248_v39 = vsel %vm373_vm2, %v2264_v24, %v2266_v59  ;;  %v7251_v42 = vsel %vm373_vm2, %v2266_v59, 0.0  ;;  %8865 = vst [vmem:[#allocation17_spill] sm:$0xff] %v7333_v44  ;;  %v3076_v60 = vmul.f32 %v8867_v62, %v7090_v13  ;;  %v3073_v52 = vmul.f32 %v8867_v62, %v7070_v2 }
 0x8cd   : > { %v7261_v33 = vpack.i.bf16 %v7251_v42, %v7248_v39  ;;  %v7273_v24 = vmul.f32 %v7248_v39, %v8845_v19  ;;  %v7277_v59 = vmul.f32 %v8847_v45, %v7251_v42  ;;  %v7291_v49 = vmul.f32 %v7248_v39, %v8849_v9  ;;  %8864 = vst [vmem:[#allocation18_spill] sm:$0xff] %v7329_v29 }
 0x8ce   : > { %v7295_v15 = vmul.f32 %v8850_v16, %v7251_v42  ;;  %v7321_v9 = vmul.f32 %v8852_v3, %v7248_v39  ;;  %v3074_v45 = vmul.f32 %v7073_v0, %v8863_v7  ;;  %v7337_v16 = vpack.i.bf16 %v7226_v8, %v7221_v1  ;;  %v8866_v3 = vld [vmem:[#allocation92_spill] sm:$0xff] }
 0x8cf   : > { %5262 = vrot.lane.b32.xlu0 %v7094_v53, %s5496_s23  ;;  %5257 = vrot.lane.b32.xlu1 %v7261_v33, %s5492_s21  ;;  %8858 = vst [vmem:[#allocation11_spill] sm:$0xff] %v7291_v49  ;;  %v3075_v26 = vmul.f32 %v8866_v3, %v7076_v41  ;;  %v3078_v32 = vmul.f32 %v8866_v3, %v7129_v57 }
 0x8d0   : > { %8862 = vst [vmem:[#allocation16_spill] sm:$0xff] %v7321_v9  ;;  %v5301_v19 = vpack.i.bf16 %v3076_v60, %v3073_v52  ;;  %v3080_v44 = vmul.f32 %v7221_v1, %v8863_v7  ;;  %v3081_v11 = vmul.f32 %v8866_v3, %v7226_v8  ;;  %v3083_v9 = vmul.f32 %v7248_v39, %v8863_v7  ;;  %v8869_v52 = vld [vmem:[#allocation118_spill] sm:$0xff] }
 0x8d1   : > { %v5291_v38 = vpack.i.bf16 %v3075_v26, %v3074_v45  ;;  %v5296_v29 = vpack.i.bf16 %v3078_v32, %v3077_v46  ;;  %v3084_v45 = vmul.f32 %v8866_v3, %v7251_v42  ;;  %v3082_v26 = vmul.f32 %v8867_v62, %v7230_v17 }
 0x8d2   : > { %v5306_v46 = vpack.i.bf16 %v3081_v11, %v3080_v44  ;;  %v3253_v49 = vmul.f32 %v8869_v52, %v7076_v41  ;;  %v8870_v11 = vld [vmem:[#allocation119_spill] sm:$0xff] }
 0x8d3   : > { %5272 = vrot.lane.b32.xlu0 %v7114_v48, %s5496_s23  ;;  %5267 = vrot.lane.b32.xlu1 %v7137_v22, %s5496_s23  ;;  %v5311_v32 = vpack.i.bf16 %v3084_v45, %v3083_v9  ;;  %v3254_v44 = vmul.f32 %v8870_v11, %v7090_v13  ;;  %v3251_v41 = vmul.f32 %v8870_v11, %v7070_v2 }
 0x8d7   : > { %5282 = vrot.lane.b32.xlu0 %v7261_v33, %s5496_s23  ;;  %5277 = vrot.lane.b32.xlu1 %v7337_v16, %s5496_s23 }
 0x8db   : > { %5292 = vrot.lane.b32.xlu0 %v5291_v38, %s5498_s13  ;;  %5287 = vrot.lane.b32.xlu1 %v7240_v31, %s5496_s23  ;;  %v8868_v38 = vld [vmem:[#allocation121_spill] sm:$0xff] }
 0x8dc   : > { %v3252_v60 = vmul.f32 %v7073_v0, %v8868_v38  ;;  %v3256_v0 = vmul.f32 %v8869_v52, %v7129_v57  ;;  %v3259_v57 = vmul.f32 %v8869_v52, %v7226_v8  ;;  %v3261_v13 = vmul.f32 %v7248_v39, %v8868_v38 }
 0x8de   : > { %v5321_v45 = vpack.i.bf16 %v3253_v49, %v3252_v60  ;;  %v3262_v49 = vmul.f32 %v8869_v52, %v7251_v42 }
 0x8df   : > { %5302 = vrot.lane.b32.xlu0 %v5301_v19, %s5498_s13  ;;  %5297 = vrot.lane.b32.xlu1 %v5296_v29, %s5498_s13  ;;  %v3079_v19 = vmul.f32 %v8867_v62, %v7218_v14  ;;  %v3255_v29 = vmul.f32 %v7126_v21, %v8868_v38  ;;  %v3258_v21 = vmul.f32 %v7221_v1, %v8868_v38 }
 0x8e0   : > { %v5341_v60 = vpack.i.bf16 %v3262_v49, %v3261_v13  ;;  %v3846_v13 = vld [vmem:[%s8460_s6 + $0x10] sm:$0xff]  ;;  %v3847_v49 = vld [vmem:[%s8460_s6 + $0x18] sm:$0xff] }
 0x8e1   : > { %v5316_v9 = vpack.i.bf16 %v3082_v26, %v3079_v19  ;;  %v5336_v2 = vpack.i.bf16 %v3259_v57, %v3258_v21  ;;  %v3260_v26 = vmul.f32 %v8870_v11, %v7230_v17  ;;  %v3257_v19 = vmul.f32 %v8870_v11, %v7218_v14  ;;  %v3845_v57 = vld [vmem:[%s8460_s6 + $0x8] sm:$0xff] }
 0x8e3   : > { %5307 = vrot.lane.b32.xlu1 %v5306_v46, %s5498_s13  ;;  %5312 = vrot.lane.b32.xlu0 %v5311_v32, %s5498_s13  ;;  %v5326_v46 = vpack.i.bf16 %v3256_v0, %v3255_v29  ;;  %v5331_v32 = vpack.i.bf16 %v3254_v44, %v3251_v41  ;;  %v5346_v29 = vpack.i.bf16 %v3260_v26, %v3257_v19  ;;  %v4972_v26 = vld [vmem:[%s8460_s6 + $0x30] sm:$0xff]  ;;  %v4973_v19 = vld [vmem:[%s8460_s6 + $0x38] sm:$0xff] }
 0x8e4   : > { %v8871_v0 = vpack.i.bf16 %v7087_v54, %v7083_v27  ;;  %v2570_v44 = vmul.f32 %v7221_v1, %v8843_v35  ;;  %v2574_v41 = vmul.f32 %v8844_v25, %v7251_v42  ;;  %v8873_v27 = vpack.i.bf16 %v7110_v12, %v7104_v50 }
 0x8e5   : > { %v2569_v42 = vmul.f32 %v8846_v28, %v7218_v14  ;;  %v8874_v50 = vpack.i.bf16 %v7118_v30, %v7098_v20  ;;  %v8876_v12 = vpack.i.bf16 %v7123_v10, %v7149_v37  ;;  %v8878_v20 = vpack.i.bf16 %v7277_v59, %v7273_v24  ;;  %v8884_v37 = vld [vmem:[#allocation11_spill] sm:$0xff] }
 0x8e6   : > { %v8879_v30 = vpack.i.bf16 %v7257_v23, %v7265_v36  ;;  %v8880_v10 = vpack.i.bf16 %v7173_v40, %v7167_v18  ;;  %v8886_v40 = vld [vmem:[#allocation15_spill] sm:$0xff] }
 0x8e7   : > { %5317 = vrot.lane.b32.xlu1 %v5316_v9, %s5498_s13  ;;  %5322 = vrot.lane.b32.xlu0 %v5321_v45, %s5500_s27  ;;  %v2571_v9 = vmul.f32 %v8844_v25, %v7226_v8  ;;  %v2573_v45 = vmul.f32 %v7248_v39, %v8843_v35  ;;  %v2572_v8 = vmul.f32 %v8846_v28, %v7230_v17 }
 0x8e9   : > { %v5366_v54 = vpack.i.bf16 %v2571_v9, %v2570_v44  ;;  %v5371_v1 = vpack.i.bf16 %v2574_v41, %v2573_v45  ;;  %v5376_v39 = vpack.i.bf16 %v2572_v8, %v2569_v42  ;;  %v4975_v44 = vld [vmem:[%s8460_s6 + $0x48] sm:$0xff]  ;;  %v4976_v9 = vld [vmem:[%s8460_s6 + $0x50] sm:$0xff] }
 0x8eb   : > { %5327 = vrot.lane.b32.xlu1 %v5326_v46, %s5500_s27  ;;  %5332 = vrot.lane.b32.xlu0 %v5331_v32, %s5500_s27  ;;  %v8872_v46 = vpack.i.bf16 %v7145_v51, %v7141_v55  ;;  %v8882_v55 = vpack.i.bf16 %v7189_v34, %v7185_v43  ;;  %v8883_v51 = vpack.i.bf16 %v7287_v4, %v7283_v5 }
 0x8ef   : > { %5337 = vrot.lane.b32.xlu1 %v5336_v2, %s5500_s27  ;;  %5342 = vrot.lane.b32.xlu0 %v5341_v60, %s5500_s27  ;;  %v4970_v2 = vld [vmem:[%s8460_s6 + $0x20] sm:$0xff]  ;;  %v4971_v60 = vld [vmem:[%s8460_s6 + $0x28] sm:$0xff] }
 0x8f3   : > { %5347 = vrot.lane.b32.xlu1 %v5346_v29, %s5500_s27  ;;  %5352 = vrot.lane.b32.xlu0 %v8871_v0, %s5493_s22  ;;  %v4974_v29 = vld [vmem:[%s8460_s6 + $0x40] sm:$0xff] }
 0x8f7   : > { %5357 = vrot.lane.b32.xlu1 %v8872_v46, %s5493_s22  ;;  %5362 = vrot.lane.b32.xlu0 %v8873_v27, %s5493_s22 }
 0x8fb   : > { %5367 = vrot.lane.b32.xlu1 %v5366_v54, %s5493_s22  ;;  %5372 = vrot.lane.b32.xlu0 %v5371_v1, %s5493_s22  ;;  %v4977_v54 = vld [vmem:[%s8460_s6 + $0x58] sm:$0xff]  ;;  %v4978_v1 = vld [vmem:[%s8460_s6 + $0x60] sm:$0xff] }
 0x8ff   : > { %5377 = vrot.lane.b32.xlu1 %v5376_v39, %s5493_s22  ;;  %5382 = vrot.lane.b32.xlu0 %v7094_v53, %s5501_s15  ;;  %v8875_v53 = vpack.i.bf16 %v7159_v6, %v7155_v56  ;;  %v8885_v56 = vpack.i.bf16 %v7295_v15, %v8884_v37  ;;  %v3756_v6 = vld [vmem:[%s8459_s5] sm:$0xff]  ;;  %v3757_v15 = vld [vmem:[%s8459_s5 + $0x8] sm:$0xff] }
 0x903   : > { %5387 = vrot.lane.b32.xlu1 %v7137_v22, %s5501_s15  ;;  %5392 = vrot.lane.b32.xlu0 %v7114_v48, %s5501_s15  ;;  %v8877_v48 = vpack.i.bf16 %v7244_v58, %v7234_v47  ;;  %v8881_v22 = vpack.i.bf16 %v7181_v63, %v7177_v61  ;;  %v8887_v61 = vld [vmem:[#allocation13_spill] sm:$0xff] }
 0x904   : > { %v8888_v63 = vpack.i.bf16 %v8886_v40, %v8887_v61  ;;  %v3759_v47 = vld [vmem:[%s8459_s5 + $0x18] sm:$0xff] }
 0x907   : > { %5397 = vrot.lane.b32.xlu1 %v7337_v16, %s5501_s15  ;;  %5402 = vrot.lane.b32.xlu0 %v7261_v33, %s5501_s15  ;;  %v3758_v33 = vld [vmem:[%s8459_s5 + $0x10] sm:$0xff] }
 0x90b   : > { %5407 = vrot.lane.b32.xlu1 %v7240_v31, %s5501_s15  ;;  %5412 = vrot.lane.b32.xlu0 %v8874_v50, %s5495_s11  ;;  %v3844_v31 = vld [vmem:[%s8460_s6] sm:$0xff] }
 0x90f   : > { %5417 = vrot.lane.b32.xlu1 %v8875_v53, %s5495_s11  ;;  %5422 = vrot.lane.b32.xlu0 %v8876_v12, %s5495_s11 }
 0x913   : > { %5427 = vrot.lane.b32.xlu1 %v8877_v48, %s5495_s11  ;;  %5432 = vrot.lane.b32.xlu0 %v8878_v20, %s5495_s11 }
 0x917   : > { %5437 = vrot.lane.b32.xlu1 %v8879_v30, %s5495_s11  ;;  %5442 = vrot.lane.b32.xlu0 %v8880_v10, %s5503_s19  ;;  %v4979_v10 = vld [vmem:[%s8460_s6 + $0x68] sm:$0xff] }
 0x91b   : > { %5447 = vrot.lane.b32.xlu1 %v8881_v22, %s5503_s19  ;;  %5452 = vrot.lane.b32.xlu0 %v8882_v55, %s5503_s19  ;;  %v4980_v22 = vld [vmem:[%s8460_s6 + $0x70] sm:$0xff] }
 0x91d   : > { %v5233_v18 = vpop.permute.xlu0 %5232 }
 0x91e   : > { %v5235_v43 = vunpack.i.h.bf16 %v5233_v18  ;;  %v5234_v4 = vunpack.i.l.bf16 %v5233_v18 }
 0x91f   : > { %5457 = vrot.lane.b32.xlu1 %v8883_v51, %s5503_s19  ;;  %5462 = vrot.lane.b32.xlu0 %v8885_v56, %s5503_s19 }
 0x920   : > { %v2340_v24 = vsel %vm577_vm10, %v5234_v4, %v5235_v43  ;;  %v4982_v4 = vld [vmem:[%s8460_s6 + $0x80] sm:$0xff] }
 0x921   : > { %v5238_v16 = vpop.permute.xlu1 %5237 }
 0x922   : > { %v5239_v34 = vunpack.i.l.bf16 %v5238_v16  ;;  %v5240_v5 = vunpack.i.h.bf16 %v5238_v16 }
 0x923   : > { %5467 = vrot.lane.b32.xlu1 %v8888_v63, %s5503_s19  ;;  %3762 = vperm.xlu0 %5228, %v3756_v6  }
 0x924   : > { %v2341_v58 = vsel %vm577_vm10, %v5235_v43, %v5239_v34  ;;  %v4981_v43 = vld [vmem:[%s8460_s6 + $0x78] sm:$0xff] }
 0x925   : > { %v5243_v23 = vpop.permute.xlu0 %5242 }
 0x926   : > { %v5245_v14 = vunpack.i.h.bf16 %v5243_v23  ;;  %v5244_v17 = vunpack.i.l.bf16 %v5243_v23 }
 0x927   : > { %3767 = vperm.xlu1 %5230, %v3757_v15   ;;  %3772 = vperm.xlu0 %5228, %v3758_v33  }
 0x928   : > { %v2343_v36 = vsel %vm577_vm10, %v5244_v17, %v5245_v14  ;;  %v2342_v59 = vsel %vm577_vm10, %v5240_v5, %v5244_v17 }
 0x929   : > { %v5006_v32 = vpack.c.bf16 %v2343_v36, %v2341_v58  ;;  %v5008_v21 = vpack.c.bf16 %v2342_v59, %v2340_v24 }
 0x92b   : > { %3777 = vperm.xlu1 %5230, %v3759_v47   ;;  %3858 = vperm.xlu0 %5228, %v3844_v31   ;;  %v4902_v47 = vld [vmem:[%s8458_s4 + $0x20] sm:$0xff] }
 0x92c   : > { %5007 = vmatprep.subr.bf16.mxu1 %v5006_v32  ;;  %v8889_v32 = vld [vmem:[#allocation8_spill] sm:$0xff] }
 0x92d   : > { %5009 = vmatpush1.bf16.msra.mxu1 %v5008_v21  ;;  %v8890_v21 = vld [vmem:[#allocation10_spill] sm:$0xff] }
 0x92f   : > { %3863 = vperm.xlu1 %5230, %v3845_v57   ;;  %3868 = vperm.xlu0 %5228, %v3846_v13   ;;  %v8891_v57 = vpack.c.bf16 %v8889_v32, %v8890_v21  ;;  %v4983_v13 = vld [vmem:[%s8460_s6 + $0x88] sm:$0xff]  ;;  %v4988_v32 = vld [vmem:[%s8460_s6 + $0xb0] sm:$0xff]  ;;  %v4989_v21 = vld [vmem:[%s8460_s6 + $0xb8] sm:$0xff] }
 0x933   : > { %3873 = vperm.xlu1 %5230, %v3847_v49   ;;  %3899 = vperm.xlu0 %5228, %v4970_v2   ;;  %v4984_v49 = vld [vmem:[%s8460_s6 + $0x90] sm:$0xff] }
 0x937   : > { %3904 = vperm.xlu1 %5230, %v4971_v60   ;;  %3909 = vperm.xlu0 %5228, %v4972_v26   ;;  %v8892_v26 = vld [vmem:[#allocation12_spill] sm:$0xff] }
 0x939   : > { %v5248_v0 = vpop.permute.xlu1 %5247 }
 0x93a   : > { %v5250_v41 = vunpack.i.h.bf16 %v5248_v0  ;;  %v5249_v46 = vunpack.i.l.bf16 %v5248_v0 }
 0x93b   : > { %3914 = vperm.xlu1 %5230, %v4973_v19   ;;  %4008 = vperm.xlu0 %5228, %v4974_v29   ;;  %v8893_v19 = vld [vmem:[#allocation9_spill] sm:$0xff] }
 0x93c   : > { %v2344_v48 = vsel %vm577_vm10, %v5249_v46, %v5250_v41  ;;  %v8894_v29 = vpack.c.bf16 %v8892_v26, %v8893_v19  ;;  %v4931_v26 = vld [vmem:[%s8458_s4 + $0x88] sm:$0xff] }
 0x93d   : > { %v5253_v45 = vpop.permute.xlu0 %5252 }
 0x93e   : > { %v5254_v27 = vunpack.i.l.bf16 %v5253_v45  ;;  %v5255_v39 = vunpack.i.h.bf16 %v5253_v45  ;;  %v4903_v45 = vld [vmem:[%s8458_s4 + $0x28] sm:$0xff] }
 0x93f   : > { %4013 = vperm.xlu1 %5230, %v4975_v44   ;;  %4018 = vperm.xlu0 %5228, %v4976_v9  }
 0x940   : > { %v2345_v12 = vsel %vm577_vm10, %v5250_v41, %v5254_v27  ;;  %v8895_v27 = vld [vmem:[#allocation16_spill] sm:$0xff] }
 0x941   : > { %v5263_v8 = vpop.permute.xlu0 %5262  ;;  %v5258_v42 = vpop.permute.xlu1 %5257 }
 0x942   : > { %v5260_v50 = vunpack.i.h.bf16 %v5258_v42  ;;  %v5259_v53 = vunpack.i.l.bf16 %v5258_v42  ;;  %v5265_v20 = vunpack.i.h.bf16 %v5263_v8  ;;  %v5264_v30 = vunpack.i.l.bf16 %v5263_v8 }
 0x943   : > { %4023 = vperm.xlu1 %5230, %v4977_v54   ;;  %4117 = vperm.xlu0 %5228, %v4978_v1   ;;  %v8896_v54 = vld [vmem:[#allocation14_spill] sm:$0xff]  ;;  %v8898_v8 = vmov 0.0  }
 0x944   : > { %v2347_v55 = vsel %vm577_vm10, %v5259_v53, %v5260_v50  ;;  %v2346_v51 = vsel %vm577_vm10, %v5255_v39, %v5259_v53  ;;  %v2944_v34 = vsel %vm1229_vm13, %v5264_v30, %v5265_v20  ;;  %v8897_v1 = vpack.c.bf16 %v8895_v27, %v8896_v54  ;;  %v4985_v50 = vld [vmem:[%s8460_s6 + $0x98] sm:$0xff]  ;;  %v4987_v53 = vld [vmem:[%s8460_s6 + $0xa8] sm:$0xff]  ;;  %v4994_v54 = vld [vmem:[%s8460_s6 + $0xe0] sm:$0xff] }
 0x945   : > { %v5273_v37 = vpop.permute.xlu0 %5272  ;;  %v5268_v56 = vpop.permute.xlu1 %5267  ;;  %v5010_v6 = vpack.c.bf16 %v2347_v55, %v2345_v12  ;;  %v5012_v18 = vpack.c.bf16 %v2346_v51, %v2344_v48  ;;  %v8899_v20 = vld [vmem:[#allocation17_spill] sm:$0xff]  ;;  %v4991_v27 = vld [vmem:[%s8460_s6 + $0xc8] sm:$0xff] }
 0x946   : > { %v5275_v16 = vunpack.i.h.bf16 %v5273_v37  ;;  %v5274_v40 = vunpack.i.l.bf16 %v5273_v37  ;;  %v5270_v61 = vunpack.i.h.bf16 %v5268_v56  ;;  %v5269_v63 = vunpack.i.l.bf16 %v5268_v56  ;;  %v4904_v37 = vld [vmem:[%s8458_s4 + $0x30] sm:$0xff] }
 0x947   : > { %4122 = vperm.xlu1 %5230, %v4979_v10   ;;  %4127 = vperm.xlu0 %5228, %v4980_v22  }
 0x948   : > { %5011 = vmatprep.subr.bf16.mxu1 %v5010_v6  ;;  %v2946_v15 = vsel %vm1229_vm13, %v5269_v63, %v5270_v61  ;;  %v2943_v33 = vsel %vm1229_vm13, %v5274_v40, %v5264_v30  ;;  %v2945_v23 = vsel %vm1229_vm13, %v5275_v16, %v5269_v63  ;;  %v8900_v30 = vld [vmem:[#allocation18_spill] sm:$0xff] }
 0x949   : > { %5013 = vmatpush1.bf16.msra.mxu1 %v5012_v18  ;;  %v5283_v5 = vpop.permute.xlu0 %5282  ;;  %v5278_v14 = vpop.permute.xlu1 %5277  ;;  %v7569_v17 = vpack.c.bf16 %v2946_v15, %v2944_v34  ;;  %v7574_v31 = vpack.c.bf16 %v2945_v23, %v2943_v33  ;;  %v8901_v10 = vpack.c.bf16 %v8899_v20, %v8900_v30  ;;  %v2292_v30 = vld [vmem:[%s8458_s4 + $0x8] sm:$0xff] }
 0x94a   : > { %v5285_v58 = vunpack.i.h.bf16 %v5283_v5  ;;  %v5284_v36 = vunpack.i.l.bf16 %v5283_v5  ;;  %v5280_v24 = vunpack.i.h.bf16 %v5278_v14  ;;  %v5279_v59 = vunpack.i.l.bf16 %v5278_v14  ;;  %5015 = vmatprep.subr.bf16.mxu1 %v8891_v57  ;;  %v4930_v5 = vld [vmem:[%s8458_s4 + $0x80] sm:$0xff] }
 0x94b   : > { %4132 = vperm.xlu1 %5230, %v4981_v43   ;;  %4214 = vperm.xlu0 %5228, %v4982_v4   ;;  %v4986_v43 = vld [vmem:[%s8460_s6 + $0xa0] sm:$0xff] }
 0x94c   : > { %5039 = vmatprep.subr.bf16.mxu0 %v7569_v17  ;;  %4906 = vmatmul.mubr.msk.f32.vlgmr.msra.gmra.mrb[0].mxu1 %vm1576_vm8, %v4902_v47  ;;  %v2948_v2 = vsel %vm1229_vm13, %v5279_v59, %v5280_v24  ;;  %v2950_v60 = vsel %vm1229_vm13, %v5284_v36, %v5285_v58  ;;  %v4990_v4 = vld [vmem:[%s8460_s6 + $0xc0] sm:$0xff] }
 0x94d   : > { %5017 = vmatpush1.bf16.msra.mxu1 %v8894_v29  ;;  %5041 = vmatpush1.bf16.msra.mxu0 %v7574_v31  ;;  %v5293_v0 = vpop.permute.xlu0 %5292  ;;  %v5288_v44 = vpop.permute.xlu1 %5287  ;;  %v7593_v9 = vpack.c.bf16 %v2950_v60, %v2948_v2 }
 0x94e   : > { %v5290_v41 = vunpack.i.h.bf16 %v5288_v44  ;;  %v5289_v46 = vunpack.i.l.bf16 %v5288_v44  ;;  %5019 = vmatprep.subr.bf16.mxu1 %v8897_v1  ;;  %2438 = vmatprep.mubr.f32.mxu1 %v8898_v8  ;;  %v5295_v42 = vunpack.i.h.bf16 %v5293_v0  ;;  %v5294_v39 = vunpack.i.l.bf16 %v5293_v0 }
 0x94f   : > { %4219 = vperm.xlu1 %5230, %v4983_v13   ;;  %4224 = vperm.xlu0 %5228, %v4984_v49  }
 0x950   : > { %5043 = vmatprep.subr.bf16.mxu0 %v7593_v9  ;;  %v2947_v12 = vsel %vm1229_vm13, %v5289_v46, %v5279_v59  ;;  %v2949_v48 = vsel %vm1229_vm13, %v5290_v41, %v5284_v36  ;;  %4907 = vmatmul.mubr.msk.f32.gmra.mrb[2].mxu1 %vm1576_vm8, %v4903_v45  ;;  %v3122_v40 = vsel %vm1439_vm14, %v5294_v39, %v5295_v42  ;;  %v4905_v59 = vld [vmem:[%s8458_s4 + $0x38] sm:$0xff]  ;;  %v2291_v45 = vld [vmem:[%s8458_s4] sm:$0xff] }
 0x951   : > { %5021 = vmatpush1.bf16.msra.mxu1 %v8901_v10  ;;  %v5303_v22 = vpop.permute.xlu0 %5302  ;;  %v5298_v55 = vpop.permute.xlu1 %5297  ;;  %v7615_v51 = vpack.c.bf16 %v2949_v48, %v2947_v12  ;;  %2444 = vmatprep.mubr.f32.mxu1 %v8898_v8 }
 0x952   : > { %v5305_v56 = vunpack.i.h.bf16 %v5303_v22  ;;  %v5304_v6 = vunpack.i.l.bf16 %v5303_v22  ;;  %v5300_v18 = vunpack.i.h.bf16 %v5298_v55  ;;  %v5299_v16 = vunpack.i.l.bf16 %v5298_v55  ;;  %v4992_v55 = vld [vmem:[%s8460_s6 + $0xd0] sm:$0xff] }
 0x953   : > { %4229 = vperm.xlu1 %5230, %v4985_v50   ;;  %4328 = vperm.xlu0 %5228, %v4987_v53  }
 0x954   : > { %v3121_v61 = vsel %vm1439_vm14, %v5304_v6, %v5294_v39  ;;  %v3123_v63 = vsel %vm1439_vm14, %v5305_v56, %v5299_v16  ;;  %5045 = vmatpush1.bf16.msra.mxu0 %v7615_v51  ;;  %v3124_v34 = vsel %vm1439_vm14, %v5299_v16, %v5300_v18  ;;  %4908 = vmatmul.mubr.msk.f32.gmra.mrb[4].mxu1 %vm1576_vm8, %v4904_v37  ;;  %v4993_v37 = vld [vmem:[%s8460_s6 + $0xd8] sm:$0xff] }
 0x955   : > { %v5313_v15 = vpop.permute.xlu0 %5312  ;;  %v5308_v33 = vpop.permute.xlu1 %5307  ;;  %v5046_v23 = vpack.c.bf16 %v3124_v34, %v3122_v40  ;;  %v5048_v14 = vpack.c.bf16 %v3123_v63, %v3121_v61  ;;  %2450 = vmatprep.mubr.f32.mxu1 %v8898_v8  ;;  %v4938_v40 = vld [vmem:[%s8458_s4 + $0xa0] sm:$0xff] }
 0x956   : > { %v5315_v47 = vunpack.i.h.bf16 %v5313_v15  ;;  %v5314_v58 = vunpack.i.l.bf16 %v5313_v15  ;;  %v5310_v36 = vunpack.i.h.bf16 %v5308_v33  ;;  %v5309_v24 = vunpack.i.l.bf16 %v5308_v33  ;;  %v4995_v15 = vld [vmem:[%s8460_s6 + $0xe8] sm:$0xff]  ;;  %v4998_v33 = vld [vmem:[%s8460_s6 + $0x100] sm:$0xff] }
 0x957   : > { %4323 = vperm.xlu1 %5230, %v4986_v43   ;;  %4432 = vperm.xlu0 %5228, %v4990_v4  }
 0x958   : > { %5047 = vmatprep.subr.bf16.mxu0 %v5046_v23  ;;  %4934 = vmatmul.mubr.msk.f32.vlgmr.msra.gmra.mrb[0].mxu0 %vm1576_vm8, %v4930_v5  ;;  %v3126_v57 = vsel %vm1439_vm14, %v5309_v24, %v5310_v36  ;;  %v3128_v13 = vsel %vm1439_vm14, %v5314_v58, %v5315_v47  ;;  %v4939_v36 = vld [vmem:[%s8458_s4 + $0xa8] sm:$0xff] }
 0x959   : > { %5049 = vmatpush1.bf16.msra.mxu0 %v5048_v14  ;;  %v5323_v49 = vpop.permute.xlu0 %5322  ;;  %v5318_v2 = vpop.permute.xlu1 %5317  ;;  %v5050_v60 = vpack.c.bf16 %v3128_v13, %v3126_v57  ;;  %3041 = vmatprep.mubr.f32.mxu0 %v8898_v8 }
 0x95a   : > { %v5320_v19 = vunpack.i.h.bf16 %v5318_v2  ;;  %v5319_v29 = vunpack.i.l.bf16 %v5318_v2  ;;  %4909 = vmatmul.mubr.msk.f32.gmra.mrb[6].mxu1 %vm1576_vm8, %v4905_v59  ;;  %v5325_v0 = vunpack.i.h.bf16 %v5323_v49  ;;  %v5324_v44 = vunpack.i.l.bf16 %v5323_v49  ;;  %v4996_v2 = vld [vmem:[%s8460_s6 + $0xf0] sm:$0xff] }
 0x95b   : > { %4333 = vperm.xlu1 %5230, %v4988_v32   ;;  %4338 = vperm.xlu0 %5228, %v4989_v21   ;;  %v2293_v32 = vld [vmem:[%s8458_s4 + $0x10] sm:$0xff] }
 0x95c   : > { %v3127_v41 = vsel %vm1439_vm14, %v5320_v19, %v5314_v58  ;;  %v3125_v46 = vsel %vm1439_vm14, %v5319_v29, %v5309_v24  ;;  %5051 = vmatprep.subr.bf16.mxu0 %v5050_v60  ;;  %4935 = vmatmul.mubr.msk.f32.gmra.mrb[2].mxu0 %vm1576_vm8, %v4931_v26  ;;  %v3300_v20 = vsel %vm1664_vm15, %v5324_v44, %v5325_v0  ;;  %v4997_v60 = vld [vmem:[%s8460_s6 + $0xf8] sm:$0xff] }
 0x95d   : > { %v5333_v1 = vpop.permute.xlu0 %5332  ;;  %v5328_v42 = vpop.permute.xlu1 %5327  ;;  %v5052_v39 = vpack.c.bf16 %v3127_v41, %v3125_v46  ;;  %3213 = vmatprep.mubr.f32.mxu0 %v8898_v8  ;;  %2533 = vmatprep.mubr.f32.mxu1 %v8898_v8  ;;  %v4940_v46 = vld [vmem:[%s8458_s4 + $0xb0] sm:$0xff] }
 0x95e   : > { %v5335_v50 = vunpack.i.h.bf16 %v5333_v1  ;;  %v5334_v53 = vunpack.i.l.bf16 %v5333_v1  ;;  %v5330_v12 = vunpack.i.h.bf16 %v5328_v42  ;;  %v5329_v48 = vunpack.i.l.bf16 %v5328_v42  ;;  %4910 = vmatmul.mubr.msk.f32.vlgmr.msra.gmra.mrb[0].mxu1 %vm1576_vm8, %v2291_v45  ;;  %v4999_v42 = vld [vmem:[%s8460_s6 + $0x108] sm:$0xff] }
 0x95f   : > { %4437 = vperm.xlu1 %5230, %v4991_v27   ;;  %4529 = vperm.xlu0 %5228, %v4994_v54   ;;  %v2294_v27 = vld [vmem:[%s8458_s4 + $0x18] sm:$0xff] }
 0x960   : > { %v3299_v10 = vsel %vm1664_vm15, %v5334_v53, %v5324_v44  ;;  %v3301_v22 = vsel %vm1664_vm15, %v5335_v50, %v5329_v48  ;;  %5053 = vmatpush1.bf16.msra.mxu0 %v5052_v39  ;;  %v3302_v56 = vsel %vm1664_vm15, %v5329_v48, %v5330_v12  ;;  %2539 = vmatprep.mubr.f32.mxu1 %v8898_v8  ;;  %v5001_v39 = vld [vmem:[%s8460_s6 + $0x118] sm:$0xff] }
 0x961   : > { %v5343_v6 = vpop.permute.xlu0 %5342  ;;  %v5338_v18 = vpop.permute.xlu1 %5337  ;;  %v5054_v16 = vpack.c.bf16 %v3302_v56, %v3300_v20  ;;  %v5056_v61 = vpack.c.bf16 %v3301_v22, %v3299_v10  ;;  %v4941_v56 = vld [vmem:[%s8458_s4 + $0xb8] sm:$0xff] }
 0x962   : > { %v5345_v63 = vunpack.i.h.bf16 %v5343_v6  ;;  %v5344_v43 = vunpack.i.l.bf16 %v5343_v6  ;;  %v5340_v4 = vunpack.i.h.bf16 %v5338_v18  ;;  %v5339_v34 = vunpack.i.l.bf16 %v5338_v18  ;;  %4911 = vmatmul.mubr.msk.f32.gmra.mrb[2].mxu1 %vm1576_vm8, %v2292_v30  ;;  %v5000_v6 = vld [vmem:[%s8460_s6 + $0x110] sm:$0xff] }
 0x963   : > { %4442 = vperm.xlu1 %5230, %v4992_v55   ;;  %4447 = vperm.xlu0 %5228, %v4993_v37  }
 0x964   : > { %5055 = vmatprep.subr.bf16.mxu0 %v5054_v16  ;;  %4942 = vmatmul.mubr.msk.f32.vlgmr.msra.gmra.mrb[0].mxu0 %vm1576_vm8, %v4938_v40  ;;  %v3304_v23 = vsel %vm1664_vm15, %v5339_v34, %v5340_v4  ;;  %v3306_v5 = vsel %vm1664_vm15, %v5344_v43, %v5345_v63 }
 0x965   : > { %5057 = vmatpush1.bf16.msra.mxu0 %v5056_v61  ;;  %v5353_v14 = vpop.permute.xlu0 %5352  ;;  %v5348_v47 = vpop.permute.xlu1 %5347  ;;  %v5058_v58 = vpack.c.bf16 %v3306_v5, %v3304_v23  ;;  %3219 = vmatprep.mubr.f32.mxu0 %v8898_v8 }
 0x966   : > { %v5350_v24 = vunpack.i.h.bf16 %v5348_v47  ;;  %v5349_v59 = vunpack.i.l.bf16 %v5348_v47  ;;  %2545 = vmatprep.mubr.f32.mxu1 %v8898_v8  ;;  %v5355_v21 = vunpack.i.h.bf16 %v5353_v14  ;;  %v5354_v57 = vunpack.i.l.bf16 %v5353_v14 }
 0x967   : > { %4534 = vperm.xlu1 %5230, %v4995_v15   ;;  %4638 = vperm.xlu0 %5228, %v4998_v33  }
 0x968   : > { %v3305_v13 = vsel %vm1664_vm15, %v5350_v24, %v5344_v43  ;;  %v3303_v49 = vsel %vm1664_vm15, %v5349_v59, %v5339_v34  ;;  %5059 = vmatprep.subr.bf16.mxu0 %v5058_v58  ;;  %4943 = vmatmul.mubr.msk.f32.gmra.mrb[2].mxu0 %vm1576_vm8, %v4939_v36  ;;  %v2612_v50 = vsel %vm801_vm11, %v5354_v57, %v5355_v21  ;;  %v4946_v34 = vld [vmem:[%s8458_s4 + $0xc0] sm:$0xff]  ;;  %v4947_v21 = vld [vmem:[%s8458_s4 + $0xc8] sm:$0xff] }
 0x969   : > { %v5363_v26 = vpop.permute.xlu0 %5362  ;;  %v5358_v19 = vpop.permute.xlu1 %5357  ;;  %v5060_v29 = vpack.c.bf16 %v3305_v13, %v3303_v49  ;;  %3225 = vmatprep.mubr.f32.mxu0 %v8898_v8  ;;  %4912 = vmatmul.mubr.msk.f32.gmra.mrb[4].mxu1 %vm1576_vm8, %v2293_v32 }
 0x96a   : > { %v5365_v0 = vunpack.i.h.bf16 %v5363_v26  ;;  %v5364_v44 = vunpack.i.l.bf16 %v5363_v26  ;;  %v5360_v45 = vunpack.i.h.bf16 %v5358_v19  ;;  %v5359_v41 = vunpack.i.l.bf16 %v5358_v19  ;;  %2551 = vmatprep.mubr.f32.mxu1 %v8898_v8 }
 0x96b   : > { %4539 = vperm.xlu1 %5230, %v4996_v2   ;;  %4544 = vperm.xlu0 %5228, %v4997_v60  }
 0x96c   : > { %v2611_v54 = vsel %vm801_vm11, %v5364_v44, %v5354_v57  ;;  %v2613_v1 = vsel %vm801_vm11, %v5365_v0, %v5359_v41  ;;  %5061 = vmatpush1.bf16.msra.mxu0 %v5060_v29  ;;  %v2614_v53 = vsel %vm801_vm11, %v5359_v41, %v5360_v45  ;;  %v4914_v57 = vld [vmem:[%s8458_s4 + $0x40] sm:$0xff] }
 0x96d   : > { %v5373_v12 = vpop.permute.xlu0 %5372  ;;  %v5368_v48 = vpop.permute.xlu1 %5367  ;;  %v5022_v20 = vpack.c.bf16 %v2614_v53, %v2612_v50  ;;  %v5024_v30 = vpack.c.bf16 %v2613_v1, %v2611_v54  ;;  %4944 = vmatmul.mubr.msk.f32.gmra.mrb[4].mxu0 %vm1576_vm8, %v4940_v46  ;;  %4913 = vmatmul.mubr.msk.f32.gmra.mrb[6].mxu1 %vm1576_vm8, %v2294_v27  ;;  %v4948_v27 = vld [vmem:[%s8458_s4 + $0xd0] sm:$0xff]  ;;  %v4915_v54 = vld [vmem:[%s8458_s4 + $0x48] sm:$0xff] }
 0x96e   : > { %v5375_v10 = vunpack.i.h.bf16 %v5373_v12  ;;  %v5374_v22 = vunpack.i.l.bf16 %v5373_v12  ;;  %v5370_v55 = vunpack.i.h.bf16 %v5368_v48  ;;  %v5369_v37 = vunpack.i.l.bf16 %v5368_v48  ;;  %3231 = vmatprep.mubr.f32.mxu0 %v8898_v8  ;;  %2703 = vmatprep.mubr.f32.mxu1 %v8898_v8 }
 0x96f   : > { %4643 = vperm.xlu1 %5230, %v4999_v42   ;;  %4653 = vperm.xlu0 %5228, %v5001_v39  }
 0x970   : > { %5023 = vmatprep.subr.bf16.mxu1 %v5022_v20  ;;  %v2616_v18 = vsel %vm801_vm11, %v5369_v37, %v5370_v55  ;;  %v2618_v16 = vsel %vm801_vm11, %v5374_v22, %v5375_v10  ;;  %v4949_v20 = vld [vmem:[%s8458_s4 + $0xd8] sm:$0xff] }
 0x971   : > { %5025 = vmatpush1.bf16.msra.mxu1 %v5024_v30  ;;  %v5383_v40 = vpop.permute.xlu0 %5382  ;;  %v5378_v61 = vpop.permute.xlu1 %5377  ;;  %v5026_v63 = vpack.c.bf16 %v2618_v16, %v2616_v18  ;;  %4945 = vmatmul.mubr.msk.f32.gmra.mrb[6].mxu0 %vm1576_vm8, %v4941_v56  ;;  %v4916_v30 = vld [vmem:[%s8458_s4 + $0x50] sm:$0xff] }
 0x972   : > { %v5380_v43 = vunpack.i.h.bf16 %v5378_v61  ;;  %v5379_v4 = vunpack.i.l.bf16 %v5378_v61  ;;  %3391 = vmatprep.mubr.f32.mxu0 %v8898_v8  ;;  %v5385_v15 = vunpack.i.h.bf16 %v5383_v40  ;;  %v5384_v33 = vunpack.i.l.bf16 %v5383_v40 }
 0x973   : > { %4648 = vperm.xlu1 %5230, %v5000_v6   ;;  %5027 = vmatprep.subr.bf16.mxu1 %v5026_v63 }
 0x974   : > { %v2617_v23 = vsel %vm801_vm11, %v5380_v43, %v5374_v22  ;;  %v2615_v5 = vsel %vm801_vm11, %v5379_v4, %v5369_v37  ;;  %v3454_v2 = vsel %vm1865_vm0, %v5384_v33, %v5385_v15  ;;  %v4917_v43 = vld [vmem:[%s8458_s4 + $0x58] sm:$0xff]  ;;  %v4954_v4 = vld [vmem:[%s8458_s4 + $0xe0] sm:$0xff] }
 0x975   : > { %v5393_v14 = vpop.permute.xlu0 %5392  ;;  %v5388_v47 = vpop.permute.xlu1 %5387  ;;  %v5028_v58 = vpack.c.bf16 %v2617_v23, %v2615_v5  ;;  %4950 = vmatmul.mubr.msk.f32.vlgmr.msra.gmra.mrb[0].mxu0 %vm1576_vm8, %v4946_v34 }
 0x976   : > { %v5395_v36 = vunpack.i.h.bf16 %v5393_v14  ;;  %v5394_v24 = vunpack.i.l.bf16 %v5393_v14  ;;  %v5390_v59 = vunpack.i.h.bf16 %v5388_v47  ;;  %v5389_v32 = vunpack.i.l.bf16 %v5388_v47  ;;  %3397 = vmatprep.mubr.f32.mxu0 %v8898_v8 }
 0x977   : > { %5029 = vmatpush1.bf16.msra.mxu1 %v5028_v58 }
 0x978   : > { %v3453_v13 = vsel %vm1865_vm0, %v5394_v24, %v5384_v33  ;;  %v3455_v49 = vsel %vm1865_vm0, %v5395_v36, %v5389_v32  ;;  %v3456_v60 = vsel %vm1865_vm0, %v5389_v32, %v5390_v59 }
 0x979   : > { %v5403_v26 = vpop.permute.xlu0 %5402  ;;  %v5398_v19 = vpop.permute.xlu1 %5397  ;;  %v5062_v29 = vpack.c.bf16 %v3456_v60, %v3454_v2  ;;  %v5064_v0 = vpack.c.bf16 %v3455_v49, %v3453_v13  ;;  %4951 = vmatmul.mubr.msk.f32.gmra.mrb[2].mxu0 %vm1576_vm8, %v4947_v21  ;;  %v4955_v21 = vld [vmem:[%s8458_s4 + $0xe8] sm:$0xff] }
 0x97a   : > { %v5405_v44 = vunpack.i.h.bf16 %v5403_v26  ;;  %v5404_v45 = vunpack.i.l.bf16 %v5403_v26  ;;  %v5400_v41 = vunpack.i.h.bf16 %v5398_v19  ;;  %v5399_v46 = vunpack.i.l.bf16 %v5398_v19  ;;  %4918 = vmatmul.mubr.msk.f32.vlgmr.msra.gmra.mrb[0].mxu1 %vm1576_vm8, %v4914_v57  ;;  %3403 = vmatprep.mubr.f32.mxu0 %v8898_v8 }
 0x97b   : > { %5063 = vmatprep.subr.bf16.mxu0 %v5062_v29  ;;  %2709 = vmatprep.mubr.f32.mxu1 %v8898_v8  ;;  %v4956_v29 = vld [vmem:[%s8458_s4 + $0xf0] sm:$0xff] }
 0x97c   : > { %5065 = vmatpush1.bf16.msra.mxu0 %v5064_v0  ;;  %v3458_v1 = vsel %vm1865_vm0, %v5399_v46, %v5400_v41  ;;  %v3460_v42 = vsel %vm1865_vm0, %v5404_v45, %v5405_v44 }
 0x97d   : > { %v5413_v39 = vpop.permute.xlu0 %5412  ;;  %v5408_v50 = vpop.permute.xlu1 %5407  ;;  %v5066_v53 = vpack.c.bf16 %v3460_v42, %v3458_v1  ;;  %4952 = vmatmul.mubr.msk.f32.gmra.mrb[4].mxu0 %vm1576_vm8, %v4948_v27 }
 0x97e   : > { %v5410_v12 = vunpack.i.h.bf16 %v5408_v50  ;;  %v5409_v48 = vunpack.i.l.bf16 %v5408_v50  ;;  %4919 = vmatmul.mubr.msk.f32.gmra.mrb[2].mxu1 %vm1576_vm8, %v4915_v54  ;;  %3409 = vmatprep.mubr.f32.mxu0 %v8898_v8  ;;  %v5415_v10 = vunpack.i.h.bf16 %v5413_v39  ;;  %v5414_v22 = vunpack.i.l.bf16 %v5413_v39 }
 0x97f   : > { %5067 = vmatprep.subr.bf16.mxu0 %v5066_v53  ;;  %2715 = vmatprep.mubr.f32.mxu1 %v8898_v8  ;;  %v4922_v53 = vld [vmem:[%s8458_s4 + $0x60] sm:$0xff] }
 0x980   : > { %v3459_v55 = vsel %vm1865_vm0, %v5410_v12, %v5404_v45  ;;  %v3457_v37 = vsel %vm1865_vm0, %v5409_v48, %v5399_v46  ;;  %v2790_v33 = vsel %vm1028_vm12, %v5414_v22, %v5415_v10  ;;  %v4957_v12 = vld [vmem:[%s8458_s4 + $0xf8] sm:$0xff] }
 0x981   : > { %v5423_v56 = vpop.permute.xlu0 %5422  ;;  %v5418_v6 = vpop.permute.xlu1 %5417  ;;  %v5068_v18 = vpack.c.bf16 %v3459_v55, %v3457_v37  ;;  %4953 = vmatmul.mubr.msk.f32.gmra.mrb[6].mxu0 %vm1576_vm8, %v4949_v20 }
 0x982   : > { %v5425_v16 = vunpack.i.h.bf16 %v5423_v56  ;;  %v5424_v40 = vunpack.i.l.bf16 %v5423_v56  ;;  %v5420_v61 = vunpack.i.h.bf16 %v5418_v6  ;;  %v5419_v63 = vunpack.i.l.bf16 %v5418_v6  ;;  %4920 = vmatmul.mubr.msk.f32.gmra.mrb[4].mxu1 %vm1576_vm8, %v4916_v30  ;;  %3545 = vmatprep.mubr.f32.mxu0 %v8898_v8 }
 0x983   : > { %5069 = vmatpush1.bf16.msra.mxu0 %v5068_v18  ;;  %2721 = vmatprep.mubr.f32.mxu1 %v8898_v8 }
 0x984   : > { %v2789_v34 = vsel %vm1028_vm12, %v5424_v40, %v5414_v22  ;;  %v2791_v15 = vsel %vm1028_vm12, %v5425_v16, %v5419_v63  ;;  %v2792_v23 = vsel %vm1028_vm12, %v5419_v63, %v5420_v61 }
 0x985   : > { %v5433_v5 = vpop.permute.xlu0 %5432  ;;  %v5428_v14 = vpop.permute.xlu1 %5427  ;;  %v5030_v47 = vpack.c.bf16 %v2792_v23, %v2790_v33  ;;  %v5032_v58 = vpack.c.bf16 %v2791_v15, %v2789_v34 }
 0x986   : > { %v5435_v36 = vunpack.i.h.bf16 %v5433_v5  ;;  %v5434_v24 = vunpack.i.l.bf16 %v5433_v5  ;;  %v5430_v59 = vunpack.i.h.bf16 %v5428_v14  ;;  %v5429_v32 = vunpack.i.l.bf16 %v5428_v14  ;;  %4921 = vmatmul.mubr.msk.f32.gmra.mrb[6].mxu1 %vm1576_vm8, %v4917_v43  ;;  %4958 = vmatmul.mubr.msk.f32.vlgmr.msra.gmra.mrb[0].mxu0 %vm1576_vm8, %v4954_v4  ;;  %v4962_v5 = vld [vmem:[%s8458_s4 + $0x100] sm:$0xff]  ;;  %v4932_v14 = vld [vmem:[%s8458_s4 + $0x90] sm:$0xff] }
 0x987   : > { %5031 = vmatprep.subr.bf16.mxu1 %v5030_v47  ;;  %2881 = vmatprep.mubr.f32.mxu1 %v8898_v8  ;;  %v4963_v47 = vld [vmem:[%s8458_s4 + $0x108] sm:$0xff] }
 0x988   : > { %5033 = vmatpush1.bf16.msra.mxu1 %v5032_v58  ;;  %v2794_v57 = vsel %vm1028_vm12, %v5429_v32, %v5430_v59  ;;  %v2796_v13 = vsel %vm1028_vm12, %v5434_v24, %v5435_v36  ;;  %3551 = vmatprep.mubr.f32.mxu0 %v8898_v8  ;;  %v4933_v58 = vld [vmem:[%s8458_s4 + $0x98] sm:$0xff]  ;;  %v4964_v36 = vld [vmem:[%s8458_s4 + $0x110] sm:$0xff] }
 0x989   : > { %v5443_v49 = vpop.permute.xlu0 %5442  ;;  %v5438_v2 = vpop.permute.xlu1 %5437  ;;  %v5034_v60 = vpack.c.bf16 %v2796_v13, %v2794_v57 }
 0x98a   : > { %v5440_v26 = vunpack.i.h.bf16 %v5438_v2  ;;  %v5439_v19 = vunpack.i.l.bf16 %v5438_v2  ;;  %4959 = vmatmul.mubr.msk.f32.gmra.mrb[2].mxu0 %vm1576_vm8, %v4955_v21  ;;  %v5445_v0 = vunpack.i.h.bf16 %v5443_v49  ;;  %v5444_v44 = vunpack.i.l.bf16 %v5443_v49 }
 0x98b   : > { %5035 = vmatprep.subr.bf16.mxu1 %v5034_v60  ;;  %3557 = vmatprep.mubr.f32.mxu0 %v8898_v8 }
 0x98c   : > { %v2795_v45 = vsel %vm1028_vm12, %v5440_v26, %v5434_v24  ;;  %v2793_v41 = vsel %vm1028_vm12, %v5439_v19, %v5429_v32  ;;  %v3632_v30 = vsel %vm2075_vm1, %v5444_v44, %v5445_v0  ;;  %v4965_v24 = vld [vmem:[%s8458_s4 + $0x118] sm:$0xff] }
 0x98d   : > { %v5453_v46 = vpop.permute.xlu0 %5452  ;;  %v5448_v27 = vpop.permute.xlu1 %5447  ;;  %v5036_v54 = vpack.c.bf16 %v2795_v45, %v2793_v41 }
 0x98e   : > { %v5455_v1 = vunpack.i.h.bf16 %v5453_v46  ;;  %v5454_v42 = vunpack.i.l.bf16 %v5453_v46  ;;  %v5450_v39 = vunpack.i.h.bf16 %v5448_v27  ;;  %v5449_v50 = vunpack.i.l.bf16 %v5448_v27  ;;  %4960 = vmatmul.mubr.msk.f32.gmra.mrb[4].mxu0 %vm1576_vm8, %v4956_v29 }
 0x98f   : > { %5037 = vmatpush1.bf16.msra.mxu1 %v5036_v54  ;;  %3563 = vmatprep.mubr.f32.mxu0 %v8898_v8 }
 0x990   : > { %v3631_v48 = vsel %vm2075_vm1, %v5454_v42, %v5444_v44  ;;  %v3633_v20 = vsel %vm2075_vm1, %v5455_v1, %v5449_v50  ;;  %5078 = vmatprep.subr.bf16.mxu1 %v7569_v17  ;;  %v3634_v10 = vsel %vm2075_vm1, %v5449_v50, %v5450_v39  ;;  %v4923_v17 = vld [vmem:[%s8458_s4 + $0x68] sm:$0xff] }
 0x991   : > { %v5463_v22 = vpop.permute.xlu0 %5462  ;;  %v5458_v55 = vpop.permute.xlu1 %5457  ;;  %v5070_v37 = vpack.c.bf16 %v3634_v10, %v3632_v30  ;;  %v5072_v56 = vpack.c.bf16 %v3633_v20, %v3631_v48 }
 0x992   : > { %v5465_v6 = vunpack.i.h.bf16 %v5463_v22  ;;  %v5464_v18 = vunpack.i.l.bf16 %v5463_v22  ;;  %v5460_v16 = vunpack.i.h.bf16 %v5458_v55  ;;  %v5459_v40 = vunpack.i.l.bf16 %v5458_v55  ;;  %4926 = vmatmul.mubr.msk.f32.vlgmr.msra.gmra.mrb[0].mxu1 %vm1576_vm8, %v4922_v53  ;;  %4961 = vmatmul.mubr.msk.f32.gmra.mrb[6].mxu0 %vm1576_vm8, %v4957_v12 }
 0x993   : > { %5080 = vmatpush1.bf16.msra.mxu1 %v7574_v31  ;;  %5071 = vmatprep.subr.bf16.mxu0 %v5070_v37 }
 0x994   : > { %5079 = vmatprep.subr.bf16.mxu1 %v7593_v9  ;;  %5073 = vmatpush1.bf16.msra.mxu0 %v5072_v56  ;;  %v3636_v61 = vsel %vm2075_vm1, %v5459_v40, %v5460_v16  ;;  %v3638_v63 = vsel %vm2075_vm1, %v5464_v18, %v5465_v6  ;;  %v4924_v9 = vld [vmem:[%s8458_s4 + $0x70] sm:$0xff] }
 0x995   : > { %v5468_v43 = vpop.permute.xlu1 %5467  ;;  %2887 = vmatprep.mubr.f32.mxu1 %v8898_v8  ;;  %v5074_v4 = vpack.c.bf16 %v3638_v63, %v3636_v61  ;;  %3723 = vmatprep.mubr.f32.mxu0 %v8898_v8 }
 0x996   : > { %v5470_v34 = vunpack.i.h.bf16 %v5468_v43  ;;  %v5469_v31 = vunpack.i.l.bf16 %v5468_v43  ;;  %4927 = vmatmul.mubr.msk.f32.gmra.mrb[2].mxu1 %vm1576_vm8, %v4923_v17 }
 0x997   : > { %5081 = vmatpush1.bf16.msra.mxu1 %v7615_v51  ;;  %5075 = vmatprep.subr.bf16.mxu0 %v5074_v4  ;;  %v4925_v51 = vld [vmem:[%s8458_s4 + $0x78] sm:$0xff] }
 0x998   : > { %v3637_v15 = vsel %vm2075_vm1, %v5470_v34, %v5464_v18  ;;  %v3635_v33 = vsel %vm2075_vm1, %v5469_v31, %v5459_v40  ;;  %2893 = vmatprep.mubr.f32.mxu1 %v8898_v8 }
 0x999   : > { %v5076_v23 = vpack.c.bf16 %v3637_v15, %v3635_v33 }
 0x99a   : > { %4928 = vmatmul.mubr.msk.f32.gmra.mrb[4].mxu1 %vm1576_vm8, %v4924_v9 }
 0x99b   : > { %5077 = vmatpush1.bf16.msra.mxu0 %v5076_v23  ;;  %2899 = vmatprep.mubr.f32.mxu1 %v8898_v8 }
 0x99e   : > { %4929 = vmatmul.mubr.msk.f32.gmra.mrb[6].mxu1 %vm1576_vm8, %v4925_v51  ;;  %4966 = vmatmul.mubr.msk.f32.vlgmr.msra.gmra.mrb[0].mxu0 %vm1576_vm8, %v4962_v5 }
 0x99f   : > { %3047 = vmatprep.mubr.f32.mxu1 %v8898_v8  ;;  %3729 = vmatprep.mubr.f32.mxu0 %v8898_v8 }
 0x9a2   : > { %4936 = vmatmul.mubr.msk.f32.vlgmr.msra.gmra.mrb[4].mxu1 %vm1576_vm8, %v4932_v14  ;;  %4967 = vmatmul.mubr.msk.f32.gmra.mrb[2].mxu0 %vm1576_vm8, %v4963_v47  ;;  %v3763_v49 = vpop.permute.xlu0 %3762 }
 0x9a3   : > { %3053 = vmatprep.mubr.f32.mxu1 %v8898_v8  ;;  %3735 = vmatprep.mubr.f32.mxu0 %v8898_v8 }
 0x9a6   : > { %4937 = vmatmul.mubr.msk.f32.gmra.mrb[6].mxu1 %vm1576_vm8, %v4933_v58  ;;  %4968 = vmatmul.mubr.msk.f32.gmra.mrb[4].mxu0 %vm1576_vm8, %v4964_v36  ;;  %v3768_v19 = vpop.permute.xlu1 %3767  ;;  %v3773_v42 = vpop.permute.xlu0 %3772 }
 0x9a7   : > { %3741 = vmatprep.mubr.f32.mxu0 %v8898_v8 }
 0x9aa   : > { %4969 = vmatmul.mubr.msk.f32.gmra.mrb[6].mxu0 %vm1576_vm8, %v4965_v24  ;;  %v3778_v22 = vpop.permute.xlu1 %3777  ;;  %v7888_v43 = vpop.permute.xlu0 %3858 }
 0x9ae   : > { %v7891_v34 = vpop.permute.xlu1 %3863  ;;  %v7896_v33 = vpop.permute.xlu0 %3868 }
 0x9b2   : > { %v7898_v23 = vpop.permute.xlu1 %3873  ;;  %v3900_v51 = vpop.permute.xlu0 %3899 }
 0x9b6   : > { %v7900_v5 = vpop.permute.xlu1 %3904  ;;  %v7902_v14 = vpop.permute.xlu0 %3909 }
 0x9ba   : > { %v7904_v47 = vpop.permute.xlu1 %3914  ;;  %v7906_v58 = vpop.permute.xlu0 %4008 }
 0x9be   : > { %v7908_v36 = vpop.permute.xlu1 %4013  ;;  %v7910_v24 = vpop.permute.xlu0 %4018 }
 0xa65   : > { %v2883_v59 = vpop.f32.mrb[0].mxu1 }
 0xa66   : > { %v2885_v32 = vpop.f32.mrb[1].mxu1 }
 0xa69   : > { %v2889_v21 = vpop.f32.mrb[2].mxu1 }
 0xa6a   : > { %v2891_v57 = vpop.f32.mrb[3].mxu1 }
 0xa71   : > { %v3725_v13 = vpop.f32.mrb[0].mxu0 }
 0xa72   : > { %v5082_v2 = vadd.f32 %v3725_v13, %v2883_v59  ;;  %v3727_v60 = vpop.f32.mrb[1].mxu0  ;;  %v7912_v59 = vpop.permute.xlu1 %4023 }
 0xa73   : > { %v5083_v26 = vadd.f32 %v3727_v60, %v2885_v32  ;;  %v7914_v32 = vpop.permute.xlu0 %4117 }
 0xa74   : > { %v3780_v29 = vadd.f32 %v5082_v2, %v3763_v49 }
 0xa75   : > { %v3781_v0 = vadd.f32 %v5083_v26, %v3763_v49  ;;  %v3049_v44 = vpop.f32.mrb[4].mxu1  ;;  %v3731_v8 = vpop.f32.mrb[2].mxu0 }
 0xa76   : > { %v3788_v45 = vmax.f32 %v3780_v29, 0.0  ;;  %v5084_v41 = vadd.f32 %v3731_v8, %v2889_v21  ;;  %v3051_v46 = vpop.f32.mrb[5].mxu1  ;;  %v3733_v27 = vpop.f32.mrb[3].mxu0 }
 0xa77   : > { %v3789_v54 = vmax.f32 %v3781_v0, 0.0  ;;  %v5085_v1 = vadd.f32 %v3733_v27, %v2891_v57  ;;  %v7916_v21 = vpop.permute.xlu1 %4122  ;;  %v7918_v57 = vpop.permute.xlu0 %4127 }
 0xa78   : > { %v3782_v39 = vadd.f32 %v5084_v41, %v3768_v19  ;;  %3804 = vrot.lane.b32.xlu0 %v3788_v45, %s5489_s17 }
 0xa79   : > { %v3783_v50 = vadd.f32 %v5085_v1, %v3768_v19  ;;  %v3737_v53 = vpop.f32.mrb[4].mxu0  ;;  %3806 = vrot.lane.b32.xlu1 %v3789_v54, %s5489_s17  ;;  %v3055_v12 = vpop.f32.mrb[6].mxu1 }
 0xa7a   : > { %v3790_v48 = vmax.f32 %v3782_v39, 0.0  ;;  %v5086_v20 = vadd.f32 %v3737_v53, %v3049_v44  ;;  %v3057_v30 = vpop.f32.mrb[7].mxu1  ;;  %v3739_v10 = vpop.f32.mrb[5].mxu0 }
 0xa7b   : > { %v3791_v55 = vmax.f32 %v3783_v50, 0.0  ;;  %v5087_v37 = vadd.f32 %v3739_v10, %v3051_v46  ;;  %v7920_v13 = vpop.permute.xlu1 %4132  ;;  %v4215_v49 = vpop.permute.xlu0 %4214 }
 0xa7c   : > { %v3784_v56 = vadd.f32 %v5086_v20, %v3773_v42  ;;  %3808 = vrot.lane.b32.xlu0 %v3790_v48, %s5489_s17 }
 0xa7d   : > { %v3785_v6 = vadd.f32 %v5087_v37, %v3773_v42  ;;  %v3743_v18 = vpop.f32.mrb[6].mxu0  ;;  %3810 = vrot.lane.b32.xlu1 %v3791_v55, %s5489_s17 }
 0xa7e   : > { %v3792_v16 = vmax.f32 %v3784_v56, 0.0  ;;  %v5088_v40 = vadd.f32 %v3743_v18, %v3055_v12  ;;  %v3745_v17 = vpop.f32.mrb[7].mxu0 }
 0xa7f   : > { %v3793_v61 = vmax.f32 %v3785_v6, 0.0  ;;  %v5089_v63 = vadd.f32 %v3745_v17, %v3057_v30  ;;  %v7922_v2 = vpop.permute.xlu1 %4219  ;;  %v7924_v60 = vpop.permute.xlu0 %4224 }
 0xa80   : > { %v3786_v4 = vadd.f32 %v5088_v40, %v3778_v22  ;;  %3812 = vrot.lane.b32.xlu0 %v3792_v16, %s5489_s17 }
 0xa81   : > { %v3787_v31 = vadd.f32 %v5089_v63, %v3778_v22  ;;  %3814 = vrot.lane.b32.xlu1 %v3793_v61, %s5489_s17 }
 0xa82   : > { %v3794_v9 = vmax.f32 %v3786_v4, 0.0 }
 0xa83   : > { %v3795_v15 = vmax.f32 %v3787_v31, 0.0  ;;  %v7926_v26 = vpop.permute.xlu1 %4229  ;;  %v7928_v19 = vpop.permute.xlu0 %4328 }
 0xa84   : > { %3816 = vrot.lane.b32.xlu0 %v3794_v9, %s5489_s17 }
 0xa85   : > { %3818 = vrot.lane.b32.xlu1 %v3795_v15, %s5489_s17  ;;  %v8902_v15 = vld [vmem:[#allocation42_spill] sm:$0xff] }
 0xa87   : > { %v7930_v29 = vpop.permute.xlu1 %4323  ;;  %v7932_v0 = vpop.permute.xlu0 %4432 }
 0xa8b   : > { %v7934_v44 = vpop.permute.xlu1 %4333  ;;  %v7936_v8 = vpop.permute.xlu0 %4338 }
 0xa8f   : > { %v7938_v45 = vpop.permute.xlu1 %4437  ;;  %v7940_v41 = vpop.permute.xlu0 %4529 }
 0xa93   : > { %v7942_v46 = vpop.permute.xlu1 %4442  ;;  %v7944_v27 = vpop.permute.xlu0 %4447 }
 0xa97   : > { %v7946_v54 = vpop.permute.xlu1 %4534  ;;  %v7948_v1 = vpop.permute.xlu0 %4638 }
 0xa9b   : > { %v7950_v42 = vpop.permute.xlu1 %4539  ;;  %v7952_v39 = vpop.permute.xlu0 %4544 }
 0xa9f   : > { %v7954_v50 = vpop.permute.xlu1 %4643  ;;  %v7956_v53 = vpop.permute.xlu0 %4653 }
 0xaa3   : > { %v7958_v12 = vpop.permute.xlu1 %4648 }
 0xaea   : > { %v3805_v48 = vpop.permute.xlu0 %3804 }
 0xaeb   : > { %v7961_v20 = vsel %vm373_vm2, 0.0, %v3805_v48  ;;  %v3807_v30 = vpop.permute.xlu1 %3806 }
 0xaec   : > { %v7964_v10 = vsel %vm373_vm2, %v3805_v48, %v3807_v30  ;;  %v3917_v22 = vmul.f32 %v3900_v51, %v7961_v20  ;;  %v4232_v37 = vmul.f32 %v4215_v49, %v7961_v20  ;;  %v7972_v56 = vsel %vm373_vm2, %v3807_v30, 0.0 }
 0xaed   : > { %v3918_v55 = vmul.f32 %v3900_v51, %v7964_v10  ;;  %v4233_v6 = vmul.f32 %v4215_v49, %v7964_v10  ;;  %v4309_v18 = vmul.f32 %v8867_v62, %v7961_v20  ;;  %v3919_v16 = vmul.f32 %v3900_v51, %v7972_v56 }
 0xaee   : > { %3941 = vrot.lane.b32.xlu0 %v3917_v22, %s5492_s21  ;;  %v4418_v17 = vmul.f32 %v8870_v11, %v7961_v20  ;;  %v4234_v61 = vmul.f32 %v4215_v49, %v7972_v56  ;;  %v3994_v63 = vmul.f32 %v8846_v28, %v7961_v20  ;;  %v3995_v31 = vmul.f32 %v7964_v10, %v8843_v35  ;;  %v8903_v49 = vld [vmem:[#allocation44_spill] sm:$0xff] }
 0xaef   : > { %3943 = vrot.lane.b32.xlu1 %v3918_v55, %s5492_s21  ;;  %v4341_v40 = vmul.f32 %v7930_v29, %v4309_v18  ;;  %v4103_v51 = vmul.f32 %v8902_v15, %v7961_v20  ;;  %v4104_v30 = vmul.f32 %v7964_v10, %v8903_v49  ;;  %v3996_v55 = vmul.f32 %v8844_v25, %v7972_v56 }
 0xaf0   : > { %v4450_v4 = vmul.f32 %v7932_v0, %v4418_v17  ;;  %v4026_v9 = vmul.f32 %v7906_v58, %v3994_v63  ;;  %v4027_v48 = vmul.f32 %v7906_v58, %v3995_v31  ;;  %v3809_v63 = vpop.permute.xlu0 %3808  ;;  %v4310_v31 = vmul.f32 %v7964_v10, %v8863_v7 }
 0xaf1   : > { %v4135_v22 = vmul.f32 %v7914_v32, %v4103_v51  ;;  %v4028_v18 = vmul.f32 %v7906_v58, %v3996_v55 }
 0xaf2   : > { %4256 = vrot.lane.b32.xlu0 %v4232_v37, %s5496_s23  ;;  %v4136_v37 = vmul.f32 %v7914_v32, %v4104_v30  ;;  %v4342_v51 = vmul.f32 %v7930_v29, %v4310_v31  ;;  %v3811_v30 = vpop.permute.xlu1 %3810 }
 0xaf3   : > { %4258 = vrot.lane.b32.xlu1 %v4233_v6, %s5496_s23  ;;  %v4311_v6 = vmul.f32 %v8866_v3, %v7972_v56  ;;  %v8035_v55 = vsel %vm373_vm2, %v3809_v63, %v3811_v30 }
 0xaf5   : > { %v4343_v17 = vmul.f32 %v7930_v29, %v4311_v6  ;;  %v8040_v29 = vsel %vm373_vm2, %v3811_v30, 0.0  ;;  %v3921_v6 = vmul.f32 %v7900_v5, %v8035_v55  ;;  %v4107_v30 = vmul.f32 %v8035_v55, %v8903_v49 }
 0xaf6   : > { %3945 = vrot.lane.b32.xlu0 %v3919_v16, %s5492_s21  ;;  %v8904_v16 = vld [vmem:[#allocation41_spill] sm:$0xff] }
 0xaf7   : > { %4365 = vrot.lane.b32.xlu1 %v4341_v40, %s5498_s13  ;;  %v4105_v40 = vmul.f32 %v8904_v16, %v7972_v56 }
 0xafa   : > { %4260 = vrot.lane.b32.xlu0 %v4234_v61, %s5496_s23  ;;  %v4420_v61 = vmul.f32 %v8869_v52, %v7972_v56 }
 0xafb   : > { %4474 = vrot.lane.b32.xlu1 %v4450_v4, %s5500_s27  ;;  %v4137_v4 = vmul.f32 %v7914_v32, %v4105_v40 }
 0xafc   : > { %v4452_v58 = vmul.f32 %v7932_v0, %v4420_v61 }
 0xafe   : > { %4050 = vrot.lane.b32.xlu0 %v4026_v9, %s5493_s22  ;;  %v8022_v9 = vsel %vm373_vm2, 0.0, %v3809_v63 }
 0xaff   : > { %4052 = vrot.lane.b32.xlu1 %v4027_v48, %s5493_s22  ;;  %v4419_v48 = vmul.f32 %v7964_v10, %v8868_v38  ;;  %v3920_v32 = vmul.f32 %v7900_v5, %v8022_v9  ;;  %v4312_v40 = vmul.f32 %v8867_v62, %v8022_v9  ;;  %v3997_v61 = vmul.f32 %v8846_v28, %v8022_v9 }
 0xb00   : > { %v4421_v63 = vmul.f32 %v8870_v11, %v8022_v9  ;;  %v4106_v31 = vmul.f32 %v8902_v15, %v8022_v9 }
 0xb02   : > { %4159 = vrot.lane.b32.xlu0 %v4135_v22, %s5495_s11  ;;  %v4451_v22 = vmul.f32 %v7932_v0, %v4419_v48  ;;  %v4236_v0 = vmul.f32 %v7922_v2, %v8035_v55  ;;  %v3999_v48 = vmul.f32 %v8844_v25, %v8040_v29 }
 0xb03   : > { %4161 = vrot.lane.b32.xlu1 %v4136_v37, %s5495_s11  ;;  %v4235_v37 = vmul.f32 %v7922_v2, %v8022_v9 }
 0xb06   : > { %4054 = vrot.lane.b32.xlu0 %v4028_v18, %s5493_s22  ;;  %v3922_v18 = vmul.f32 %v7900_v5, %v8040_v29  ;;  %v4344_v5 = vmul.f32 %v7928_v19, %v4312_v40  ;;  %v4313_v40 = vmul.f32 %v8035_v55, %v8863_v7 }
 0xb07   : > { %4369 = vrot.lane.b32.xlu1 %v4343_v17, %s5498_s13  ;;  %v4237_v17 = vmul.f32 %v7922_v2, %v8040_v29  ;;  %v4453_v2 = vmul.f32 %v7938_v45, %v4421_v63  ;;  %v3813_v63 = vpop.permute.xlu0 %3812 }
 0xb0a   : > { %4163 = vrot.lane.b32.xlu0 %v4137_v4, %s5495_s11  ;;  %v4029_v4 = vmul.f32 %v7908_v36, %v3997_v61  ;;  %v4345_v61 = vmul.f32 %v7928_v19, %v4313_v40 }
 0xb0b   : > { %4478 = vrot.lane.b32.xlu1 %v4452_v58, %s5500_s27  ;;  %v3998_v58 = vmul.f32 %v8035_v55, %v8843_v35 }
 0xb0e   : > { %4367 = vrot.lane.b32.xlu0 %v4342_v51, %s5498_s13  ;;  %v4138_v51 = vmul.f32 %v7916_v21, %v4106_v31  ;;  %v8102_v31 = vsel %vm373_vm2, 0.0, %v3813_v63 }
 0xb0f   : > { %3947 = vrot.lane.b32.xlu1 %v3920_v32, %s5492_s21  ;;  %v4030_v32 = vmul.f32 %v7908_v36, %v3998_v58 }
 0xb12   : > { %4476 = vrot.lane.b32.xlu0 %v4451_v22, %s5500_s27  ;;  %v4031_v22 = vmul.f32 %v7908_v36, %v3999_v48 }
 0xb13   : > { %4262 = vrot.lane.b32.xlu1 %v4235_v37, %s5496_s23  ;;  %v4108_v37 = vmul.f32 %v8904_v16, %v8040_v29 }
 0xb16   : > { %3949 = vrot.lane.b32.xlu0 %v3921_v6, %s5492_s21  ;;  %v4139_v6 = vmul.f32 %v7916_v21, %v4107_v30 }
 0xb17   : > { %3951 = vrot.lane.b32.xlu1 %v3922_v18, %s5492_s21  ;;  %v4314_v18 = vmul.f32 %v8866_v3, %v8040_v29 }
 0xb19   : > { %v4346_v36 = vmul.f32 %v7928_v19, %v4314_v18  ;;  %v3923_v19 = vmul.f32 %v7902_v14, %v8102_v31 }
 0xb1a   : > { %4264 = vrot.lane.b32.xlu0 %v4236_v0, %s5496_s23  ;;  %v4140_v0 = vmul.f32 %v7916_v21, %v4108_v37  ;;  %v3815_v21 = vpop.permute.xlu1 %3814 }
 0xb1b   : > { %4266 = vrot.lane.b32.xlu1 %v4237_v17, %s5496_s23  ;;  %v4423_v17 = vmul.f32 %v8869_v52, %v8040_v29  ;;  %v8106_v58 = vsel %vm373_vm2, %v3813_v63, %v3815_v21  ;;  %v8119_v48 = vsel %vm373_vm2, %v3815_v21, 0.0  ;;  %v4315_v21 = vmul.f32 %v8867_v62, %v8102_v31 }
 0xb1c   : > { %v4001_v30 = vmul.f32 %v8106_v58, %v8843_v35  ;;  %v4240_v18 = vmul.f32 %v7924_v60, %v8119_v48 }
 0xb1e   : > { %4371 = vrot.lane.b32.xlu0 %v4344_v5, %s5498_s13  ;;  %v4422_v5 = vmul.f32 %v8035_v55, %v8868_v38  ;;  %v4033_v37 = vmul.f32 %v7910_v24, %v4001_v30 }
 0xb1f   : > { %4056 = vrot.lane.b32.xlu1 %v4029_v4, %s5493_s22  ;;  %v4455_v4 = vmul.f32 %v7938_v45, %v4423_v17  ;;  %v4109_v17 = vmul.f32 %v8902_v15, %v8102_v31 }
 0xb21   : > { %v4141_v63 = vmul.f32 %v7918_v57, %v4109_v17 }
 0xb22   : > { %4480 = vrot.lane.b32.xlu0 %v4453_v2, %s5500_s27  ;;  %v4454_v2 = vmul.f32 %v7938_v45, %v4422_v5  ;;  %v4238_v45 = vmul.f32 %v7924_v60, %v8102_v31  ;;  %v3817_v5 = vpop.permute.xlu0 %3816 }
 0xb23   : > { %4165 = vrot.lane.b32.xlu1 %v4138_v51, %s5495_s11  ;;  %v3924_v51 = vmul.f32 %v7902_v14, %v8106_v58 }
 0xb26   : > { %4058 = vrot.lane.b32.xlu0 %v4030_v32, %s5493_s22  ;;  %v4239_v32 = vmul.f32 %v7924_v60, %v8106_v58  ;;  %v4425_v60 = vmul.f32 %v8106_v58, %v8868_v38 }
 0xb27   : > { %4060 = vrot.lane.b32.xlu1 %v4031_v22, %s5493_s22  ;;  %v3925_v22 = vmul.f32 %v7902_v14, %v8119_v48  ;;  %v4316_v14 = vmul.f32 %v8106_v58, %v8863_v7 }
 0xb2a   : > { %4167 = vrot.lane.b32.xlu0 %v4139_v6, %s5495_s11  ;;  %v4110_v6 = vmul.f32 %v8106_v58, %v8903_v49 }
 0xb2b   : > { %4169 = vrot.lane.b32.xlu1 %v4140_v0, %s5495_s11  ;;  %v4000_v0 = vmul.f32 %v8846_v28, %v8102_v31 }
 0xb2c   : > { %v4142_v40 = vmul.f32 %v7918_v57, %v4110_v6 }
 0xb2e   : > { %4375 = vrot.lane.b32.xlu0 %v4346_v36, %s5498_s13  ;;  %v4032_v36 = vmul.f32 %v7910_v24, %v4000_v0  ;;  %v4111_v0 = vmul.f32 %v8904_v16, %v8119_v48 }
 0xb2f   : > { %4373 = vrot.lane.b32.xlu1 %v4345_v61, %s5498_s13  ;;  %v4348_v61 = vmul.f32 %v7934_v44, %v4316_v14 }
 0xb30   : > { %v4143_v14 = vmul.f32 %v7918_v57, %v4111_v0 }
 0xb32   : > { %4484 = vrot.lane.b32.xlu0 %v4455_v4, %s5500_s27  ;;  %v4457_v4 = vmul.f32 %v7942_v46, %v4425_v60 }
 0xb33   : > { %4482 = vrot.lane.b32.xlu1 %v4454_v2, %s5500_s27  ;;  %v8156_v2 = vsel %vm373_vm2, 0.0, %v3817_v5 }
 0xb36   : > { %3953 = vrot.lane.b32.xlu0 %v3923_v19, %s5492_s21  ;;  %v4347_v19 = vmul.f32 %v7934_v44, %v4315_v21 }
 0xb37   : > { %3955 = vrot.lane.b32.xlu1 %v3924_v51, %s5492_s21  ;;  %v4424_v51 = vmul.f32 %v8870_v11, %v8102_v31 }
 0xb39   : > { %v4456_v30 = vmul.f32 %v7942_v46, %v4424_v51 }
 0xb3a   : > { %4268 = vrot.lane.b32.xlu0 %v4238_v45, %s5496_s23  ;;  %v3926_v45 = vmul.f32 %v7904_v47, %v8156_v2 }
 0xb3b   : > { %4270 = vrot.lane.b32.xlu1 %v4239_v32, %s5496_s23  ;;  %v3819_v32 = vpop.permute.xlu1 %3818 }
 0xb3c   : > { %v8173_v6 = vsel %vm373_vm2, %v3819_v32, 0.0  ;;  %v8195_v60 = vsel %vm373_vm2, %v3817_v5, %v3819_v32 }
 0xb3d   : > { %v4243_v17 = vmul.f32 %v7926_v26, %v8173_v6 }
 0xb3e   : > { %3957 = vrot.lane.b32.xlu0 %v3925_v22, %s5492_s21  ;;  %v4002_v22 = vmul.f32 %v8844_v25, %v8119_v48 }
 0xb3f   : > { %4064 = vrot.lane.b32.xlu1 %v4033_v37, %s5493_s22  ;;  %v4241_v37 = vmul.f32 %v7926_v26, %v8156_v2 }
 0xb42   : > { %4272 = vrot.lane.b32.xlu0 %v4240_v18, %s5496_s23  ;;  %v4034_v18 = vmul.f32 %v7910_v24, %v4002_v22  ;;  %v4003_v24 = vmul.f32 %v8846_v28, %v8156_v2  ;;  %v4242_v22 = vmul.f32 %v7926_v26, %v8195_v60 }
 0xb43   : > { %4173 = vrot.lane.b32.xlu1 %v4142_v40, %s5495_s11  ;;  %v3928_v40 = vmul.f32 %v7904_v47, %v8173_v6 }
 0xb44   : > { %v4035_v57 = vmul.f32 %v7912_v59, %v4003_v24 }
 0xb46   : > { %4062 = vrot.lane.b32.xlu0 %v4032_v36, %s5493_s22  ;;  %v4317_v36 = vmul.f32 %v8866_v3, %v8119_v48 }
 0xb47   : > { %4379 = vrot.lane.b32.xlu1 %v4348_v61, %s5498_s13 }
 0xb48   : > { %v4349_v61 = vmul.f32 %v7934_v44, %v4317_v36 }
 0xb4a   : > { %4171 = vrot.lane.b32.xlu0 %v4141_v63, %s5495_s11  ;;  %v8905_v63 = vld [vmem:[#allocation29_spill] sm:$0xff] }
 0xb4b   : > { %4488 = vrot.lane.b32.xlu1 %v4457_v4, %s5500_s27  ;;  %v3848_v21 = vmul.f32 %v8905_v63, %v7961_v20  ;;  %v4112_v4 = vmul.f32 %v8902_v15, %v8156_v2 }
 0xb4d   : > { %v3876_v44 = vmul.f32 %v7888_v43, %v3848_v21  ;;  %v4144_v51 = vmul.f32 %v7920_v13, %v4112_v4 }
 0xb4e   : > { %4377 = vrot.lane.b32.xlu0 %v4347_v19, %s5498_s13  ;;  %v3927_v19 = vmul.f32 %v7904_v47, %v8195_v60  ;;  %v8906_v47 = vld [vmem:[#allocation30_spill] sm:$0xff] }
 0xb4f   : > { %3959 = vrot.lane.b32.xlu1 %v3926_v45, %s5492_s21  ;;  %v4318_v45 = vmul.f32 %v8867_v62, %v8156_v2 }
 0xb51   : > { %v4350_v62 = vmul.f32 %v7936_v8, %v4318_v45 }
 0xb52   : > { %4486 = vrot.lane.b32.xlu0 %v4456_v30, %s5500_s27 }
 0xb53   : > { %4274 = vrot.lane.b32.xlu1 %v4241_v37, %s5496_s23  ;;  %v3849_v37 = vmul.f32 %v8906_v47, %v7964_v10 }
 0xb55   : > { %v3877_v26 = vmul.f32 %v7888_v43, %v3849_v37  ;;  %v4547_v37 = vmul.f32 %v7940_v41, %v7961_v20 }
 0xb56   : > { %4066 = vrot.lane.b32.xlu0 %v4034_v18, %s5493_s22  ;;  %v4004_v18 = vmul.f32 %v8195_v60, %v8843_v35  ;;  %v4113_v35 = vmul.f32 %v8195_v60, %v8903_v49 }
 0xb57   : > { %3963 = vrot.lane.b32.xlu1 %v3928_v40, %s5492_s21  ;;  %v4005_v40 = vmul.f32 %v8844_v25, %v8173_v6  ;;  %v4114_v25 = vmul.f32 %v8904_v16, %v8173_v6 }
 0xb58   : > { %v4145_v4 = vmul.f32 %v7920_v13, %v4113_v35  ;;  %v4550_v35 = vmul.f32 %v7946_v54, %v8022_v9 }
 0xb5a   : > { %4175 = vrot.lane.b32.xlu0 %v4143_v14, %s5495_s11 }
 0xb5b   : > { %4278 = vrot.lane.b32.xlu1 %v4243_v17, %s5496_s23  ;;  %v4036_v17 = vmul.f32 %v7912_v59, %v4004_v18 }
 0xb5e   : > { %4381 = vrot.lane.b32.xlu0 %v4349_v61, %s5498_s13 }
 0xb5f   : > { %4068 = vrot.lane.b32.xlu1 %v4035_v57, %s5493_s22  ;;  %v4037_v57 = vmul.f32 %v7912_v59, %v4005_v40  ;;  %v4320_v59 = vmul.f32 %v8866_v3, %v8173_v6 }
 0xb60   : > { %v3942_v28 = vpop.permute.xlu0 %3941 }
 0xb61   : > { %v3944_v5 = vpop.permute.xlu1 %3943 }
 0xb62   : > { %v3965_v32 = vsel %vm577_vm10, %v3942_v28, %v3944_v5  ;;  %3961 = vrot.lane.b32.xlu0 %v3927_v19, %s5492_s21  ;;  %v4319_v28 = vmul.f32 %v8195_v60, %v8863_v7  ;;  %v4352_v7 = vmul.f32 %v7936_v8, %v4320_v59 }
 0xb63   : > { %v3981_v15 = vadd.f32 %v3965_v32, %v3876_v44  ;;  %4177 = vrot.lane.b32.xlu1 %v4144_v51, %s5495_s11  ;;  %v4146_v44 = vmul.f32 %v7920_v13, %v4114_v25  ;;  %v4426_v51 = vmul.f32 %v8869_v52, %v8119_v48  ;;  %v4551_v25 = vmul.f32 %v7946_v54, %v8035_v55 }
 0xb64   : > { %v4257_v30 = vpop.permute.xlu0 %4256 }
 0xb65   : > { %v4259_v0 = vpop.permute.xlu1 %4258 }
 0xb66   : > { %v4280_v14 = vsel %vm1229_vm13, %v4257_v30, %v4259_v0  ;;  %4276 = vrot.lane.b32.xlu0 %v4242_v22, %s5496_s23  ;;  %v4458_v30 = vmul.f32 %v7942_v46, %v4426_v51  ;;  %v4549_v46 = vmul.f32 %v7940_v41, %v7972_v56 }
 0xb67   : > { %4383 = vrot.lane.b32.xlu1 %v4350_v62, %s5498_s13 }
 0xb68   : > { %v3946_v36 = vpop.permute.xlu0 %3945 }
 0xb69   : > { %v3966_v24 = vsel %vm577_vm10, %v3944_v5, %v3946_v36  ;;  %v4366_v61 = vpop.permute.xlu1 %4365  ;;  %v4351_v5 = vmul.f32 %v7936_v8, %v4319_v28  ;;  %v4428_v28 = vmul.f32 %v8195_v60, %v8868_v38  ;;  %v3850_v38 = vmul.f32 %v8905_v63, %v8022_v9 }
 0xb6a   : > { %v3982_v21 = vadd.f32 %v3966_v24, %v3877_v26  ;;  %4070 = vrot.lane.b32.xlu0 %v4036_v17, %s5493_s22 }
 0xb6b   : > { %4072 = vrot.lane.b32.xlu1 %v4037_v57, %s5493_s22  ;;  %s319_s22 = scalar_lea.vmem %s8462_s8, %s5571_s7 }
 0xb6c   : > { %v4261_v43 = vpop.permute.xlu0 %4260 }
 0xb6d   : > { %v4281_v49 = vsel %vm1229_vm13, %v4259_v0, %v4261_v43  ;;  %v4475_v19 = vpop.permute.xlu1 %4474  ;;  %v4427_v43 = vmul.f32 %v8870_v11, %v8156_v2 }
 0xb6e   : > { %4179 = vrot.lane.b32.xlu0 %v4145_v4, %s5495_s11  ;;  %v4552_v4 = vmul.f32 %v7946_v54, %v8040_v29 }
 0xb6f   : > { %4181 = vrot.lane.b32.xlu1 %v4146_v44, %s5495_s11  ;;  %v4459_v11 = vmul.f32 %v7944_v27, %v4427_v43 }
 0xb70   : > { %v4051_v16 = vpop.permute.xlu0 %4050 }
 0xb71   : > { %v4053_v45 = vpop.permute.xlu1 %4052 }
 0xb72   : > { %v4074_v32 = vsel %vm801_vm11, %v4051_v16, %v4053_v45  ;;  %4385 = vrot.lane.b32.xlu0 %v4351_v5, %s5498_s13  ;;  %v4429_v5 = vmul.f32 %v8869_v52, %v8173_v6  ;;  %v3851_v52 = vmul.f32 %v8906_v47, %v8035_v55 }
 0xb73   : > { %v4090_v13 = vadd.f32 %v4074_v32, %v3981_v15  ;;  %4387 = vrot.lane.b32.xlu1 %v4352_v7, %s5498_s13  ;;  %v4548_v15 = vmul.f32 %v7940_v41, %v7964_v10 }
 0xb74   : > { %v4160_v3 = vpop.permute.xlu0 %4159 }
 0xb75   : > { %v4162_v22 = vpop.permute.xlu1 %4161 }
 0xb76   : > { %v4183_v18 = vsel %vm1028_vm12, %v4160_v3, %v4162_v22  ;;  %4490 = vrot.lane.b32.xlu0 %v4458_v30, %s5500_s27 }
 0xb77   : > { %v4199_v0 = vadd.f32 %v4183_v18, %v4090_v13  ;;  %4571 = vrot.lane.b32.xlu1 %v4547_v37, %s5501_s15  ;;  %v4461_v13 = vmul.f32 %v7944_v27, %v4429_v5 }
 0xb78   : > { %v4055_v8 = vpop.permute.xlu0 %4054 }
 0xb79   : > { %v4075_v62 = vsel %vm801_vm11, %v4053_v45, %v4055_v8  ;;  %v4370_v40 = vpop.permute.xlu1 %4369  ;;  %v4296_v26 = vadd.f32 %v4280_v14, %v4199_v0  ;;  %v4554_v8 = vmul.f32 %v7950_v42, %v8106_v58 }
 0xb7a   : > { %v4091_v36 = vadd.f32 %v4075_v62, %v3982_v21  ;;  %4573 = vrot.lane.b32.xlu0 %v4548_v15, %s5501_s15  ;;  %v8907_v15 = vld [vmem:[#allocation141_spill] sm:$0xff] }
 0xb7b   : > { %4575 = vrot.lane.b32.xlu1 %v4549_v46, %s5501_s15  ;;  %v4624_v62 = vmul.f32 %v8907_v15, %v7961_v20 }
 0xb7c   : > { %v4164_v17 = vpop.permute.xlu0 %4163 }
 0xb7d   : > { %v4184_v24 = vsel %vm1028_vm12, %v4162_v22, %v4164_v17  ;;  %v4479_v57 = vpop.permute.xlu1 %4478  ;;  %v3878_v22 = vmul.f32 %v7891_v34, %v3850_v38  ;;  %v4555_v17 = vmul.f32 %v7950_v42, %v8119_v48  ;;  %v4656_v20 = vmul.f32 %v7948_v1, %v4624_v62 }
 0xb7e   : > { %v4200_v41 = vadd.f32 %v4184_v24, %v4091_v36  ;;  %4577 = vrot.lane.b32.xlu0 %v4550_v35, %s5501_s15  ;;  %v4557_v38 = vmul.f32 %v7952_v39, %v8195_v60 }
 0xb7f   : > { %4579 = vrot.lane.b32.xlu1 %v4551_v25, %s5501_s15  ;;  %v8909_v25 = vld [vmem:[#allocation142_spill] sm:$0xff] }
 0xb80   : > { %v4368_v14 = vpop.permute.xlu0 %4367  ;;  %v4297_v21 = vadd.f32 %v4281_v49, %v4200_v41  ;;  %v4460_v49 = vmul.f32 %v7944_v27, %v4428_v28  ;;  %v3879_v27 = vmul.f32 %v7891_v34, %v3851_v52  ;;  %v8908_v34 = vld [vmem:[#allocation143_spill] sm:$0xff]  ;;  %v4626_v43 = vmul.f32 %v8909_v25, %v7972_v56 }
 0xb81   : > { %v4389_v44 = vsel %vm1439_vm14, %v4366_v61, %v4368_v14  ;;  %v4390_v59 = vsel %vm1439_vm14, %v4368_v14, %v4370_v40  ;;  %v3948_v16 = vpop.permute.xlu1 %3947  ;;  %v4625_v35 = vmul.f32 %v7964_v10, %v8908_v34  ;;  %v4627_v10 = vmul.f32 %v8907_v15, %v8022_v9 }
 0xb82   : > { %v4405_v51 = vadd.f32 %v4389_v44, %v4296_v26  ;;  %v4406_v45 = vadd.f32 %v4390_v59, %v4297_v21  ;;  %4581 = vrot.lane.b32.xlu0 %v4552_v4, %s5501_s15  ;;  %v4658_v4 = vmul.f32 %v7948_v1, %v4626_v43  ;;  %v4628_v28 = vmul.f32 %v8035_v55, %v8908_v34 }
 0xb83   : > { %4492 = vrot.lane.b32.xlu1 %v4459_v11, %s5500_s27  ;;  %v4659_v44 = vmul.f32 %v7954_v50, %v4627_v10  ;;  %v4629_v59 = vmul.f32 %v8909_v25, %v8040_v29  ;;  %v4635_v43 = vmul.f32 %v8909_v25, %v8173_v6 }
 0xb84   : > { %v4477_v54 = vpop.permute.xlu0 %4476  ;;  %v4660_v11 = vmul.f32 %v7954_v50, %v4628_v28  ;;  %v4746_v28 = vld [vmem:[#allocation2] sm:$0x1] }
 0xb85   : > { %v4498_v61 = vsel %vm1664_vm15, %v4475_v19, %v4477_v54  ;;  %v4499_v7 = vsel %vm1664_vm15, %v4477_v54, %v4479_v57  ;;  %v4263_v32 = vpop.permute.xlu1 %4262  ;;  %v4553_v19 = vmul.f32 %v7950_v42, %v8102_v31  ;;  %v4657_v42 = vmul.f32 %v7948_v1, %v4625_v35 }
 0xb86   : > { %v8292_v3 = vadd.f32 %v4498_v61, %v4405_v51  ;;  %v8294_v30 = vadd.f32 %v4499_v7, %v4406_v45  ;;  %4494 = vrot.lane.b32.xlu0 %v4460_v49, %s5500_s27  ;;  %v4661_v9 = vmul.f32 %v7954_v50, %v4629_v59  ;;  %v4556_v51 = vmul.f32 %v7952_v39, %v8156_v2 }
 0xb87   : > { %4496 = vrot.lane.b32.xlu1 %v4461_v13, %s5500_s27  ;;  %v4630_v50 = vmul.f32 %v8907_v15, %v8102_v31  ;;  %v4631_v13 = vmul.f32 %v8106_v58, %v8908_v34 }
 0xb88   : > { %v3950_v37 = vpop.permute.xlu0 %3949 }
 0xb89   : > { %v3967_v18 = vsel %vm577_vm10, %v3948_v16, %v3950_v37  ;;  %v3952_v0 = vpop.permute.xlu1 %3951  ;;  %v4663_v62 = vmul.f32 %v7958_v12, %v4631_v13 }
 0xb8a   : > { %v3983_v40 = vadd.f32 %v3967_v18, %v3878_v22  ;;  %v3968_v46 = vsel %vm577_vm10, %v3950_v37, %v3952_v0  ;;  %4583 = vrot.lane.b32.xlu0 %v4553_v19, %s5501_s15  ;;  %v4632_v0 = vmul.f32 %v8909_v25, %v8119_v48 }
 0xb8b   : > { %v3984_v26 = vadd.f32 %v3968_v46, %v3879_v27  ;;  %4585 = vrot.lane.b32.xlu1 %v4554_v8, %s5501_s15  ;;  %v4662_v27 = vmul.f32 %v7958_v12, %v4630_v50 }
 0xb8c   : > { %v4265_v36 = vpop.permute.xlu0 %4264  ;;  %v4664_v48 = vmul.f32 %v7958_v12, %v4632_v0 }
 0xb8d   : > { %v4282_v24 = vsel %vm1229_vm13, %v4263_v32, %v4265_v36  ;;  %v4267_v57 = vpop.permute.xlu1 %4266  ;;  %v4558_v32 = vmul.f32 %v7952_v39, %v8173_v6  ;;  %v4667_v6 = vmul.f32 %v7956_v53, %v4635_v43 }
 0xb8e   : > { %v4283_v41 = vsel %vm1229_vm13, %v4265_v36, %v4267_v57  ;;  %4587 = vrot.lane.b32.xlu0 %v4555_v17, %s5501_s15 }
 0xb8f   : > { %4680 = vrot.lane.b32.xlu1 %v4656_v20, %s5503_s19 }
 0xb90   : > { %v4372_v14 = vpop.permute.xlu0 %4371 }
 0xb91   : > { %v4057_v21 = vpop.permute.xlu1 %4056 }
 0xb92   : > { %4682 = vrot.lane.b32.xlu0 %v4657_v42, %s5503_s19 }
 0xb93   : > { %4684 = vrot.lane.b32.xlu1 %v4658_v4, %s5503_s19 }
 0xb94   : > { %v4481_v56 = vpop.permute.xlu0 %4480 }
 0xb95   : > { %v4166_v16 = vpop.permute.xlu1 %4165 }
 0xb96   : > { %4686 = vrot.lane.b32.xlu0 %v4659_v44, %s5503_s19  ;;  %v3853_v44 = vmul.f32 %v8906_v47, %v8106_v58 }
 0xb97   : > { %4688 = vrot.lane.b32.xlu1 %v4660_v11, %s5503_s19 }
 0xb98   : > { %v4059_v1 = vpop.permute.xlu0 %4058  ;;  %v3881_v11 = vmul.f32 %v7896_v33, %v3853_v44 }
 0xb99   : > { %v4076_v55 = vsel %vm801_vm11, %v4057_v21, %v4059_v1  ;;  %v4061_v5 = vpop.permute.xlu1 %4060 }
 0xb9a   : > { %v4092_v45 = vadd.f32 %v4076_v55, %v3983_v40  ;;  %v4077_v54 = vsel %vm801_vm11, %v4059_v1, %v4061_v5  ;;  %4690 = vrot.lane.b32.xlu0 %v4661_v9, %s5503_s19  ;;  %v4633_v40 = vmul.f32 %v8907_v15, %v8156_v2  ;;  %v3852_v15 = vmul.f32 %v8905_v63, %v8102_v31 }
 0xb9b   : > { %v4093_v29 = vadd.f32 %v4077_v54, %v3984_v26  ;;  %4589 = vrot.lane.b32.xlu1 %v4556_v51, %s5501_s15 }
 0xb9c   : > { %v4168_v49 = vpop.permute.xlu0 %4167  ;;  %v4665_v20 = vmul.f32 %v7956_v53, %v4633_v40  ;;  %v3880_v31 = vmul.f32 %v7896_v33, %v3852_v15 }
 0xb9d   : > { %v4185_v61 = vsel %vm1028_vm12, %v4166_v16, %v4168_v49  ;;  %v4170_v7 = vpop.permute.xlu1 %4169 }
 0xb9e   : > { %v4201_v52 = vadd.f32 %v4185_v61, %v4092_v45  ;;  %v4186_v22 = vsel %vm1028_vm12, %v4168_v49, %v4170_v7  ;;  %4591 = vrot.lane.b32.xlu0 %v4557_v38, %s5501_s15 }
 0xb9f   : > { %v4202_v37 = vadd.f32 %v4186_v22, %v4093_v29  ;;  %4593 = vrot.lane.b32.xlu1 %v4558_v32, %s5501_s15 }
 0xba0   : > { %v4376_v19 = vpop.permute.xlu0 %4375  ;;  %v4298_v18 = vadd.f32 %v4282_v24, %v4201_v52  ;;  %v4634_v24 = vmul.f32 %v8195_v60, %v8908_v34 }
 0xba1   : > { %v4299_v8 = vadd.f32 %v4283_v41, %v4202_v37  ;;  %v4374_v39 = vpop.permute.xlu1 %4373 }
 0xba2   : > { %v4391_v46 = vsel %vm1439_vm14, %v4372_v14, %v4374_v39  ;;  %v4392_v26 = vsel %vm1439_vm14, %v4374_v39, %v4376_v19  ;;  %4692 = vrot.lane.b32.xlu0 %v4662_v27, %s5503_s19  ;;  %v4666_v10 = vmul.f32 %v7956_v53, %v4634_v24  ;;  %v3855_v24 = vmul.f32 %v8906_v47, %v8195_v60 }
 0xba3   : > { %v4407_v36 = vadd.f32 %v4391_v46, %v4298_v18  ;;  %v4408_v17 = vadd.f32 %v4392_v26, %v4299_v8  ;;  %4694 = vrot.lane.b32.xlu1 %v4663_v62, %s5503_s19 }
 0xba4   : > { %v4485_v35 = vpop.permute.xlu0 %4484 }
 0xba5   : > { %v4483_v57 = vpop.permute.xlu1 %4482 }
 0xba6   : > { %v4500_v41 = vsel %vm1664_vm15, %v4481_v56, %v4483_v57  ;;  %v4501_v14 = vsel %vm1664_vm15, %v4483_v57, %v4485_v35  ;;  %4696 = vrot.lane.b32.xlu0 %v4664_v48, %s5503_s19  ;;  %v3854_v48 = vmul.f32 %v8905_v63, %v8156_v2 }
 0xba7   : > { %v8375_v42 = vadd.f32 %v4500_v41, %v4407_v36  ;;  %v8377_v12 = vadd.f32 %v4501_v14, %v4408_v17  ;;  %4698 = vrot.lane.b32.xlu1 %v4665_v20, %s5503_s19  ;;  %v3883_v14 = vmul.f32 %v7898_v23, %v3855_v24 }
 0xba8   : > { %v3954_v34 = vpop.permute.xlu0 %3953  ;;  %v3882_v43 = vmul.f32 %v7898_v23, %v3854_v48 }
 0xba9   : > { %v3956_v21 = vpop.permute.xlu1 %3955 }
 0xbaa   : > { %v3969_v25 = vsel %vm577_vm10, %v3954_v34, %v3956_v21  ;;  %4700 = vrot.lane.b32.xlu0 %v4666_v10, %s5503_s19 }
 0xbab   : > { %v3985_v4 = vadd.f32 %v3969_v25, %v3880_v31  ;;  %4702 = vrot.lane.b32.xlu1 %v4667_v6, %s5503_s19 }
 0xbac   : > { %v4269_v56 = vpop.permute.xlu0 %4268 }
 0xbad   : > { %v4271_v59 = vpop.permute.xlu1 %4270 }
 0xbae   : > { %v4284_v16 = vsel %vm1229_vm13, %v4269_v56, %v4271_v59  ;;  %4749 = vperm.xlu0 %5228, %v4746_v28  }
 0xbb0   : > { %v3958_v1 = vpop.permute.xlu0 %3957 }
 0xbb1   : > { %v3970_v53 = vsel %vm577_vm10, %v3956_v21, %v3958_v1  ;;  %v4065_v9 = vpop.permute.xlu1 %4064 }
 0xbb2   : > { %v3986_v55 = vadd.f32 %v3970_v53, %v3881_v11 }
 0xbb4   : > { %v4273_v5 = vpop.permute.xlu0 %4272 }
 0xbb5   : > { %v4285_v51 = vsel %vm1229_vm13, %v4271_v59, %v4273_v5  ;;  %v4174_v45 = vpop.permute.xlu1 %4173 }
 0xbb8   : > { %v4063_v54 = vpop.permute.xlu0 %4062 }
 0xbb9   : > { %v4078_v29 = vsel %vm801_vm11, %v4063_v54, %v4065_v9  ;;  %v4380_v49 = vpop.permute.xlu1 %4379 }
 0xbba   : > { %v4094_v58 = vadd.f32 %v4078_v29, %v3985_v4 }
 0xbbc   : > { %v4172_v38 = vpop.permute.xlu0 %4171 }
 0xbbd   : > { %v4187_v50 = vsel %vm1028_vm12, %v4172_v38, %v4174_v45  ;;  %v4489_v61 = vpop.permute.xlu1 %4488 }
 0xbbe   : > { %v4203_v7 = vadd.f32 %v4187_v50, %v4094_v58 }
 0xbc0   : > { %v4378_v33 = vpop.permute.xlu0 %4377  ;;  %v4300_v32 = vadd.f32 %v4284_v16, %v4203_v7 }
 0xbc1   : > { %v4393_v13 = vsel %vm1439_vm14, %v4378_v33, %v4380_v49  ;;  %v3960_v52 = vpop.permute.xlu1 %3959 }
 0xbc2   : > { %v4409_v22 = vadd.f32 %v4393_v13, %v4300_v32 }
 0xbc4   : > { %v4487_v37 = vpop.permute.xlu0 %4486 }
 0xbc5   : > { %v4502_v19 = vsel %vm1664_vm15, %v4487_v37, %v4489_v61  ;;  %v4275_v18 = vpop.permute.xlu1 %4274 }
 0xbc6   : > { %v8396_v27 = vadd.f32 %v4502_v19, %v4409_v22 }
 0xbc8   : > { %v4067_v0 = vpop.permute.xlu0 %4066 }
 0xbc9   : > { %v4079_v8 = vsel %vm801_vm11, %v4065_v9, %v4067_v0  ;;  %v3964_v39 = vpop.permute.xlu1 %3963 }
 0xbca   : > { %v4095_v62 = vadd.f32 %v4079_v8, %v3986_v55 }
 0xbcc   : > { %v4176_v40 = vpop.permute.xlu0 %4175 }
 0xbcd   : > { %v4188_v46 = vsel %vm1028_vm12, %v4174_v45, %v4176_v40  ;;  %v4279_v26 = vpop.permute.xlu1 %4278 }
 0xbce   : > { %v4204_v36 = vadd.f32 %v4188_v46, %v4095_v62 }
 0xbd0   : > { %v4382_v17 = vpop.permute.xlu0 %4381  ;;  %v4301_v35 = vadd.f32 %v4285_v51, %v4204_v36 }
 0xbd1   : > { %v4394_v57 = vsel %vm1439_vm14, %v4380_v49, %v4382_v17  ;;  %v4069_v20 = vpop.permute.xlu1 %4068 }
 0xbd2   : > { %v4410_v15 = vadd.f32 %v4394_v57, %v4301_v35 }
 0xbd4   : > { %v3962_v41 = vpop.permute.xlu0 %3961 }
 0xbd5   : > { %v3971_v34 = vsel %vm577_vm10, %v3960_v52, %v3962_v41  ;;  %v3972_v10 = vsel %vm577_vm10, %v3962_v41, %v3964_v39  ;;  %v4178_v31 = vpop.permute.xlu1 %4177 }
 0xbd6   : > { %v3987_v21 = vadd.f32 %v3971_v34, %v3882_v43  ;;  %v3988_v6 = vadd.f32 %v3972_v10, %v3883_v14 }
 0xbd8   : > { %v4277_v2 = vpop.permute.xlu0 %4276 }
 0xbd9   : > { %v8409_v63 = vpop.permute.xlu1 %4383  ;;  %v4286_v1 = vsel %vm1229_vm13, %v4275_v18, %v4277_v2  ;;  %v4287_v9 = vsel %vm1229_vm13, %v4277_v2, %v4279_v26 }
 0xbdc   : > { %v4071_v60 = vpop.permute.xlu0 %4070 }
 0xbdd   : > { %v4080_v47 = vsel %vm801_vm11, %v4069_v20, %v4071_v60  ;;  %v4073_v25 = vpop.permute.xlu1 %4072 }
 0xbde   : > { %v4096_v4 = vadd.f32 %v4080_v47, %v3987_v21  ;;  %v4081_v28 = vsel %vm801_vm11, %v4071_v60, %v4073_v25 }
 0xbdf   : > { %v4097_v44 = vadd.f32 %v4081_v28, %v3988_v6 }
 0xbe0   : > { %v4180_v56 = vpop.permute.xlu0 %4179 }
 0xbe1   : > { %v4189_v23 = vsel %vm1028_vm12, %v4178_v31, %v4180_v56  ;;  %v4182_v59 = vpop.permute.xlu1 %4181 }
 0xbe2   : > { %v4205_v16 = vadd.f32 %v4189_v23, %v4096_v4  ;;  %v4190_v11 = vsel %vm1028_vm12, %v4180_v56, %v4182_v59 }
 0xbe3   : > { %v4206_v53 = vadd.f32 %v4190_v11, %v4097_v44 }
 0xbe4   : > { %v4386_v55 = vpop.permute.xlu0 %4385  ;;  %v4302_v5 = vadd.f32 %v4286_v1, %v4205_v16 }
 0xbe5   : > { %v4303_v51 = vadd.f32 %v4287_v9, %v4206_v53  ;;  %v4388_v45 = vpop.permute.xlu1 %4387  ;;  %v4395_v25 = vsel %vm1439_vm14, %v8409_v63, %v4386_v55 }
 0xbe6   : > { %v4396_v28 = vsel %vm1439_vm14, %v4386_v55, %v4388_v45  ;;  %v4411_v59 = vadd.f32 %v4395_v25, %v4302_v5  ;;  %v8912_v25 = vlaneseq }
 0xbe7   : > { %v4412_v53 = vadd.f32 %v4396_v28, %v4303_v51 }
 0xbe8   : > { %v4491_v54 = vpop.permute.xlu0 %4490  ;;  %vm4790_vm2 = vcmp.lt.s32.totalorder %v8912_v25, 256 }
 0xbe9   : > { %v4503_v29 = vsel %vm1664_vm15, %v4489_v61, %v4491_v54  ;;  %v4572_v49 = vpop.permute.xlu1 %4571 }
 0xbea   : > { %v4519_v58 = vadd.f32 %v4503_v29, %v4410_v15 }
 0xbec   : > { %v4574_v38 = vpop.permute.xlu0 %4573 }
 0xbed   : > { %v4576_v50 = vpop.permute.xlu1 %4575  ;;  %v4595_v62 = vsel %vm1865_vm0, %v4572_v49, %v4574_v38 }
 0xbee   : > { %v4611_v26 = vadd.f32 %v4595_v62, %v8292_v3  ;;  %v4596_v36 = vsel %vm1865_vm0, %v4574_v38, %v4576_v50 }
 0xbef   : > { %v4612_v43 = vadd.f32 %v4596_v36, %v8294_v30 }
 0xbf0   : > { %v4578_v7 = vpop.permute.xlu0 %4577 }
 0xbf1   : > { %v4580_v33 = vpop.permute.xlu1 %4579 }
 0xbf2   : > { %v4597_v61 = vsel %vm1865_vm0, %v4578_v7, %v4580_v33 }
 0xbf3   : > { %v4613_v17 = vadd.f32 %v4597_v61, %v8375_v42 }
 0xbf4   : > { %v4582_v32 = vpop.permute.xlu0 %4581 }
 0xbf5   : > { %v4493_v13 = vpop.permute.xlu1 %4492  ;;  %v4598_v35 = vsel %vm1865_vm0, %v4580_v33, %v4582_v32 }
 0xbf6   : > { %v4614_v41 = vadd.f32 %v4598_v35, %v8377_v12  ;;  %v8910_v35 = vld [vmem:[#allocation4_spill] sm:$0xff] }
 0xbf8   : > { %v4495_v52 = vpop.permute.xlu0 %4494 }
 0xbf9   : > { %v4497_v22 = vpop.permute.xlu1 %4496  ;;  %v4504_v44 = vsel %vm1664_vm15, %v4493_v13, %v4495_v52 }
 0xbfa   : > { %v4505_v16 = vsel %vm1664_vm15, %v4495_v52, %v4497_v22  ;;  %v4520_v29 = vadd.f32 %v4504_v44, %v4411_v59 }
 0xbfb   : > { %v4521_v49 = vadd.f32 %v4505_v16, %v4412_v53 }
 0xbfc   : > { %v4584_v37 = vpop.permute.xlu0 %4583 }
 0xbfd   : > { %v4586_v19 = vpop.permute.xlu1 %4585 }
 0xbfe   : > { %v4599_v60 = vsel %vm1865_vm0, %v4584_v37, %v4586_v19 }
 0xbff   : > { %v4615_v30 = vadd.f32 %v4599_v60, %v8396_v27 }
 0xc00   : > { %v4588_v18 = vpop.permute.xlu0 %4587 }
 0xc01   : > { %v4681_v0 = vpop.permute.xlu1 %4680  ;;  %v4600_v12 = vsel %vm1865_vm0, %v4586_v19, %v4588_v18 }
 0xc02   : > { %v4616_v11 = vadd.f32 %v4600_v12, %v4519_v58 }
 0xc04   : > { %v4683_v8 = vpop.permute.xlu0 %4682 }
 0xc05   : > { %v4685_v39 = vpop.permute.xlu1 %4684  ;;  %v4704_v40 = vsel %vm2075_vm1, %v4681_v0, %v4683_v8 }
 0xc06   : > { %v4720_v57 = vadd.f32 %v4704_v40, %v4611_v26  ;;  %v4705_v20 = vsel %vm2075_vm1, %v4683_v8, %v4685_v39 }
 0xc07   : > { %v4721_v31 = vadd.f32 %v4705_v20, %v4612_v43 }
 0xc08   : > { %v4687_v46 = vpop.permute.xlu0 %4686 }
 0xc09   : > { %v4689_v48 = vpop.permute.xlu1 %4688 }
 0xc0a   : > { %v4706_v24 = vsel %vm2075_vm1, %v4687_v46, %v4689_v48 }
 0xc0b   : > { %v4722_v15 = vadd.f32 %v4706_v24, %v4613_v17 }
 0xc0c   : > { %v4691_v14 = vpop.permute.xlu0 %4690 }
 0xc0d   : > { %v4728_v34 = vadd.f32 %v4722_v15, %v4720_v57  ;;  %v4707_v3 = vsel %vm2075_vm1, %v4689_v48, %v4691_v14  ;;  %v4590_v10 = vpop.permute.xlu1 %4589 }
 0xc0e   : > { %v4723_v42 = vadd.f32 %v4707_v3, %v4614_v41  ;;  %v5504_v3 = vmov 1966171168  }
 0xc10   : > { %v4737_v21 = vadd.f32 %v4723_v42, %v4721_v31  ;;  %v4592_v6 = vpop.permute.xlu0 %4591 }
 0xc11   : > { %v4594_v2 = vpop.permute.xlu1 %4593  ;;  %v4601_v63 = vsel %vm1865_vm0, %v4590_v10, %v4592_v6  ;;  %v4774_v10 = vunpack.c.l.s4 %v5504_v3 }
 0xc12   : > { %v4602_v55 = vsel %vm1865_vm0, %v4592_v6, %v4594_v2  ;;  %v4617_v38 = vadd.f32 %v4601_v63, %v4520_v29 }
 0xc13   : > { %v4618_v5 = vadd.f32 %v4602_v55, %v4521_v49  ;;  %v4775_v31 = vunpack.c.0.s8 %v4774_v10 }
 0xc14   : > { %v4693_v47 = vpop.permute.xlu0 %4692 }
 0xc15   : > { %v4695_v4 = vpop.permute.xlu1 %4694 }
 0xc16   : > { %v4708_v56 = vsel %vm2075_vm1, %v4693_v47, %v4695_v4 }
 0xc17   : > { %v4724_v23 = vadd.f32 %v4708_v56, %v4615_v30 }
 0xc18   : > { %v4697_v1 = vpop.permute.xlu0 %4696 }
 0xc19   : > { %v4729_v9 = vadd.f32 %v4728_v34, %v4724_v23  ;;  %v4709_v27 = vsel %vm2075_vm1, %v4695_v4, %v4697_v1  ;;  %v4699_v54 = vpop.permute.xlu1 %4698 }
 0xc1a   : > { %v4725_v45 = vadd.f32 %v4709_v27, %v4616_v11 }
 0xc1c   : > { %v4738_v50 = vadd.f32 %v4737_v21, %v4725_v45  ;;  %v4701_v7 = vpop.permute.xlu0 %4700  ;;  %v8911_v21 = vld [vmem:[#allocation3_spill] sm:$0xff] }
 0xc1d   : > { %v4710_v33 = vsel %vm2075_vm1, %v4699_v54, %v4701_v7  ;;  %v4703_v58 = vpop.permute.xlu1 %4702  ;;  %v4778_v6 = vsub.s32 %v4775_v31, %v8911_v21 }
 0xc1e   : > { %v4726_v32 = vadd.f32 %v4710_v33, %v4617_v38  ;;  %v4711_v51 = vsel %vm2075_vm1, %v4701_v7, %v4703_v58 }
 0xc1f   : > { %v4727_v13 = vadd.f32 %v4711_v51, %v4618_v5 }
 0xc20   : > { %v4730_v52 = vadd.f32 %v4729_v9, %v4726_v32 }
 0xc21   : > { %v4739_v22 = vadd.f32 %v4738_v50, %v4727_v13 }
 0xc22   : > { %v4731_v37 = vrot.slane %v4730_v52, 4 }
 0xc23   : > { %v4740_v19 = vrot.slane %v4739_v22, 4 }
 0xc24   : > { %v4732_v18 = vadd.f32 %v4731_v37, %v4730_v52 }
 0xc25   : > { %v4741_v0 = vadd.f32 %v4740_v19, %v4739_v22 }
 0xc26   : > { %v4733_v8 = vrot.slane %v4732_v18, 2 }
 0xc27   : > { %v4742_v39 = vrot.slane %v4741_v0, 2 }
 0xc28   : > { %v4734_v62 = vadd.f32 %v4733_v8, %v4732_v18 }
 0xc29   : > { %v4743_v61 = vadd.f32 %v4742_v39, %v4741_v0 }
 0xc2a   : > { %v4735_v40 = vrot.slane %v4734_v62, 1 }
 0xc2b   : > { %v4744_v46 = vrot.slane %v4743_v61, 1 }
 0xc2c   : > { %v4736_v17 = vadd.f32 %v4735_v40, %v4734_v62 }
 0xc2d   : > { %v4750_v26 = vpop.permute.xlu0 %4749  ;;  %v4745_v36 = vadd.f32 %v4744_v46, %v4743_v61 }
 0xc2e   : > { %v4755_v48 = vrot.slane %v4750_v26, %v8910_v35 }
 0xc30   : > { %v4756_v24 = vadd.f32 %v4755_v48, %v4736_v17  ;;  %v4757_v57 = vadd.f32 %v4755_v48, %v4745_v36 }
 0xc32   : > { %v5002_v20 = vmul.f32 -1.442695, %v4756_v24  ;;  %v5003_v15 = vmul.f32 -1.442695, %v4757_v57 }
 0xc34   : > { %5471 = vpow2.f32 %v5002_v20 }
 0xc35   : > { %5473 = vpow2.f32 %v5003_v15 }
 0xc3e   : > { %v5472_v43 = vpop.eup %5471 }
 0xc3f   : > { %v5474_v41 = vpop.eup %5473  ;;  %v4764_v14 = vadd.f32 1.0, %v5472_v43 }
 0xc40   : > { %v4765_v34 = vadd.f32 1.0, %v5474_v41 }
 0xc41   : > { %5475 = vrcp.f32 %v4764_v14 }
 0xc42   : > { %5477 = vrcp.f32 %v4765_v34 }
 0xc4b   : > { %v5476_v42 = vpop.eup %5475 }
 0xc4c   : > { %v5478_v2 = vpop.eup %5477 }
 0xc4d   : > { %v4772_v60 = vcombine.low %v5476_v42, %v5478_v2 }
 0xc4f   : > { %v4779_v47 = vrot.slane %v4772_v60, %v4778_v6 }
 0xc51   : > { %v4786_v30 = vrot.slane %v4779_v47, %v4778_v6 }
 0xc53   : > { %4792 = vst.msk [vmem:[%s319_s22] sm:$0x3] %vm4790_vm2, %v4786_v30 }
 0xc54 PF: > { %s20_s29 = sadd.s32 1, %s5485_s29  }
 0xc55   : > { %p17_p4 = scmp.ge.s32.totalorder %s20_s29, 4  }
 0xc57   :  { %19 = sbr.rel (!%p17_p4) target bundleno = 3 (0x3), region = 109 }

</bundles_post_ra>
